<compile_context>
chip_gen: v7x
topology: tpu7x:2x2x1
jax: 0.10.0
libtpu: 0.0.40
codegen_flags: <defaults>
</compile_context>

<pallas_src>
import functools
import math

import jax
import jax.numpy as jnp
from jax.experimental import pallas as pl
from jax.experimental.pallas import tpu as pltpu

NEG_LARGE = -1e30  # finite "minus infinity": avoids NaN on fully-masked rows
VMEM_LIMIT = 32 * 1024 * 1024  # scoped-VMEM budget; safe on v5e/v6e/v7x


# ----------------------------- tiling helper -------------------------------


def _tile(dim, pref, aligns):
    """Largest tile <= pref that divides `dim` and is a multiple of one of
    `aligns` (tried in order); falls back to the full dimension (always legal)."""
    if dim <= pref:
        return dim
    for align in aligns:
        t = (pref // align) * align
        while t >= align:
            if dim % t == 0:
                return t
            t -= align
    return dim


# --------------------------- dense (matmul) kernels -------------------------


def _linear_kernel(nk, relu, x_ref, w_ref, b_ref, o_ref, acc_ref):
    @pl.when(pl.program_id(2) == 0)
    def _():
        acc_ref[...] = jnp.zeros_like(acc_ref)

    acc_ref[...] += jnp.dot(
        x_ref[...], w_ref[...], preferred_element_type=jnp.float32
    )

    @pl.when(pl.program_id(2) == nk - 1)
    def _():
        y = acc_ref[...] + b_ref[...]
        if relu:
            y = jnp.maximum(y, 0.0)
        o_ref[...] = y.astype(o_ref.dtype)


def linear(x2d, w, b2d, relu=False, out_dtype=jnp.bfloat16):
    """y = x @ w + b (optionally ReLU).
    x2d: (M,K) bf16 activations, w: (K,N) bf16 weights (stored bf16 at init),
    b: (1,N) f32.  f32 VMEM accumulator; output emitted directly in out_dtype
    (bf16 for activations feeding the next matmul, f32 for the final logits)."""
    M, K = x2d.shape
    N = w.shape[1]
    tm = _tile(M, 512, (16,))        # bf16 sublane packing -> tm multiple of 16
    tn = _tile(N, 512, (256, 128))   # 256-multiples fill the 2x256 MXU (v6e/v7x)
    tk = _tile(K, 512, (256, 128))
    nk = K // tk
    return pl.pallas_call(
        functools.partial(_linear_kernel, nk, relu),
        out_shape=jax.ShapeDtypeStruct((M, N), out_dtype),
        grid=(M // tm, N // tn, nk),
        in_specs=[
            pl.BlockSpec((tm, tk), lambda i, j, k: (i, k)),
            pl.BlockSpec((tk, tn), lambda i, j, k: (k, j)),
            pl.BlockSpec((1, tn), lambda i, j, k: (0, j)),
        ],
        out_specs=pl.BlockSpec((tm, tn), lambda i, j, k: (i, j)),
        scratch_shapes=[pltpu.VMEM((tm, tn), jnp.float32)],
        compiler_params=pltpu.CompilerParams(
            dimension_semantics=("parallel", "parallel", "arbitrary"),
            vmem_limit_bytes=VMEM_LIMIT,
        ),
    )(x2d, w, b2d)


def _linear_res_ln_kernel(
    nk, eps, x_ref, w_ref, b_ref, r_ref, g_ref, beta_ref, o_ref, acc_ref
):
    @pl.when(pl.program_id(1) == 0)
    def _():
        acc_ref[...] = jnp.zeros_like(acc_ref)

    acc_ref[...] += jnp.dot(
        x_ref[...], w_ref[...], preferred_element_type=jnp.float32
    )

    @pl.when(pl.program_id(1) == nk - 1)
    def _():
        y = acc_ref[...] + b_ref[...] + r_ref[...].astype(jnp.float32)
        mean = jnp.mean(y, axis=-1, keepdims=True)
        var = jnp.mean(jnp.square(y - mean), axis=-1, keepdims=True)
        out = (y - mean) * jax.lax.rsqrt(var + eps) * g_ref[...] + beta_ref[...]
        o_ref[...] = out.astype(o_ref.dtype)


def linear_res_ln(x2d, w, b2d, res2d, gamma, beta, eps):
    """LayerNorm(x @ w + b + residual), emitted as bf16.
    Output width N kept whole per tile (row reduction); K tiled with an f32
    accumulator.  LN math in f32.
    TODO(synk): on v7x (64 MiB VMEM) with very large d_model, drop tk/tm or
    split into matmul + separate LN kernels if the full-N layout exceeds the
    scoped-VMEM budget; at typical d_model it fits comfortably."""
    M, K = x2d.shape
    N = w.shape[1]
    tm = _tile(M, 512, (16,))
    tk = _tile(K, 512, (256, 128))
    nk = K // tk
    return pl.pallas_call(
        functools.partial(_linear_res_ln_kernel, nk, eps),
        out_shape=jax.ShapeDtypeStruct((M, N), jnp.bfloat16),
        grid=(M // tm, nk),
        in_specs=[
            pl.BlockSpec((tm, tk), lambda i, k: (i, k)),
            pl.BlockSpec((tk, N), lambda i, k: (k, 0)),
            pl.BlockSpec((1, N), lambda i, k: (0, 0)),
            pl.BlockSpec((tm, N), lambda i, k: (i, 0)),
            pl.BlockSpec((1, N), lambda i, k: (0, 0)),
            pl.BlockSpec((1, N), lambda i, k: (0, 0)),
        ],
        out_specs=pl.BlockSpec((tm, N), lambda i, k: (i, 0)),
        scratch_shapes=[pltpu.VMEM((tm, N), jnp.float32)],
        compiler_params=pltpu.CompilerParams(
            dimension_semantics=("parallel", "arbitrary"),
            vmem_limit_bytes=VMEM_LIMIT,
        ),
    )(x2d, w, b2d, res2d, gamma, beta)


# ------------------------------ attention kernels ---------------------------


def _mha_heads(q, k, v, mask, scale, n_heads, o_ref):
    """Multi-head attention over one batch element.
    q: (Sq,D) bf16, k/v: (Skv,D) bf16, mask: additive f32 broadcastable to
    (Sq,Skv).  Each head's output is stored straight into its lane range of
    o_ref (bounds live ranges, no lane concatenation)."""
    D = q.shape[1]
    dh = D // n_heads
    for h in range(n_heads):
        sl = slice(h * dh, (h + 1) * dh)
        qh = q[:, sl].astype(jnp.bfloat16)
        kh = k[:, sl].astype(jnp.bfloat16)
        vh = v[:, sl].astype(jnp.bfloat16)
        # q @ k^T without an explicit transpose: bf16 operands, f32 accumulate.
        s = jax.lax.dot_general(
            qh, kh, (((1,), (1,)), ((), ())), preferred_element_type=jnp.float32
        )
        s = s * scale + mask
        s = s - jnp.max(s, axis=-1, keepdims=True)
        p = jnp.exp(s)
        p = p * pl.reciprocal(jnp.sum(p, axis=-1, keepdims=True), approx=True)
        oh = jax.lax.dot_general(
            p.astype(jnp.bfloat16), vh, (((1,), (0,)), ((), ())),
            preferred_element_type=jnp.float32,
        )
        o_ref[0, :, sl] = oh.astype(o_ref.dtype)


def _self_attn_kernel(scale, n_heads, causal, qkv_ref, m_ref, o_ref):
    S = qkv_ref.shape[1]
    D = qkv_ref.shape[2] // 3
    qkv = qkv_ref[0]          # (S, 3D) bf16; slice in-kernel (no HBM round trip)
    q = qkv[:, :D]
    k = qkv[:, D:2 * D]
    v = qkv[:, 2 * D:]
    mask = m_ref[0]           # (1, S) additive key-padding mask (0 / -1e30)
    if causal:
        rows = jax.lax.broadcasted_iota(jnp.int32, (S, S), 0)
        cols = jax.lax.broadcasted_iota(jnp.int32, (S, S), 1)
        # Combined once before the head loop.  Padded AND future positions sum
        # to -2e30: intentional (still finite in f32, NaN-safe for pad rows).
        mask = mask + jnp.where(cols > rows, NEG_LARGE, 0.0)
    _mha_heads(q, k, v, mask, scale, n_heads, o_ref)


def self_attention(qkv, key_mask, n_heads, causal):
    """qkv: (B,S,3D) bf16 fused projections, key_mask: (B,1,S) additive f32."""
    B, S, D3 = qkv.shape
    D = D3 // 3
    scale = 1.0 / math.sqrt(D // n_heads)
    # TODO(synk): for long sequences (esp. v7x's 64 MiB VMEM) this should be a
    # flash-tiled kernel (Skv grid axis + online-softmax VMEM scratch); at
    # these S the full (S,S) score tile fits easily.
    return pl.pallas_call(
        functools.partial(_self_attn_kernel, scale, n_heads, causal),
        out_shape=jax.ShapeDtypeStruct((B, S, D), jnp.bfloat16),
        grid=(B,),
        in_specs=[
            pl.BlockSpec((1, S, D3), lambda b: (b, 0, 0)),
            pl.BlockSpec((1, 1, S), lambda b: (b, 0, 0)),
        ],
        out_specs=pl.BlockSpec((1, S, D), lambda b: (b, 0, 0)),
        compiler_params=pltpu.CompilerParams(
            dimension_semantics=("parallel",),
            vmem_limit_bytes=VMEM_LIMIT,
        ),
    )(qkv, key_mask)


def _cross_attn_kernel(scale, n_heads, q_ref, kv_ref, m_ref, o_ref):
    D = q_ref.shape[2]
    q = q_ref[0]              # (Sq, D) bf16
    kv = kv_ref[0]            # (Skv, 2D) bf16; split in-kernel
    k = kv[:, :D]
    v = kv[:, D:]
    mask = m_ref[0]           # (1, Skv)
    _mha_heads(q, k, v, mask, scale, n_heads, o_ref)


def cross_attention(q, kv, key_mask, n_heads):
    """q: (B,Sq,D) bf16, kv: (B,Skv,2D) bf16, key_mask: (B,1,Skv) additive."""
    B, Sq, D = q.shape
    Skv = kv.shape[1]
    scale = 1.0 / math.sqrt(D // n_heads)
    return pl.pallas_call(
        functools.partial(_cross_attn_kernel, scale, n_heads),
        out_shape=jax.ShapeDtypeStruct((B, Sq, D), jnp.bfloat16),
        grid=(B,),
        in_specs=[
            pl.BlockSpec((1, Sq, D), lambda b: (b, 0, 0)),
            pl.BlockSpec((1, Skv, 2 * D), lambda b: (b, 0, 0)),
            pl.BlockSpec((1, 1, Skv), lambda b: (b, 0, 0)),
        ],
        out_specs=pl.BlockSpec((1, Sq, D), lambda b: (b, 0, 0)),
        compiler_params=pltpu.CompilerParams(
            dimension_semantics=("parallel",),
            vmem_limit_bytes=VMEM_LIMIT,
        ),
    )(q, kv, key_mask)


# ----------------------------- Parameter init ------------------------------


def init_linear(key, d_in, d_out):
    k1, k2 = jax.random.split(key)
    return {
        # Weights stored bf16 once (no per-call converts); biases stay f32.
        "w": (jax.random.normal(k1, (d_in, d_out), jnp.float32) * 0.02).astype(
            jnp.bfloat16
        ),
        "b": jax.random.normal(k2, (1, d_out), jnp.float32) * 0.02,
    }


def init_ln(d):
    return {"g": jnp.ones((1, d), jnp.float32), "b": jnp.zeros((1, d), jnp.float32)}


def init_self_attn(key, d_model):
    ks = jax.random.split(key, 2)
    qkv = init_linear(ks[0], d_model, 3 * d_model)  # fused Wq|Wk|Wv
    out = init_linear(ks[1], d_model, d_model)
    return {"w_qkv": qkv["w"], "b_qkv": qkv["b"], "w_o": out["w"], "b_o": out["b"]}


def init_cross_attn(key, d_model):
    ks = jax.random.split(key, 3)
    q = init_linear(ks[0], d_model, d_model)
    kv = init_linear(ks[1], d_model, 2 * d_model)  # fused Wk|Wv
    out = init_linear(ks[2], d_model, d_model)
    return {
        "w_q": q["w"], "b_q": q["b"],
        "w_kv": kv["w"], "b_kv": kv["b"],
        "w_o": out["w"], "b_o": out["b"],
    }


def init_params(key, vocab_size, max_seq_len, d_model, n_layers, ffn_hidden):
    keys = jax.random.split(key, 2 + 2 * n_layers)
    params = {}
    params["tok_emb"] = (
        jax.random.normal(keys[0], (vocab_size, d_model), jnp.float32) * 0.02
    )
    # Sinusoidal positional encoding.
    pos = jnp.arange(max_seq_len, dtype=jnp.float32)[:, None]
    i = jnp.arange(d_model, dtype=jnp.float32)[None, :]
    angle = pos / jnp.power(10000.0, (2.0 * jnp.floor(i / 2.0)) / d_model)
    params["pos_enc"] = jnp.where(
        (jnp.arange(d_model)[None, :] % 2) == 0, jnp.sin(angle), jnp.cos(angle)
    ).astype(jnp.float32)

    encoders, decoders = [], []
    for l in range(n_layers):
        ek = jax.random.split(keys[1 + l], 3)
        encoders.append(
            {
                "attn": init_self_attn(ek[0], d_model),
                "ff1": init_linear(ek[1], d_model, ffn_hidden),
                "ff2": init_linear(ek[2], ffn_hidden, d_model),
                "ln1": init_ln(d_model),
                "ln2": init_ln(d_model),
            }
        )
        dk = jax.random.split(keys[1 + n_layers + l], 4)
        decoders.append(
            {
                "self_attn": init_self_attn(dk[0], d_model),
                "cross_attn": init_cross_attn(dk[1], d_model),
                "ff1": init_linear(dk[2], d_model, ffn_hidden),
                "ff2": init_linear(dk[3], ffn_hidden, d_model),
                "ln1": init_ln(d_model),
                "ln2": init_ln(d_model),
                "ln3": init_ln(d_model),
            }
        )
    params["encoders"] = encoders
    params["decoders"] = decoders
    params["out"] = init_linear(keys[-1], d_model, vocab_size)
    return params


# ------------------------------ Model forward ------------------------------


def embed(params, tokens, d_model):
    # TODO(synk): `word_embedding` implementation not provided in the reference;
    # using token embedding * sqrt(d_model) + sinusoidal positional encoding.
    S = tokens.shape[1]
    x = params["tok_emb"][tokens] * math.sqrt(d_model) + params["pos_enc"][:S]
    return x.astype(jnp.bfloat16)  # activations flow as bf16 (f32 accumulation)


def key_padding_mask(tokens, pad_id):
    """(B,1,S) additive key mask: 0 for keep, -1e30 where the key is <pad>."""
    B, S = tokens.shape
    keep = tokens != pad_id
    return jnp.where(keep, 0.0, NEG_LARGE).astype(jnp.float32).reshape(B, 1, S)


def self_attention_block(x2d, shape, key_mask, p, n_heads, causal):
    """Fused QKV projection + multi-head attention.  Returns (B*S, D) bf16."""
    B, S, D = shape
    qkv = linear(x2d, p["w_qkv"], p["b_qkv"])  # (B*S, 3D) bf16, one matmul
    # Fed straight to the attention kernel; q/k/v sliced in-kernel.
    out = self_attention(qkv.reshape(B, S, 3 * D), key_mask, n_heads, causal)
    return out.reshape(B * S, D)


def encoder_layer(x2d, shape, key_mask, p, n_heads, eps):
    attn = self_attention_block(x2d, shape, key_mask, p["attn"], n_heads, False)
    x2d = linear_res_ln(
        attn, p["attn"]["w_o"], p["attn"]["b_o"], x2d,
        p["ln1"]["g"], p["ln1"]["b"], eps,
    )
    h = linear(x2d, p["ff1"]["w"], p["ff1"]["b"], relu=True)
    x2d = linear_res_ln(
        h, p["ff2"]["w"], p["ff2"]["b"], x2d, p["ln2"]["g"], p["ln2"]["b"], eps
    )
    return x2d


def decoder_layer(x2d, enc2d, dec_shape, enc_shape, dec_key_mask, enc_key_mask,
                  p, n_heads, eps):
    B, S, D = dec_shape
    _, Skv, _ = enc_shape

    # Masked self-attention (padding key mask + in-kernel lookahead mask).
    # TODO(synk): Decoder.forward source not provided; standard combination used.
    attn = self_attention_block(
        x2d, dec_shape, dec_key_mask, p["self_attn"], n_heads, causal=True
    )
    x2d = linear_res_ln(
        attn, p["self_attn"]["w_o"], p["self_attn"]["b_o"], x2d,
        p["ln1"]["g"], p["ln1"]["b"], eps,
    )

    # Cross-attention: Q from decoder, fused K|V from encoder output.
    ca = p["cross_attn"]
    q = linear(x2d, ca["w_q"], ca["b_q"])          # (B*S, D) bf16
    kv = linear(enc2d, ca["w_kv"], ca["b_kv"])     # (B*Skv, 2D) bf16
    o = cross_attention(
        q.reshape(B, S, D), kv.reshape(B, Skv, 2 * D), enc_key_mask, n_heads
    ).reshape(B * S, D)
    x2d = linear_res_ln(
        o, ca["w_o"], ca["b_o"], x2d, p["ln2"]["g"], p["ln2"]["b"], eps
    )

    # Feed-forward.
    h = linear(x2d, p["ff1"]["w"], p["ff1"]["b"], relu=True)
    x2d = linear_res_ln(
        h, p["ff2"]["w"], p["ff2"]["b"], x2d, p["ln3"]["g"], p["ln3"]["b"], eps
    )
    return x2d


def make_forward(vocab, d_model, n_heads, eps):
    pad_id = vocab["<pad>"]
    eos_id = vocab["<eos>"]

    def forward(params, input_tokens, target_tokens):
        B, S_src = input_tokens.shape
        _, S_tgt = target_tokens.shape
        enc_shape = (B, S_src, d_model)
        dec_shape = (B, S_tgt, d_model)

        # ---- encoder stack (Transformer.encoder_output) ----
        enc_key_mask = key_padding_mask(input_tokens, pad_id)
        enc_x = embed(params, input_tokens, d_model).reshape(B * S_src, d_model)
        for p in params["encoders"]:
            enc_x = encoder_layer(enc_x, enc_shape, enc_key_mask, p, n_heads, eps)

        # ---- decoder stack ----
        dec_key_mask = key_padding_mask(target_tokens, pad_id)
        dec_x = embed(params, target_tokens, d_model).reshape(B * S_tgt, d_model)
        for p in params["decoders"]:
            dec_x = decoder_layer(
                dec_x, enc_x, dec_shape, enc_shape,
                dec_key_mask, enc_key_mask, p, n_heads, eps,
            )

        # Final vocab projection: logits in f32.
        logits = linear(
            dec_x, params["out"]["w"], params["out"]["b"], out_dtype=jnp.float32
        )
        # Permute kept in XLA: an in-kernel transposed store would only pay off
        # if S (or vocab) were a 128-multiple so the store stays lane-dense.
        logits = logits.reshape(B, S_tgt, -1).transpose(0, 2, 1)  # (B, vocab, S)
        return logits, eos_id, pad_id

    return forward


# ---------------------------------- main -----------------------------------

if __name__ == "__main__":
    # Small, forward-consistent shapes.
    vocab_list = ["<pad>", "<sos>", "<eos>", "<unk>"] + [f"w{i}" for i in range(12)]
    vocab = {tok: i for i, tok in enumerate(vocab_list)}
    V = len(vocab)
    max_seq_len = 8
    d_model = 32
    n_heads = 4
    n_layers = 2
    ffn_hidden_dim = 64
    eps = 1e-5
    batch = 2

    key = jax.random.PRNGKey(0)
    pkey, ikey, tkey = jax.random.split(key, 3)
    params = init_params(pkey, V, max_seq_len, d_model, n_layers, ffn_hidden_dim)

    # Token ids in [4, V); pad only at the tail.
    input_tokens = jax.random.randint(ikey, (batch, max_seq_len), 4, V, jnp.int32)
    input_tokens = input_tokens.at[:, -2:].set(vocab["<pad>"])
    target_tokens = jax.random.randint(tkey, (batch, max_seq_len), 4, V, jnp.int32)
    target_tokens = target_tokens.at[:, 0].set(vocab["<sos>"])
    target_tokens = target_tokens.at[:, -1].set(vocab["<pad>"])

    forward = jax.jit(make_forward(vocab, d_model, n_heads, eps))
    logits, eos_id, pad_id = forward(params, input_tokens, target_tokens)
    jax.block_until_ready(logits)

    assert logits.shape == (batch, V, max_seq_len)
    assert bool(jnp.all(jnp.isfinite(logits)))
    print("KERNEL_OK")
</pallas_src>

<mosaic_0001>
module attributes {stable_mosaic.version = 11 : i64} {
  func.func @_linear_kernel(%arg0: i32, %arg1: i32, %arg2: i32, %arg3: memref<16x32xbf16, #tpu.memory_space<vmem>>, %arg4: memref<32x96xbf16, #tpu.memory_space<vmem>>, %arg5: memref<1x96xf32, #tpu.memory_space<vmem>>, %arg6: memref<16x96xbf16, #tpu.memory_space<vmem>>, %arg7: memref<16x96xf32, #tpu.memory_space<vmem>>) attributes {dimension_semantics = [#tpu.dimension_semantics<parallel>, #tpu.dimension_semantics<parallel>, #tpu.dimension_semantics<arbitrary>], iteration_bounds = array<i64: 1, 1, 1>, scalar_prefetch = 0 : i64, scratch_operands = 1 : i64, tpu.core_type = #tpu.core_type<tc>, window_params = [{transform_indices = @transform_0, window_bounds = array<i64: 16, 32>}, {transform_indices = @transform_1, window_bounds = array<i64: 32, 96>}, {transform_indices = @transform_2, window_bounds = array<i64: 1, 96>}, {transform_indices = @transform_3, window_bounds = array<i64: 16, 96>}]} {
    %c0_i32 = arith.constant 0 : i32
    %0 = arith.cmpi eq, %arg2, %c0_i32 : i32
    %1 = arith.extui %0 : i1 to i32
    %c0_i32_0 = arith.constant 0 : i32
    %2 = arith.cmpi ne, %1, %c0_i32_0 : i32
    scf.if %2 {
      %cst_10 = arith.constant 0.000000e+00 : f32
      %12 = vector.broadcast %cst_10 : f32 to vector<16x96xf32>
      %c0_11 = arith.constant 0 : index
      %c0_12 = arith.constant 0 : index
      %13 = vector.load %arg7[%c0_11, %c0_12] : memref<16x96xf32, #tpu.memory_space<vmem>>, vector<16x96xf32>
      tpu.vector_store %arg7[%c0_11, %c0_12], %12 {strides = array<i32>} : memref<16x96xf32, #tpu.memory_space<vmem>>, vector<16x96xf32>,
    } else {
    }
    %c0 = arith.constant 0 : index
    %c0_1 = arith.constant 0 : index
    %3 = vector.load %arg7[%c0, %c0_1] : memref<16x96xf32, #tpu.memory_space<vmem>>, vector<16x96xf32>
    %c0_2 = arith.constant 0 : index
    %c0_3 = arith.constant 0 : index
    %4 = vector.load %arg3[%c0_2, %c0_3] : memref<16x32xbf16, #tpu.memory_space<vmem>>, vector<16x32xbf16>
    %c0_4 = arith.constant 0 : index
    %c0_5 = arith.constant 0 : index
    %5 = vector.load %arg4[%c0_4, %c0_5] : memref<32x96xbf16, #tpu.memory_space<vmem>>, vector<32x96xbf16>
    %cst = arith.constant dense<0.000000e+00> : vector<16x96xf32>
    %6 = tpu.matmul %4, %5, %cst {dimension_numbers = #tpu.dot_dimension_numbers<[1], [0], [0], [1], [0, 0, 1, 1], [], []>} : vector<16x32xbf16>, vector<32x96xbf16>, vector<16x96xf32> -> vector<16x96xf32>
    %7 = arith.addf %3, %6 : vector<16x96xf32>
    %c0_6 = arith.constant 0 : index
    %c0_7 = arith.constant 0 : index
    %8 = vector.load %arg7[%c0_6, %c0_7] : memref<16x96xf32, #tpu.memory_space<vmem>>, vector<16x96xf32>
    tpu.vector_store %arg7[%c0_6, %c0_7], %7 {strides = array<i32>} : memref<16x96xf32, #tpu.memory_space<vmem>>, vector<16x96xf32>,
    %c0_i32_8 = arith.constant 0 : i32
    %9 = arith.cmpi eq, %arg2, %c0_i32_8 : i32
    %10 = arith.extui %9 : i1 to i32
    %c0_i32_9 = arith.constant 0 : i32
    %11 = arith.cmpi ne, %10, %c0_i32_9 : i32
    scf.if %11 {
      %c0_10 = arith.constant 0 : index
      %c0_11 = arith.constant 0 : index
      %12 = vector.load %arg7[%c0_10, %c0_11] : memref<16x96xf32, #tpu.memory_space<vmem>>, vector<16x96xf32>
      %c0_12 = arith.constant 0 : index
      %c0_13 = arith.constant 0 : index
      %13 = vector.load %arg5[%c0_12, %c0_13] : memref<1x96xf32, #tpu.memory_space<vmem>>, vector<1x96xf32>
      %14 = vector.broadcast %13 : vector<1x96xf32> to vector<16x96xf32>
      %15 = arith.addf %12, %14 : vector<16x96xf32>
      %16 = arith.truncf %15 : vector<16x96xf32> to vector<16x96xbf16>
      %c0_14 = arith.constant 0 : index
      %c0_15 = arith.constant 0 : index
      %17 = vector.load %arg6[%c0_14, %c0_15] : memref<16x96xbf16, #tpu.memory_space<vmem>>, vector<16x96xbf16>
      tpu.vector_store %arg6[%c0_14, %c0_15], %16 {strides = array<i32>} : memref<16x96xbf16, #tpu.memory_space<vmem>>, vector<16x96xbf16>,
    } else {
    }
    return
  }
  func.func @transform_0(%arg0: i32, %arg1: i32, %arg2: i32) -> (i32, i32) {
    %c0_i32 = arith.constant 0 : i32
    return %arg0, %arg2 : i32, i32
  }
  func.func @transform_1(%arg0: i32, %arg1: i32, %arg2: i32) -> (i32, i32) {
    %c0_i32 = arith.constant 0 : i32
    return %arg2, %arg1 : i32, i32
  }
  func.func @transform_2(%arg0: i32, %arg1: i32, %arg2: i32) -> (i32, i32) {
    %c0_i32 = arith.constant 0 : i32
    %c0_i32_0 = arith.constant 0 : i32
    return %c0_i32, %arg1 : i32, i32
  }
  func.func @transform_3(%arg0: i32, %arg1: i32, %arg2: i32) -> (i32, i32) {
    %c0_i32 = arith.constant 0 : i32
    return %arg0, %arg1 : i32, i32
  }
}

module attributes {stable_mosaic.version = 11 : i64} {
  func.func @_self_attn_kernel(%arg0: i32, %arg1: memref<1x8x96xbf16, #tpu.memory_space<vmem>>, %arg2: memref<1x1x8xf32, #tpu.memory_space<vmem>>, %arg3: memref<1x8x32xbf16, #tpu.memory_space<vmem>>) attributes {dimension_semantics = [#tpu.dimension_semantics<parallel>], iteration_bounds = array<i64: 2>, scalar_prefetch = 0 : i64, scratch_operands = 0 : i64, tpu.core_type = #tpu.core_type<tc>, window_params = [{transform_indices = @transform_0, window_bounds = array<i64: 1, 8, 96>}, {transform_indices = @transform_1, window_bounds = array<i64: 1, 1, 8>}, {transform_indices = @transform_2, window_bounds = array<i64: 1, 8, 32>}]} {
    %c0 = arith.constant 0 : index
    %c0_0 = arith.constant 0 : index
    %c0_1 = arith.constant 0 : index
    %0 = vector.load %arg1[%c0, %c0_0, %c0_1] : memref<1x8x96xbf16, #tpu.memory_space<vmem>>, vector<1x8x96xbf16>
    %1 = vector.shape_cast %0 : vector<1x8x96xbf16> to vector<8x96xbf16>
    %2 = vector.extract_strided_slice %1 {offsets = [0, 0], sizes = [8, 32], strides = [1, 1]} : vector<8x96xbf16> to vector<8x32xbf16>
    %3 = vector.extract_strided_slice %1 {offsets = [0, 32], sizes = [8, 32], strides = [1, 1]} : vector<8x96xbf16> to vector<8x32xbf16>
    %4 = vector.extract_strided_slice %1 {offsets = [0, 64], sizes = [8, 32], strides = [1, 1]} : vector<8x96xbf16> to vector<8x32xbf16>
    %c0_2 = arith.constant 0 : index
    %c0_3 = arith.constant 0 : index
    %c0_4 = arith.constant 0 : index
    %5 = vector.load %arg2[%c0_2, %c0_3, %c0_4] : memref<1x1x8xf32, #tpu.memory_space<vmem>>, vector<1x1x8xf32>
    %6 = vector.shape_cast %5 : vector<1x1x8xf32> to vector<1x8xf32>
    %7 = vector.extract_strided_slice %2 {offsets = [0, 0], sizes = [8, 8], strides = [1, 1]} : vector<8x32xbf16> to vector<8x8xbf16>
    %8 = vector.extract_strided_slice %3 {offsets = [0, 0], sizes = [8, 8], strides = [1, 1]} : vector<8x32xbf16> to vector<8x8xbf16>
    %9 = vector.extract_strided_slice %4 {offsets = [0, 0], sizes = [8, 8], strides = [1, 1]} : vector<8x32xbf16> to vector<8x8xbf16>
    %cst = arith.constant dense<0.000000e+00> : vector<8x8xf32>
    %10 = tpu.matmul %7, %8, %cst {dimension_numbers = #tpu.dot_dimension_numbers<[1], [1], [0], [0], [0, 0, 1, 0], [], []>} : vector<8x8xbf16>, vector<8x8xbf16>, vector<8x8xf32> -> vector<8x8xf32>
    %cst_5 = arith.constant 0.353553385 : f32
    %11 = vector.broadcast %cst_5 : f32 to vector<8x8xf32>
    %12 = arith.mulf %10, %11 : vector<8x8xf32>
    %13 = vector.broadcast %6 : vector<1x8xf32> to vector<8x8xf32>
    %14 = arith.addf %12, %13 : vector<8x8xf32>
    %cst_6 = arith.constant dense<0xFF800000> : vector<8xf32>
    %15 = vector.multi_reduction <maximumf>, %14, %cst_6 [1] : vector<8x8xf32> to vector<8xf32>
    %16 = vector.shape_cast %15 : vector<8xf32> to vector<8x1xf32>
    %17 = vector.broadcast %16 : vector<8x1xf32> to vector<8x8xf32>
    %18 = arith.subf %14, %17 : vector<8x8xf32>
    %19 = math.exp %18 : vector<8x8xf32>
    %cst_7 = arith.constant dense<0.000000e+00> : vector<8xf32>
    %20 = vector.multi_reduction <add>, %19, %cst_7 [1] : vector<8x8xf32> to vector<8xf32>
    %21 = vector.shape_cast %20 : vector<8xf32> to vector<8x1xf32>
    %22 = tpu.reciprocal %21 {approx = true} : vector<8x1xf32> -> vector<8x1xf32>
    %23 = vector.broadcast %22 : vector<8x1xf32> to vector<8x8xf32>
    %24 = arith.mulf %19, %23 : vector<8x8xf32>
    %25 = arith.truncf %24 : vector<8x8xf32> to vector<8x8xbf16>
    %cst_8 = arith.constant dense<0.000000e+00> : vector<8x8xf32>
    %26 = tpu.matmul %25, %9, %cst_8 {dimension_numbers = #tpu.dot_dimension_numbers<[1], [0], [0], [1], [0, 0, 1, 1], [], []>} : vector<8x8xbf16>, vector<8x8xbf16>, vector<8x8xf32> -> vector<8x8xf32>
    %27 = arith.truncf %26 : vector<8x8xf32> to vector<8x8xbf16>
    %c0_9 = arith.constant 0 : index
    %c0_10 = arith.constant 0 : index
    %c0_11 = arith.constant 0 : index
    %28 = vector.load %arg3[%c0_9, %c0_10, %c0_11] : memref<1x8x32xbf16, #tpu.memory_space<vmem>>, vector<1x8x8xbf16>
    %29 = vector.shape_cast %28 : vector<1x8x8xbf16> to vector<8x8xbf16>
    %30 = vector.shape_cast %27 : vector<8x8xbf16> to vector<1x8x8xbf16>
    tpu.vector_store %arg3[%c0_9, %c0_10, %c0_11], %30 {strides = array<i32>} : memref<1x8x32xbf16, #tpu.memory_space<vmem>>, vector<1x8x8xbf16>,
    %31 = vector.extract_strided_slice %2 {offsets = [0, 8], sizes = [8, 8], strides = [1, 1]} : vector<8x32xbf16> to vector<8x8xbf16>
    %32 = vector.extract_strided_slice %3 {offsets = [0, 8], sizes = [8, 8], strides = [1, 1]} : vector<8x32xbf16> to vector<8x8xbf16>
    %33 = vector.extract_strided_slice %4 {offsets = [0, 8], sizes = [8, 8], strides = [1, 1]} : vector<8x32xbf16> to vector<8x8xbf16>
    %cst_12 = arith.constant dense<0.000000e+00> : vector<8x8xf32>
    %34 = tpu.matmul %31, %32, %cst_12 {dimension_numbers = #tpu.dot_dimension_numbers<[1], [1], [0], [0], [0, 0, 1, 0], [], []>} : vector<8x8xbf16>, vector<8x8xbf16>, vector<8x8xf32> -> vector<8x8xf32>
    %cst_13 = arith.constant 0.353553385 : f32
    %35 = vector.broadcast %cst_13 : f32 to vector<8x8xf32>
    %36 = arith.mulf %34, %35 : vector<8x8xf32>
    %37 = vector.broadcast %6 : vector<1x8xf32> to vector<8x8xf32>
    %38 = arith.addf %36, %37 : vector<8x8xf32>
    %cst_14 = arith.constant dense<0xFF800000> : vector<8xf32>
    %39 = vector.multi_reduction <maximumf>, %38, %cst_14 [1] : vector<8x8xf32> to vector<8xf32>
    %40 = vector.shape_cast %39 : vector<8xf32> to vector<8x1xf32>
    %41 = vector.broadcast %40 : vector<8x1xf32> to vector<8x8xf32>
    %42 = arith.subf %38, %41 : vector<8x8xf32>
    %43 = math.exp %42 : vector<8x8xf32>
    %cst_15 = arith.constant dense<0.000000e+00> : vector<8xf32>
    %44 = vector.multi_reduction <add>, %43, %cst_15 [1] : vector<8x8xf32> to vector<8xf32>
    %45 = vector.shape_cast %44 : vector<8xf32> to vector<8x1xf32>
    %46 = tpu.reciprocal %45 {approx = true} : vector<8x1xf32> -> vector<8x1xf32>
    %47 = vector.broadcast %46 : vector<8x1xf32> to vector<8x8xf32>
    %48 = arith.mulf %43, %47 : vector<8x8xf32>
    %49 = arith.truncf %48 : vector<8x8xf32> to vector<8x8xbf16>
    %cst_16 = arith.constant dense<0.000000e+00> : vector<8x8xf32>
    %50 = tpu.matmul %49, %33, %cst_16 {dimension_numbers = #tpu.dot_dimension_numbers<[1], [0], [0], [1], [0, 0, 1, 1], [], []>} : vector<8x8xbf16>, vector<8x8xbf16>, vector<8x8xf32> -> vector<8x8xf32>
    %51 = arith.truncf %50 : vector<8x8xf32> to vector<8x8xbf16>
    %c0_17 = arith.constant 0 : index
    %c0_18 = arith.constant 0 : index
    %c8 = arith.constant 8 : index
    %52 = vector.load %arg3[%c0_17, %c0_18, %c8] : memref<1x8x32xbf16, #tpu.memory_space<vmem>>, vector<1x8x8xbf16>
    %53 = vector.shape_cast %52 : vector<1x8x8xbf16> to vector<8x8xbf16>
    %54 = vector.shape_cast %51 : vector<8x8xbf16> to vector<1x8x8xbf16>
    tpu.vector_store %arg3[%c0_17, %c0_18, %c8], %54 {strides = array<i32>} : memref<1x8x32xbf16, #tpu.memory_space<vmem>>, vector<1x8x8xbf16>,
    %55 = vector.extract_strided_slice %2 {offsets = [0, 16], sizes = [8, 8], strides = [1, 1]} : vector<8x32xbf16> to vector<8x8xbf16>
    %56 = vector.extract_strided_slice %3 {offsets = [0, 16], sizes = [8, 8], strides = [1, 1]} : vector<8x32xbf16> to vector<8x8xbf16>
    %57 = vector.extract_strided_slice %4 {offsets = [0, 16], sizes = [8, 8], strides = [1, 1]} : vector<8x32xbf16> to vector<8x8xbf16>
    %cst_19 = arith.constant dense<0.000000e+00> : vector<8x8xf32>
    %58 = tpu.matmul %55, %56, %cst_19 {dimension_numbers = #tpu.dot_dimension_numbers<[1], [1], [0], [0], [0, 0, 1, 0], [], []>} : vector<8x8xbf16>, vector<8x8xbf16>, vector<8x8xf32> -> vector<8x8xf32>
    %cst_20 = arith.constant 0.353553385 : f32
    %59 = vector.broadcast %cst_20 : f32 to vector<8x8xf32>
    %60 = arith.mulf %58, %59 : vector<8x8xf32>
    %61 = vector.broadcast %6 : vector<1x8xf32> to vector<8x8xf32>
    %62 = arith.addf %60, %61 : vector<8x8xf32>
    %cst_21 = arith.constant dense<0xFF800000> : vector<8xf32>
    %63 = vector.multi_reduction <maximumf>, %62, %cst_21 [1] : vector<8x8xf32> to vector<8xf32>
    %64 = vector.shape_cast %63 : vector<8xf32> to vector<8x1xf32>
    %65 = vector.broadcast %64 : vector<8x1xf32> to vector<8x8xf32>
    %66 = arith.subf %62, %65 : vector<8x8xf32>
    %67 = math.exp %66 : vector<8x8xf32>
    %cst_22 = arith.constant dense<0.000000e+00> : vector<8xf32>
    %68 = vector.multi_reduction <add>, %67, %cst_22 [1] : vector<8x8xf32> to vector<8xf32>
    %69 = vector.shape_cast %68 : vector<8xf32> to vector<8x1xf32>
    %70 = tpu.reciprocal %69 {approx = true} : vector<8x1xf32> -> vector<8x1xf32>
    %71 = vector.broadcast %70 : vector<8x1xf32> to vector<8x8xf32>
    %72 = arith.mulf %67, %71 : vector<8x8xf32>
    %73 = arith.truncf %72 : vector<8x8xf32> to vector<8x8xbf16>
    %cst_23 = arith.constant dense<0.000000e+00> : vector<8x8xf32>
    %74 = tpu.matmul %73, %57, %cst_23 {dimension_numbers = #tpu.dot_dimension_numbers<[1], [0], [0], [1], [0, 0, 1, 1], [], []>} : vector<8x8xbf16>, vector<8x8xbf16>, vector<8x8xf32> -> vector<8x8xf32>
    %75 = arith.truncf %74 : vector<8x8xf32> to vector<8x8xbf16>
    %c0_24 = arith.constant 0 : index
    %c0_25 = arith.constant 0 : index
    %c16 = arith.constant 16 : index
    %76 = vector.load %arg3[%c0_24, %c0_25, %c16] : memref<1x8x32xbf16, #tpu.memory_space<vmem>>, vector<1x8x8xbf16>
    %77 = vector.shape_cast %76 : vector<1x8x8xbf16> to vector<8x8xbf16>
    %78 = vector.shape_cast %75 : vector<8x8xbf16> to vector<1x8x8xbf16>
    tpu.vector_store %arg3[%c0_24, %c0_25, %c16], %78 {strides = array<i32>} : memref<1x8x32xbf16, #tpu.memory_space<vmem>>, vector<1x8x8xbf16>,
    %79 = vector.extract_strided_slice %2 {offsets = [0, 24], sizes = [8, 8], strides = [1, 1]} : vector<8x32xbf16> to vector<8x8xbf16>
    %80 = vector.extract_strided_slice %3 {offsets = [0, 24], sizes = [8, 8], strides = [1, 1]} : vector<8x32xbf16> to vector<8x8xbf16>
    %81 = vector.extract_strided_slice %4 {offsets = [0, 24], sizes = [8, 8], strides = [1, 1]} : vector<8x32xbf16> to vector<8x8xbf16>
    %cst_26 = arith.constant dense<0.000000e+00> : vector<8x8xf32>
    %82 = tpu.matmul %79, %80, %cst_26 {dimension_numbers = #tpu.dot_dimension_numbers<[1], [1], [0], [0], [0, 0, 1, 0], [], []>} : vector<8x8xbf16>, vector<8x8xbf16>, vector<8x8xf32> -> vector<8x8xf32>
    %cst_27 = arith.constant 0.353553385 : f32
    %83 = vector.broadcast %cst_27 : f32 to vector<8x8xf32>
    %84 = arith.mulf %82, %83 : vector<8x8xf32>
    %85 = vector.broadcast %6 : vector<1x8xf32> to vector<8x8xf32>
    %86 = arith.addf %84, %85 : vector<8x8xf32>
    %cst_28 = arith.constant dense<0xFF800000> : vector<8xf32>
    %87 = vector.multi_reduction <maximumf>, %86, %cst_28 [1] : vector<8x8xf32> to vector<8xf32>
    %88 = vector.shape_cast %87 : vector<8xf32> to vector<8x1xf32>
    %89 = vector.broadcast %88 : vector<8x1xf32> to vector<8x8xf32>
    %90 = arith.subf %86, %89 : vector<8x8xf32>
    %91 = math.exp %90 : vector<8x8xf32>
    %cst_29 = arith.constant dense<0.000000e+00> : vector<8xf32>
    %92 = vector.multi_reduction <add>, %91, %cst_29 [1] : vector<8x8xf32> to vector<8xf32>
    %93 = vector.shape_cast %92 : vector<8xf32> to vector<8x1xf32>
    %94 = tpu.reciprocal %93 {approx = true} : vector<8x1xf32> -> vector<8x1xf32>
    %95 = vector.broadcast %94 : vector<8x1xf32> to vector<8x8xf32>
    %96 = arith.mulf %91, %95 : vector<8x8xf32>
    %97 = arith.truncf %96 : vector<8x8xf32> to vector<8x8xbf16>
    %cst_30 = arith.constant dense<0.000000e+00> : vector<8x8xf32>
    %98 = tpu.matmul %97, %81, %cst_30 {dimension_numbers = #tpu.dot_dimension_numbers<[1], [0], [0], [1], [0, 0, 1, 1], [], []>} : vector<8x8xbf16>, vector<8x8xbf16>, vector<8x8xf32> -> vector<8x8xf32>
    %99 = arith.truncf %98 : vector<8x8xf32> to vector<8x8xbf16>
    %c0_31 = arith.constant 0 : index
    %c0_32 = arith.constant 0 : index
    %c24 = arith.constant 24 : index
    %100 = vector.load %arg3[%c0_31, %c0_32, %c24] : memref<1x8x32xbf16, #tpu.memory_space<vmem>>, vector<1x8x8xbf16>
    %101 = vector.shape_cast %100 : vector<1x8x8xbf16> to vector<8x8xbf16>
    %102 = vector.shape_cast %99 : vector<8x8xbf16> to vector<1x8x8xbf16>
    tpu.vector_store %arg3[%c0_31, %c0_32, %c24], %102 {strides = array<i32>} : memref<1x8x32xbf16, #tpu.memory_space<vmem>>, vector<1x8x8xbf16>,
    return
  }
  func.func @transform_0(%arg0: i32) -> (i32, i32, i32) {
    %c0_i32 = arith.constant 0 : i32
    %c0_i32_0 = arith.constant 0 : i32
    %c0_i32_1 = arith.constant 0 : i32
    return %arg0, %c0_i32, %c0_i32_0 : i32, i32, i32
  }
  func.func @transform_1(%arg0: i32) -> (i32, i32, i32) {
    %c0_i32 = arith.constant 0 : i32
    %c0_i32_0 = arith.constant 0 : i32
    %c0_i32_1 = arith.constant 0 : i32
    return %arg0, %c0_i32, %c0_i32_0 : i32, i32, i32
  }
  func.func @transform_2(%arg0: i32) -> (i32, i32, i32) {
    %c0_i32 = arith.constant 0 : i32
    %c0_i32_0 = arith.constant 0 : i32
    %c0_i32_1 = arith.constant 0 : i32
    return %arg0, %c0_i32, %c0_i32_0 : i32, i32, i32
  }
}

module attributes {stable_mosaic.version = 11 : i64} {
  func.func @_linear_res_ln_kernel(%arg0: i32, %arg1: i32, %arg2: memref<16x32xbf16, #tpu.memory_space<vmem>>, %arg3: memref<32x32xbf16, #tpu.memory_space<vmem>>, %arg4: memref<1x32xf32, #tpu.memory_space<vmem>>, %arg5: memref<16x32xbf16, #tpu.memory_space<vmem>>, %arg6: memref<1x32xf32, #tpu.memory_space<vmem>>, %arg7: memref<1x32xf32, #tpu.memory_space<vmem>>, %arg8: memref<16x32xbf16, #tpu.memory_space<vmem>>, %arg9: memref<16x32xf32, #tpu.memory_space<vmem>>) attributes {dimension_semantics = [#tpu.dimension_semantics<parallel>, #tpu.dimension_semantics<arbitrary>], iteration_bounds = array<i64: 1, 1>, scalar_prefetch = 0 : i64, scratch_operands = 1 : i64, tpu.core_type = #tpu.core_type<tc>, window_params = [{transform_indices = @transform_0, window_bounds = array<i64: 16, 32>}, {transform_indices = @transform_1, window_bounds = array<i64: 32, 32>}, {pipeline_mode = #tpu.pipeline_mode<synchronous>, transform_indices = @transform_2, window_bounds = array<i64: 1, 32>}, {transform_indices = @transform_3, window_bounds = array<i64: 16, 32>}, {pipeline_mode = #tpu.pipeline_mode<synchronous>, transform_indices = @transform_4, window_bounds = array<i64: 1, 32>}, {pipeline_mode = #tpu.pipeline_mode<synchronous>, transform_indices = @transform_5, window_bounds = array<i64: 1, 32>}, {transform_indices = @transform_6, window_bounds = array<i64: 16, 32>}]} {
    %c0_i32 = arith.constant 0 : i32
    %0 = arith.cmpi eq, %arg1, %c0_i32 : i32
    %1 = arith.extui %0 : i1 to i32
    %c0_i32_0 = arith.constant 0 : i32
    %2 = arith.cmpi ne, %1, %c0_i32_0 : i32
    scf.if %2 {
      %cst_10 = arith.constant 0.000000e+00 : f32
      %12 = vector.broadcast %cst_10 : f32 to vector<16x32xf32>
      %c0_11 = arith.constant 0 : index
      %c0_12 = arith.constant 0 : index
      %13 = vector.load %arg9[%c0_11, %c0_12] : memref<16x32xf32, #tpu.memory_space<vmem>>, vector<16x32xf32>
      tpu.vector_store %arg9[%c0_11, %c0_12], %12 {strides = array<i32>} : memref<16x32xf32, #tpu.memory_space<vmem>>, vector<16x32xf32>,
    } else {
    }
    %c0 = arith.constant 0 : index
    %c0_1 = arith.constant 0 : index
    %3 = vector.load %arg9[%c0, %c0_1] : memref<16x32xf32, #tpu.memory_space<vmem>>, vector<16x32xf32>
    %c0_2 = arith.constant 0 : index
    %c0_3 = arith.constant 0 : index
    %4 = vector.load %arg2[%c0_2, %c0_3] : memref<16x32xbf16, #tpu.memory_space<vmem>>, vector<16x32xbf16>
    %c0_4 = arith.constant 0 : index
    %c0_5 = arith.constant 0 : index
    %5 = vector.load %arg3[%c0_4, %c0_5] : memref<32x32xbf16, #tpu.memory_space<vmem>>, vector<32x32xbf16>
    %cst = arith.constant dense<0.000000e+00> : vector<16x32xf32>
    %6 = tpu.matmul %4, %5, %cst {dimension_numbers = #tpu.dot_dimension_numbers<[1], [0], [0], [1], [0, 0, 1, 1], [], []>} : vector<16x32xbf16>, vector<32x32xbf16>, vector<16x32xf32> -> vector<16x32xf32>
    %7 = arith.addf %3, %6 : vector<16x32xf32>
    %c0_6 = arith.constant 0 : index
    %c0_7 = arith.constant 0 : index
    %8 = vector.load %arg9[%c0_6, %c0_7] : memref<16x32xf32, #tpu.memory_space<vmem>>, vector<16x32xf32>
    tpu.vector_store %arg9[%c0_6, %c0_7], %7 {strides = array<i32>} : memref<16x32xf32, #tpu.memory_space<vmem>>, vector<16x32xf32>,
    %c0_i32_8 = arith.constant 0 : i32
    %9 = arith.cmpi eq, %arg1, %c0_i32_8 : i32
    %10 = arith.extui %9 : i1 to i32
    %c0_i32_9 = arith.constant 0 : i32
    %11 = arith.cmpi ne, %10, %c0_i32_9 : i32
    scf.if %11 {
      %c0_10 = arith.constant 0 : index
      %c0_11 = arith.constant 0 : index
      %12 = vector.load %arg9[%c0_10, %c0_11] : memref<16x32xf32, #tpu.memory_space<vmem>>, vector<16x32xf32>
      %c0_12 = arith.constant 0 : index
      %c0_13 = arith.constant 0 : index
      %13 = vector.load %arg4[%c0_12, %c0_13] : memref<1x32xf32, #tpu.memory_space<vmem>>, vector<1x32xf32>
      %14 = vector.broadcast %13 : vector<1x32xf32> to vector<16x32xf32>
      %15 = arith.addf %12, %14 : vector<16x32xf32>
      %c0_14 = arith.constant 0 : index
      %c0_15 = arith.constant 0 : index
      %16 = vector.load %arg5[%c0_14, %c0_15] : memref<16x32xbf16, #tpu.memory_space<vmem>>, vector<16x32xbf16>
      %17 = arith.extf %16 : vector<16x32xbf16> to vector<16x32xf32>
      %18 = arith.addf %15, %17 : vector<16x32xf32>
      %cst_16 = arith.constant dense<0.000000e+00> : vector<16xf32>
      %19 = vector.multi_reduction <add>, %18, %cst_16 [1] : vector<16x32xf32> to vector<16xf32>
      %20 = vector.shape_cast %19 : vector<16xf32> to vector<16x1xf32>
      %cst_17 = arith.constant 3.200000e+01 : f32
      %21 = vector.broadcast %cst_17 : f32 to vector<16x1xf32>
      %22 = arith.divf %20, %21 : vector<16x1xf32>
      %23 = vector.broadcast %22 : vector<16x1xf32> to vector<16x32xf32>
      %24 = arith.subf %18, %23 : vector<16x32xf32>
      %25 = arith.mulf %24, %24 : vector<16x32xf32>
      %cst_18 = arith.constant dense<0.000000e+00> : vector<16xf32>
      %26 = vector.multi_reduction <add>, %25, %cst_18 [1] : vector<16x32xf32> to vector<16xf32>
      %27 = vector.shape_cast %26 : vector<16xf32> to vector<16x1xf32>
      %cst_19 = arith.constant 3.200000e+01 : f32
      %28 = vector.broadcast %cst_19 : f32 to vector<16x1xf32>
      %29 = arith.divf %27, %28 : vector<16x1xf32>
      %30 = vector.broadcast %22 : vector<16x1xf32> to vector<16x32xf32>
      %31 = arith.subf %18, %30 : vector<16x32xf32>
      %cst_20 = arith.constant 9.99999974E-6 : f32
      %32 = vector.broadcast %cst_20 : f32 to vector<16x1xf32>
      %33 = arith.addf %29, %32 : vector<16x1xf32>
      %34 = math.rsqrt %33 : vector<16x1xf32>
      %35 = vector.broadcast %34 : vector<16x1xf32> to vector<16x32xf32>
      %36 = arith.mulf %31, %35 : vector<16x32xf32>
      %c0_21 = arith.constant 0 : index
      %c0_22 = arith.constant 0 : index
      %37 = vector.load %arg6[%c0_21, %c0_22] : memref<1x32xf32, #tpu.memory_space<vmem>>, vector<1x32xf32>
      %38 = vector.broadcast %37 : vector<1x32xf32> to vector<16x32xf32>
      %39 = arith.mulf %36, %38 : vector<16x32xf32>
      %c0_23 = arith.constant 0 : index
      %c0_24 = arith.constant 0 : index
      %40 = vector.load %arg7[%c0_23, %c0_24] : memref<1x32xf32, #tpu.memory_space<vmem>>, vector<1x32xf32>
      %41 = vector.broadcast %40 : vector<1x32xf32> to vector<16x32xf32>
      %42 = arith.addf %39, %41 : vector<16x32xf32>
      %43 = arith.truncf %42 : vector<16x32xf32> to vector<16x32xbf16>
      %c0_25 = arith.constant 0 : index
      %c0_26 = arith.constant 0 : index
      %44 = vector.load %arg8[%c0_25, %c0_26] : memref<16x32xbf16, #tpu.memory_space<vmem>>, vector<16x32xbf16>
      tpu.vector_store %arg8[%c0_25, %c0_26], %43 {strides = array<i32>} : memref<16x32xbf16, #tpu.memory_space<vmem>>, vector<16x32xbf16>,
    } else {
    }
    return
  }
  func.func @transform_0(%arg0: i32, %arg1: i32) -> (i32, i32) {
    %c0_i32 = arith.constant 0 : i32
    return %arg0, %arg1 : i32, i32
  }
  func.func @transform_1(%arg0: i32, %arg1: i32) -> (i32, i32) {
    %c0_i32 = arith.constant 0 : i32
    %c0_i32_0 = arith.constant 0 : i32
    return %arg1, %c0_i32 : i32, i32
  }
  func.func @transform_2(%arg0: i32, %arg1: i32) -> (i32, i32) {
    %c0_i32 = arith.constant 0 : i32
    %c0_i32_0 = arith.constant 0 : i32
    %c0_i32_1 = arith.constant 0 : i32
    return %c0_i32, %c0_i32_0 : i32, i32
  }
  func.func @transform_3(%arg0: i32, %arg1: i32) -> (i32, i32) {
    %c0_i32 = arith.constant 0 : i32
    %c0_i32_0 = arith.constant 0 : i32
    return %arg0, %c0_i32 : i32, i32
  }
  func.func @transform_4(%arg0: i32, %arg1: i32) -> (i32, i32) {
    %c0_i32 = arith.constant 0 : i32
    %c0_i32_0 = arith.constant 0 : i32
    %c0_i32_1 = arith.constant 0 : i32
    return %c0_i32, %c0_i32_0 : i32, i32
  }
  func.func @transform_5(%arg0: i32, %arg1: i32) -> (i32, i32) {
    %c0_i32 = arith.constant 0 : i32
    %c0_i32_0 = arith.constant 0 : i32
    %c0_i32_1 = arith.constant 0 : i32
    return %c0_i32, %c0_i32_0 : i32, i32
  }
  func.func @transform_6(%arg0: i32, %arg1: i32) -> (i32, i32) {
    %c0_i32 = arith.constant 0 : i32
    %c0_i32_0 = arith.constant 0 : i32
    return %arg0, %c0_i32 : i32, i32
  }
}

module attributes {stable_mosaic.version = 11 : i64} {
  func.func @_linear_kernel(%arg0: i32, %arg1: i32, %arg2: i32, %arg3: memref<16x32xbf16, #tpu.memory_space<vmem>>, %arg4: memref<32x64xbf16, #tpu.memory_space<vmem>>, %arg5: memref<1x64xf32, #tpu.memory_space<vmem>>, %arg6: memref<16x64xbf16, #tpu.memory_space<vmem>>, %arg7: memref<16x64xf32, #tpu.memory_space<vmem>>) attributes {dimension_semantics = [#tpu.dimension_semantics<parallel>, #tpu.dimension_semantics<parallel>, #tpu.dimension_semantics<arbitrary>], iteration_bounds = array<i64: 1, 1, 1>, scalar_prefetch = 0 : i64, scratch_operands = 1 : i64, tpu.core_type = #tpu.core_type<tc>, window_params = [{transform_indices = @transform_0, window_bounds = array<i64: 16, 32>}, {transform_indices = @transform_1, window_bounds = array<i64: 32, 64>}, {transform_indices = @transform_2, window_bounds = array<i64: 1, 64>}, {transform_indices = @transform_3, window_bounds = array<i64: 16, 64>}]} {
    %c0_i32 = arith.constant 0 : i32
    %0 = arith.cmpi eq, %arg2, %c0_i32 : i32
    %1 = arith.extui %0 : i1 to i32
    %c0_i32_0 = arith.constant 0 : i32
    %2 = arith.cmpi ne, %1, %c0_i32_0 : i32
    scf.if %2 {
      %cst_10 = arith.constant 0.000000e+00 : f32
      %12 = vector.broadcast %cst_10 : f32 to vector<16x64xf32>
      %c0_11 = arith.constant 0 : index
      %c0_12 = arith.constant 0 : index
      %13 = vector.load %arg7[%c0_11, %c0_12] : memref<16x64xf32, #tpu.memory_space<vmem>>, vector<16x64xf32>
      tpu.vector_store %arg7[%c0_11, %c0_12], %12 {strides = array<i32>} : memref<16x64xf32, #tpu.memory_space<vmem>>, vector<16x64xf32>,
    } else {
    }
    %c0 = arith.constant 0 : index
    %c0_1 = arith.constant 0 : index
    %3 = vector.load %arg7[%c0, %c0_1] : memref<16x64xf32, #tpu.memory_space<vmem>>, vector<16x64xf32>
    %c0_2 = arith.constant 0 : index
    %c0_3 = arith.constant 0 : index
    %4 = vector.load %arg3[%c0_2, %c0_3] : memref<16x32xbf16, #tpu.memory_space<vmem>>, vector<16x32xbf16>
    %c0_4 = arith.constant 0 : index
    %c0_5 = arith.constant 0 : index
    %5 = vector.load %arg4[%c0_4, %c0_5] : memref<32x64xbf16, #tpu.memory_space<vmem>>, vector<32x64xbf16>
    %cst = arith.constant dense<0.000000e+00> : vector<16x64xf32>
    %6 = tpu.matmul %4, %5, %cst {dimension_numbers = #tpu.dot_dimension_numbers<[1], [0], [0], [1], [0, 0, 1, 1], [], []>} : vector<16x32xbf16>, vector<32x64xbf16>, vector<16x64xf32> -> vector<16x64xf32>
    %7 = arith.addf %3, %6 : vector<16x64xf32>
    %c0_6 = arith.constant 0 : index
    %c0_7 = arith.constant 0 : index
    %8 = vector.load %arg7[%c0_6, %c0_7] : memref<16x64xf32, #tpu.memory_space<vmem>>, vector<16x64xf32>
    tpu.vector_store %arg7[%c0_6, %c0_7], %7 {strides = array<i32>} : memref<16x64xf32, #tpu.memory_space<vmem>>, vector<16x64xf32>,
    %c0_i32_8 = arith.constant 0 : i32
    %9 = arith.cmpi eq, %arg2, %c0_i32_8 : i32
    %10 = arith.extui %9 : i1 to i32
    %c0_i32_9 = arith.constant 0 : i32
    %11 = arith.cmpi ne, %10, %c0_i32_9 : i32
    scf.if %11 {
      %c0_10 = arith.constant 0 : index
      %c0_11 = arith.constant 0 : index
      %12 = vector.load %arg7[%c0_10, %c0_11] : memref<16x64xf32, #tpu.memory_space<vmem>>, vector<16x64xf32>
      %c0_12 = arith.constant 0 : index
      %c0_13 = arith.constant 0 : index
      %13 = vector.load %arg5[%c0_12, %c0_13] : memref<1x64xf32, #tpu.memory_space<vmem>>, vector<1x64xf32>
      %14 = vector.broadcast %13 : vector<1x64xf32> to vector<16x64xf32>
      %15 = arith.addf %12, %14 : vector<16x64xf32>
      %cst_14 = arith.constant 0.000000e+00 : f32
      %16 = vector.broadcast %cst_14 : f32 to vector<16x64xf32>
      %17 = arith.maximumf %15, %16 : vector<16x64xf32>
      %18 = arith.truncf %17 : vector<16x64xf32> to vector<16x64xbf16>
      %c0_15 = arith.constant 0 : index
      %c0_16 = arith.constant 0 : index
      %19 = vector.load %arg6[%c0_15, %c0_16] : memref<16x64xbf16, #tpu.memory_space<vmem>>, vector<16x64xbf16>
      tpu.vector_store %arg6[%c0_15, %c0_16], %18 {strides = array<i32>} : memref<16x64xbf16, #tpu.memory_space<vmem>>, vector<16x64xbf16>,
    } else {
    }
    return
  }
  func.func @transform_0(%arg0: i32, %arg1: i32, %arg2: i32) -> (i32, i32) {
    %c0_i32 = arith.constant 0 : i32
    return %arg0, %arg2 : i32, i32
  }
  func.func @transform_1(%arg0: i32, %arg1: i32, %arg2: i32) -> (i32, i32) {
    %c0_i32 = arith.constant 0 : i32
    return %arg2, %arg1 : i32, i32
  }
  func.func @transform_2(%arg0: i32, %arg1: i32, %arg2: i32) -> (i32, i32) {
    %c0_i32 = arith.constant 0 : i32
    %c0_i32_0 = arith.constant 0 : i32
    return %c0_i32, %arg1 : i32, i32
  }
  func.func @transform_3(%arg0: i32, %arg1: i32, %arg2: i32) -> (i32, i32) {
    %c0_i32 = arith.constant 0 : i32
    return %arg0, %arg1 : i32, i32
  }
}

module attributes {stable_mosaic.version = 11 : i64} {
  func.func @_linear_res_ln_kernel(%arg0: i32, %arg1: i32, %arg2: memref<16x64xbf16, #tpu.memory_space<vmem>>, %arg3: memref<64x32xbf16, #tpu.memory_space<vmem>>, %arg4: memref<1x32xf32, #tpu.memory_space<vmem>>, %arg5: memref<16x32xbf16, #tpu.memory_space<vmem>>, %arg6: memref<1x32xf32, #tpu.memory_space<vmem>>, %arg7: memref<1x32xf32, #tpu.memory_space<vmem>>, %arg8: memref<16x32xbf16, #tpu.memory_space<vmem>>, %arg9: memref<16x32xf32, #tpu.memory_space<vmem>>) attributes {dimension_semantics = [#tpu.dimension_semantics<parallel>, #tpu.dimension_semantics<arbitrary>], iteration_bounds = array<i64: 1, 1>, scalar_prefetch = 0 : i64, scratch_operands = 1 : i64, tpu.core_type = #tpu.core_type<tc>, window_params = [{transform_indices = @transform_0, window_bounds = array<i64: 16, 64>}, {transform_indices = @transform_1, window_bounds = array<i64: 64, 32>}, {pipeline_mode = #tpu.pipeline_mode<synchronous>, transform_indices = @transform_2, window_bounds = array<i64: 1, 32>}, {transform_indices = @transform_3, window_bounds = array<i64: 16, 32>}, {pipeline_mode = #tpu.pipeline_mode<synchronous>, transform_indices = @transform_4, window_bounds = array<i64: 1, 32>}, {pipeline_mode = #tpu.pipeline_mode<synchronous>, transform_indices = @transform_5, window_bounds = array<i64: 1, 32>}, {transform_indices = @transform_6, window_bounds = array<i64: 16, 32>}]} {
    %c0_i32 = arith.constant 0 : i32
    %0 = arith.cmpi eq, %arg1, %c0_i32 : i32
    %1 = arith.extui %0 : i1 to i32
    %c0_i32_0 = arith.constant 0 : i32
    %2 = arith.cmpi ne, %1, %c0_i32_0 : i32
    scf.if %2 {
      %cst_10 = arith.constant 0.000000e+00 : f32
      %12 = vector.broadcast %cst_10 : f32 to vector<16x32xf32>
      %c0_11 = arith.constant 0 : index
      %c0_12 = arith.constant 0 : index
      %13 = vector.load %arg9[%c0_11, %c0_12] : memref<16x32xf32, #tpu.memory_space<vmem>>, vector<16x32xf32>
      tpu.vector_store %arg9[%c0_11, %c0_12], %12 {strides = array<i32>} : memref<16x32xf32, #tpu.memory_space<vmem>>, vector<16x32xf32>,
    } else {
    }
    %c0 = arith.constant 0 : index
    %c0_1 = arith.constant 0 : index
    %3 = vector.load %arg9[%c0, %c0_1] : memref<16x32xf32, #tpu.memory_space<vmem>>, vector<16x32xf32>
    %c0_2 = arith.constant 0 : index
    %c0_3 = arith.constant 0 : index
    %4 = vector.load %arg2[%c0_2, %c0_3] : memref<16x64xbf16, #tpu.memory_space<vmem>>, vector<16x64xbf16>
    %c0_4 = arith.constant 0 : index
    %c0_5 = arith.constant 0 : index
    %5 = vector.load %arg3[%c0_4, %c0_5] : memref<64x32xbf16, #tpu.memory_space<vmem>>, vector<64x32xbf16>
    %cst = arith.constant dense<0.000000e+00> : vector<16x32xf32>
    %6 = tpu.matmul %4, %5, %cst {dimension_numbers = #tpu.dot_dimension_numbers<[1], [0], [0], [1], [0, 0, 1, 1], [], []>} : vector<16x64xbf16>, vector<64x32xbf16>, vector<16x32xf32> -> vector<16x32xf32>
    %7 = arith.addf %3, %6 : vector<16x32xf32>
    %c0_6 = arith.constant 0 : index
    %c0_7 = arith.constant 0 : index
    %8 = vector.load %arg9[%c0_6, %c0_7] : memref<16x32xf32, #tpu.memory_space<vmem>>, vector<16x32xf32>
    tpu.vector_store %arg9[%c0_6, %c0_7], %7 {strides = array<i32>} : memref<16x32xf32, #tpu.memory_space<vmem>>, vector<16x32xf32>,
    %c0_i32_8 = arith.constant 0 : i32
    %9 = arith.cmpi eq, %arg1, %c0_i32_8 : i32
    %10 = arith.extui %9 : i1 to i32
    %c0_i32_9 = arith.constant 0 : i32
    %11 = arith.cmpi ne, %10, %c0_i32_9 : i32
    scf.if %11 {
      %c0_10 = arith.constant 0 : index
      %c0_11 = arith.constant 0 : index
      %12 = vector.load %arg9[%c0_10, %c0_11] : memref<16x32xf32, #tpu.memory_space<vmem>>, vector<16x32xf32>
      %c0_12 = arith.constant 0 : index
      %c0_13 = arith.constant 0 : index
      %13 = vector.load %arg4[%c0_12, %c0_13] : memref<1x32xf32, #tpu.memory_space<vmem>>, vector<1x32xf32>
      %14 = vector.broadcast %13 : vector<1x32xf32> to vector<16x32xf32>
      %15 = arith.addf %12, %14 : vector<16x32xf32>
      %c0_14 = arith.constant 0 : index
      %c0_15 = arith.constant 0 : index
      %16 = vector.load %arg5[%c0_14, %c0_15] : memref<16x32xbf16, #tpu.memory_space<vmem>>, vector<16x32xbf16>
      %17 = arith.extf %16 : vector<16x32xbf16> to vector<16x32xf32>
      %18 = arith.addf %15, %17 : vector<16x32xf32>
      %cst_16 = arith.constant dense<0.000000e+00> : vector<16xf32>
      %19 = vector.multi_reduction <add>, %18, %cst_16 [1] : vector<16x32xf32> to vector<16xf32>
      %20 = vector.shape_cast %19 : vector<16xf32> to vector<16x1xf32>
      %cst_17 = arith.constant 3.200000e+01 : f32
      %21 = vector.broadcast %cst_17 : f32 to vector<16x1xf32>
      %22 = arith.divf %20, %21 : vector<16x1xf32>
      %23 = vector.broadcast %22 : vector<16x1xf32> to vector<16x32xf32>
      %24 = arith.subf %18, %23 : vector<16x32xf32>
      %25 = arith.mulf %24, %24 : vector<16x32xf32>
      %cst_18 = arith.constant dense<0.000000e+00> : vector<16xf32>
      %26 = vector.multi_reduction <add>, %25, %cst_18 [1] : vector<16x32xf32> to vector<16xf32>
      %27 = vector.shape_cast %26 : vector<16xf32> to vector<16x1xf32>
      %cst_19 = arith.constant 3.200000e+01 : f32
      %28 = vector.broadcast %cst_19 : f32 to vector<16x1xf32>
      %29 = arith.divf %27, %28 : vector<16x1xf32>
      %30 = vector.broadcast %22 : vector<16x1xf32> to vector<16x32xf32>
      %31 = arith.subf %18, %30 : vector<16x32xf32>
      %cst_20 = arith.constant 9.99999974E-6 : f32
      %32 = vector.broadcast %cst_20 : f32 to vector<16x1xf32>
      %33 = arith.addf %29, %32 : vector<16x1xf32>
      %34 = math.rsqrt %33 : vector<16x1xf32>
      %35 = vector.broadcast %34 : vector<16x1xf32> to vector<16x32xf32>
      %36 = arith.mulf %31, %35 : vector<16x32xf32>
      %c0_21 = arith.constant 0 : index
      %c0_22 = arith.constant 0 : index
      %37 = vector.load %arg6[%c0_21, %c0_22] : memref<1x32xf32, #tpu.memory_space<vmem>>, vector<1x32xf32>
      %38 = vector.broadcast %37 : vector<1x32xf32> to vector<16x32xf32>
      %39 = arith.mulf %36, %38 : vector<16x32xf32>
      %c0_23 = arith.constant 0 : index
      %c0_24 = arith.constant 0 : index
      %40 = vector.load %arg7[%c0_23, %c0_24] : memref<1x32xf32, #tpu.memory_space<vmem>>, vector<1x32xf32>
      %41 = vector.broadcast %40 : vector<1x32xf32> to vector<16x32xf32>
      %42 = arith.addf %39, %41 : vector<16x32xf32>
      %43 = arith.truncf %42 : vector<16x32xf32> to vector<16x32xbf16>
      %c0_25 = arith.constant 0 : index
      %c0_26 = arith.constant 0 : index
      %44 = vector.load %arg8[%c0_25, %c0_26] : memref<16x32xbf16, #tpu.memory_space<vmem>>, vector<16x32xbf16>
      tpu.vector_store %arg8[%c0_25, %c0_26], %43 {strides = array<i32>} : memref<16x32xbf16, #tpu.memory_space<vmem>>, vector<16x32xbf16>,
    } else {
    }
    return
  }
  func.func @transform_0(%arg0: i32, %arg1: i32) -> (i32, i32) {
    %c0_i32 = arith.constant 0 : i32
    return %arg0, %arg1 : i32, i32
  }
  func.func @transform_1(%arg0: i32, %arg1: i32) -> (i32, i32) {
    %c0_i32 = arith.constant 0 : i32
    %c0_i32_0 = arith.constant 0 : i32
    return %arg1, %c0_i32 : i32, i32
  }
  func.func @transform_2(%arg0: i32, %arg1: i32) -> (i32, i32) {
    %c0_i32 = arith.constant 0 : i32
    %c0_i32_0 = arith.constant 0 : i32
    %c0_i32_1 = arith.constant 0 : i32
    return %c0_i32, %c0_i32_0 : i32, i32
  }
  func.func @transform_3(%arg0: i32, %arg1: i32) -> (i32, i32) {
    %c0_i32 = arith.constant 0 : i32
    %c0_i32_0 = arith.constant 0 : i32
    return %arg0, %c0_i32 : i32, i32
  }
  func.func @transform_4(%arg0: i32, %arg1: i32) -> (i32, i32) {
    %c0_i32 = arith.constant 0 : i32
    %c0_i32_0 = arith.constant 0 : i32
    %c0_i32_1 = arith.constant 0 : i32
    return %c0_i32, %c0_i32_0 : i32, i32
  }
  func.func @transform_5(%arg0: i32, %arg1: i32) -> (i32, i32) {
    %c0_i32 = arith.constant 0 : i32
    %c0_i32_0 = arith.constant 0 : i32
    %c0_i32_1 = arith.constant 0 : i32
    return %c0_i32, %c0_i32_0 : i32, i32
  }
  func.func @transform_6(%arg0: i32, %arg1: i32) -> (i32, i32) {
    %c0_i32 = arith.constant 0 : i32
    %c0_i32_0 = arith.constant 0 : i32
    return %arg0, %c0_i32 : i32, i32
  }
}

module attributes {stable_mosaic.version = 11 : i64} {
  func.func @_linear_kernel(%arg0: i32, %arg1: i32, %arg2: i32, %arg3: memref<16x32xbf16, #tpu.memory_space<vmem>>, %arg4: memref<32x64xbf16, #tpu.memory_space<vmem>>, %arg5: memref<1x64xf32, #tpu.memory_space<vmem>>, %arg6: memref<16x64xbf16, #tpu.memory_space<vmem>>, %arg7: memref<16x64xf32, #tpu.memory_space<vmem>>) attributes {dimension_semantics = [#tpu.dimension_semantics<parallel>, #tpu.dimension_semantics<parallel>, #tpu.dimension_semantics<arbitrary>], iteration_bounds = array<i64: 1, 1, 1>, scalar_prefetch = 0 : i64, scratch_operands = 1 : i64, tpu.core_type = #tpu.core_type<tc>, window_params = [{transform_indices = @transform_0, window_bounds = array<i64: 16, 32>}, {transform_indices = @transform_1, window_bounds = array<i64: 32, 64>}, {transform_indices = @transform_2, window_bounds = array<i64: 1, 64>}, {transform_indices = @transform_3, window_bounds = array<i64: 16, 64>}]} {
    %c0_i32 = arith.constant 0 : i32
    %0 = arith.cmpi eq, %arg2, %c0_i32 : i32
    %1 = arith.extui %0 : i1 to i32
    %c0_i32_0 = arith.constant 0 : i32
    %2 = arith.cmpi ne, %1, %c0_i32_0 : i32
    scf.if %2 {
      %cst_10 = arith.constant 0.000000e+00 : f32
      %12 = vector.broadcast %cst_10 : f32 to vector<16x64xf32>
      %c0_11 = arith.constant 0 : index
      %c0_12 = arith.constant 0 : index
      %13 = vector.load %arg7[%c0_11, %c0_12] : memref<16x64xf32, #tpu.memory_space<vmem>>, vector<16x64xf32>
      tpu.vector_store %arg7[%c0_11, %c0_12], %12 {strides = array<i32>} : memref<16x64xf32, #tpu.memory_space<vmem>>, vector<16x64xf32>,
    } else {
    }
    %c0 = arith.constant 0 : index
    %c0_1 = arith.constant 0 : index
    %3 = vector.load %arg7[%c0, %c0_1] : memref<16x64xf32, #tpu.memory_space<vmem>>, vector<16x64xf32>
    %c0_2 = arith.constant 0 : index
    %c0_3 = arith.constant 0 : index
    %4 = vector.load %arg3[%c0_2, %c0_3] : memref<16x32xbf16, #tpu.memory_space<vmem>>, vector<16x32xbf16>
    %c0_4 = arith.constant 0 : index
    %c0_5 = arith.constant 0 : index
    %5 = vector.load %arg4[%c0_4, %c0_5] : memref<32x64xbf16, #tpu.memory_space<vmem>>, vector<32x64xbf16>
    %cst = arith.constant dense<0.000000e+00> : vector<16x64xf32>
    %6 = tpu.matmul %4, %5, %cst {dimension_numbers = #tpu.dot_dimension_numbers<[1], [0], [0], [1], [0, 0, 1, 1], [], []>} : vector<16x32xbf16>, vector<32x64xbf16>, vector<16x64xf32> -> vector<16x64xf32>
    %7 = arith.addf %3, %6 : vector<16x64xf32>
    %c0_6 = arith.constant 0 : index
    %c0_7 = arith.constant 0 : index
    %8 = vector.load %arg7[%c0_6, %c0_7] : memref<16x64xf32, #tpu.memory_space<vmem>>, vector<16x64xf32>
    tpu.vector_store %arg7[%c0_6, %c0_7], %7 {strides = array<i32>} : memref<16x64xf32, #tpu.memory_space<vmem>>, vector<16x64xf32>,
    %c0_i32_8 = arith.constant 0 : i32
    %9 = arith.cmpi eq, %arg2, %c0_i32_8 : i32
    %10 = arith.extui %9 : i1 to i32
    %c0_i32_9 = arith.constant 0 : i32
    %11 = arith.cmpi ne, %10, %c0_i32_9 : i32
    scf.if %11 {
      %c0_10 = arith.constant 0 : index
      %c0_11 = arith.constant 0 : index
      %12 = vector.load %arg7[%c0_10, %c0_11] : memref<16x64xf32, #tpu.memory_space<vmem>>, vector<16x64xf32>
      %c0_12 = arith.constant 0 : index
      %c0_13 = arith.constant 0 : index
      %13 = vector.load %arg5[%c0_12, %c0_13] : memref<1x64xf32, #tpu.memory_space<vmem>>, vector<1x64xf32>
      %14 = vector.broadcast %13 : vector<1x64xf32> to vector<16x64xf32>
      %15 = arith.addf %12, %14 : vector<16x64xf32>
      %16 = arith.truncf %15 : vector<16x64xf32> to vector<16x64xbf16>
      %c0_14 = arith.constant 0 : index
      %c0_15 = arith.constant 0 : index
      %17 = vector.load %arg6[%c0_14, %c0_15] : memref<16x64xbf16, #tpu.memory_space<vmem>>, vector<16x64xbf16>
      tpu.vector_store %arg6[%c0_14, %c0_15], %16 {strides = array<i32>} : memref<16x64xbf16, #tpu.memory_space<vmem>>, vector<16x64xbf16>,
    } else {
    }
    return
  }
  func.func @transform_0(%arg0: i32, %arg1: i32, %arg2: i32) -> (i32, i32) {
    %c0_i32 = arith.constant 0 : i32
    return %arg0, %arg2 : i32, i32
  }
  func.func @transform_1(%arg0: i32, %arg1: i32, %arg2: i32) -> (i32, i32) {
    %c0_i32 = arith.constant 0 : i32
    return %arg2, %arg1 : i32, i32
  }
  func.func @transform_2(%arg0: i32, %arg1: i32, %arg2: i32) -> (i32, i32) {
    %c0_i32 = arith.constant 0 : i32
    %c0_i32_0 = arith.constant 0 : i32
    return %c0_i32, %arg1 : i32, i32
  }
  func.func @transform_3(%arg0: i32, %arg1: i32, %arg2: i32) -> (i32, i32) {
    %c0_i32 = arith.constant 0 : i32
    return %arg0, %arg1 : i32, i32
  }
}

module attributes {stable_mosaic.version = 11 : i64} {
  func.func @_linear_kernel(%arg0: i32, %arg1: i32, %arg2: i32, %arg3: memref<16x32xbf16, #tpu.memory_space<vmem>>, %arg4: memref<32x32xbf16, #tpu.memory_space<vmem>>, %arg5: memref<1x32xf32, #tpu.memory_space<vmem>>, %arg6: memref<16x32xbf16, #tpu.memory_space<vmem>>, %arg7: memref<16x32xf32, #tpu.memory_space<vmem>>) attributes {dimension_semantics = [#tpu.dimension_semantics<parallel>, #tpu.dimension_semantics<parallel>, #tpu.dimension_semantics<arbitrary>], iteration_bounds = array<i64: 1, 1, 1>, scalar_prefetch = 0 : i64, scratch_operands = 1 : i64, tpu.core_type = #tpu.core_type<tc>, window_params = [{transform_indices = @transform_0, window_bounds = array<i64: 16, 32>}, {transform_indices = @transform_1, window_bounds = array<i64: 32, 32>}, {transform_indices = @transform_2, window_bounds = array<i64: 1, 32>}, {transform_indices = @transform_3, window_bounds = array<i64: 16, 32>}]} {
    %c0_i32 = arith.constant 0 : i32
    %0 = arith.cmpi eq, %arg2, %c0_i32 : i32
    %1 = arith.extui %0 : i1 to i32
    %c0_i32_0 = arith.constant 0 : i32
    %2 = arith.cmpi ne, %1, %c0_i32_0 : i32
    scf.if %2 {
      %cst_10 = arith.constant 0.000000e+00 : f32
      %12 = vector.broadcast %cst_10 : f32 to vector<16x32xf32>
      %c0_11 = arith.constant 0 : index
      %c0_12 = arith.constant 0 : index
      %13 = vector.load %arg7[%c0_11, %c0_12] : memref<16x32xf32, #tpu.memory_space<vmem>>, vector<16x32xf32>
      tpu.vector_store %arg7[%c0_11, %c0_12], %12 {strides = array<i32>} : memref<16x32xf32, #tpu.memory_space<vmem>>, vector<16x32xf32>,
    } else {
    }
    %c0 = arith.constant 0 : index
    %c0_1 = arith.constant 0 : index
    %3 = vector.load %arg7[%c0, %c0_1] : memref<16x32xf32, #tpu.memory_space<vmem>>, vector<16x32xf32>
    %c0_2 = arith.constant 0 : index
    %c0_3 = arith.constant 0 : index
    %4 = vector.load %arg3[%c0_2, %c0_3] : memref<16x32xbf16, #tpu.memory_space<vmem>>, vector<16x32xbf16>
    %c0_4 = arith.constant 0 : index
    %c0_5 = arith.constant 0 : index
    %5 = vector.load %arg4[%c0_4, %c0_5] : memref<32x32xbf16, #tpu.memory_space<vmem>>, vector<32x32xbf16>
    %cst = arith.constant dense<0.000000e+00> : vector<16x32xf32>
    %6 = tpu.matmul %4, %5, %cst {dimension_numbers = #tpu.dot_dimension_numbers<[1], [0], [0], [1], [0, 0, 1, 1], [], []>} : vector<16x32xbf16>, vector<32x32xbf16>, vector<16x32xf32> -> vector<16x32xf32>
    %7 = arith.addf %3, %6 : vector<16x32xf32>
    %c0_6 = arith.constant 0 : index
    %c0_7 = arith.constant 0 : index
    %8 = vector.load %arg7[%c0_6, %c0_7] : memref<16x32xf32, #tpu.memory_space<vmem>>, vector<16x32xf32>
    tpu.vector_store %arg7[%c0_6, %c0_7], %7 {strides = array<i32>} : memref<16x32xf32, #tpu.memory_space<vmem>>, vector<16x32xf32>,
    %c0_i32_8 = arith.constant 0 : i32
    %9 = arith.cmpi eq, %arg2, %c0_i32_8 : i32
    %10 = arith.extui %9 : i1 to i32
    %c0_i32_9 = arith.constant 0 : i32
    %11 = arith.cmpi ne, %10, %c0_i32_9 : i32
    scf.if %11 {
      %c0_10 = arith.constant 0 : index
      %c0_11 = arith.constant 0 : index
      %12 = vector.load %arg7[%c0_10, %c0_11] : memref<16x32xf32, #tpu.memory_space<vmem>>, vector<16x32xf32>
      %c0_12 = arith.constant 0 : index
      %c0_13 = arith.constant 0 : index
      %13 = vector.load %arg5[%c0_12, %c0_13] : memref<1x32xf32, #tpu.memory_space<vmem>>, vector<1x32xf32>
      %14 = vector.broadcast %13 : vector<1x32xf32> to vector<16x32xf32>
      %15 = arith.addf %12, %14 : vector<16x32xf32>
      %16 = arith.truncf %15 : vector<16x32xf32> to vector<16x32xbf16>
      %c0_14 = arith.constant 0 : index
      %c0_15 = arith.constant 0 : index
      %17 = vector.load %arg6[%c0_14, %c0_15] : memref<16x32xbf16, #tpu.memory_space<vmem>>, vector<16x32xbf16>
      tpu.vector_store %arg6[%c0_14, %c0_15], %16 {strides = array<i32>} : memref<16x32xbf16, #tpu.memory_space<vmem>>, vector<16x32xbf16>,
    } else {
    }
    return
  }
  func.func @transform_0(%arg0: i32, %arg1: i32, %arg2: i32) -> (i32, i32) {
    %c0_i32 = arith.constant 0 : i32
    return %arg0, %arg2 : i32, i32
  }
  func.func @transform_1(%arg0: i32, %arg1: i32, %arg2: i32) -> (i32, i32) {
    %c0_i32 = arith.constant 0 : i32
    return %arg2, %arg1 : i32, i32
  }
  func.func @transform_2(%arg0: i32, %arg1: i32, %arg2: i32) -> (i32, i32) {
    %c0_i32 = arith.constant 0 : i32
    %c0_i32_0 = arith.constant 0 : i32
    return %c0_i32, %arg1 : i32, i32
  }
  func.func @transform_3(%arg0: i32, %arg1: i32, %arg2: i32) -> (i32, i32) {
    %c0_i32 = arith.constant 0 : i32
    return %arg0, %arg1 : i32, i32
  }
}

module attributes {stable_mosaic.version = 11 : i64} {
  func.func @_self_attn_kernel(%arg0: i32, %arg1: memref<1x8x96xbf16, #tpu.memory_space<vmem>>, %arg2: memref<1x1x8xf32, #tpu.memory_space<vmem>>, %arg3: memref<1x8x32xbf16, #tpu.memory_space<vmem>>) attributes {dimension_semantics = [#tpu.dimension_semantics<parallel>], iteration_bounds = array<i64: 2>, scalar_prefetch = 0 : i64, scratch_operands = 0 : i64, tpu.core_type = #tpu.core_type<tc>, window_params = [{transform_indices = @transform_0, window_bounds = array<i64: 1, 8, 96>}, {transform_indices = @transform_1, window_bounds = array<i64: 1, 1, 8>}, {transform_indices = @transform_2, window_bounds = array<i64: 1, 8, 32>}]} {
    %c0 = arith.constant 0 : index
    %c0_0 = arith.constant 0 : index
    %c0_1 = arith.constant 0 : index
    %0 = vector.load %arg1[%c0, %c0_0, %c0_1] : memref<1x8x96xbf16, #tpu.memory_space<vmem>>, vector<1x8x96xbf16>
    %1 = vector.shape_cast %0 : vector<1x8x96xbf16> to vector<8x96xbf16>
    %2 = vector.extract_strided_slice %1 {offsets = [0, 0], sizes = [8, 32], strides = [1, 1]} : vector<8x96xbf16> to vector<8x32xbf16>
    %3 = vector.extract_strided_slice %1 {offsets = [0, 32], sizes = [8, 32], strides = [1, 1]} : vector<8x96xbf16> to vector<8x32xbf16>
    %4 = vector.extract_strided_slice %1 {offsets = [0, 64], sizes = [8, 32], strides = [1, 1]} : vector<8x96xbf16> to vector<8x32xbf16>
    %c0_2 = arith.constant 0 : index
    %c0_3 = arith.constant 0 : index
    %c0_4 = arith.constant 0 : index
    %5 = vector.load %arg2[%c0_2, %c0_3, %c0_4] : memref<1x1x8xf32, #tpu.memory_space<vmem>>, vector<1x1x8xf32>
    %6 = vector.shape_cast %5 : vector<1x1x8xf32> to vector<1x8xf32>
    %7 = tpu.iota {dimensions = array<i32: 0>} : vector<8x8xi32>
    %8 = tpu.iota {dimensions = array<i32: 1>} : vector<8x8xi32>
    %9 = arith.cmpi sgt, %8, %7 : vector<8x8xi32>
    %cst = arith.constant -1.000000e+30 : f32
    %cst_5 = arith.constant 0.000000e+00 : f32
    %10 = vector.broadcast %cst : f32 to vector<8x8xf32>
    %11 = vector.broadcast %cst_5 : f32 to vector<8x8xf32>
    %12 = arith.select %9, %10, %11 : vector<8x8xi1>, vector<8x8xf32>
    %13 = vector.broadcast %6 : vector<1x8xf32> to vector<8x8xf32>
    %14 = arith.addf %13, %12 : vector<8x8xf32>
    %15 = vector.extract_strided_slice %2 {offsets = [0, 0], sizes = [8, 8], strides = [1, 1]} : vector<8x32xbf16> to vector<8x8xbf16>
    %16 = vector.extract_strided_slice %3 {offsets = [0, 0], sizes = [8, 8], strides = [1, 1]} : vector<8x32xbf16> to vector<8x8xbf16>
    %17 = vector.extract_strided_slice %4 {offsets = [0, 0], sizes = [8, 8], strides = [1, 1]} : vector<8x32xbf16> to vector<8x8xbf16>
    %cst_6 = arith.constant dense<0.000000e+00> : vector<8x8xf32>
    %18 = tpu.matmul %15, %16, %cst_6 {dimension_numbers = #tpu.dot_dimension_numbers<[1], [1], [0], [0], [0, 0, 1, 0], [], []>} : vector<8x8xbf16>, vector<8x8xbf16>, vector<8x8xf32> -> vector<8x8xf32>
    %cst_7 = arith.constant 0.353553385 : f32
    %19 = vector.broadcast %cst_7 : f32 to vector<8x8xf32>
    %20 = arith.mulf %18, %19 : vector<8x8xf32>
    %21 = arith.addf %20, %14 : vector<8x8xf32>
    %cst_8 = arith.constant dense<0xFF800000> : vector<8xf32>
    %22 = vector.multi_reduction <maximumf>, %21, %cst_8 [1] : vector<8x8xf32> to vector<8xf32>
    %23 = vector.shape_cast %22 : vector<8xf32> to vector<8x1xf32>
    %24 = vector.broadcast %23 : vector<8x1xf32> to vector<8x8xf32>
    %25 = arith.subf %21, %24 : vector<8x8xf32>
    %26 = math.exp %25 : vector<8x8xf32>
    %cst_9 = arith.constant dense<0.000000e+00> : vector<8xf32>
    %27 = vector.multi_reduction <add>, %26, %cst_9 [1] : vector<8x8xf32> to vector<8xf32>
    %28 = vector.shape_cast %27 : vector<8xf32> to vector<8x1xf32>
    %29 = tpu.reciprocal %28 {approx = true} : vector<8x1xf32> -> vector<8x1xf32>
    %30 = vector.broadcast %29 : vector<8x1xf32> to vector<8x8xf32>
    %31 = arith.mulf %26, %30 : vector<8x8xf32>
    %32 = arith.truncf %31 : vector<8x8xf32> to vector<8x8xbf16>
    %cst_10 = arith.constant dense<0.000000e+00> : vector<8x8xf32>
    %33 = tpu.matmul %32, %17, %cst_10 {dimension_numbers = #tpu.dot_dimension_numbers<[1], [0], [0], [1], [0, 0, 1, 1], [], []>} : vector<8x8xbf16>, vector<8x8xbf16>, vector<8x8xf32> -> vector<8x8xf32>
    %34 = arith.truncf %33 : vector<8x8xf32> to vector<8x8xbf16>
    %c0_11 = arith.constant 0 : index
    %c0_12 = arith.constant 0 : index
    %c0_13 = arith.constant 0 : index
    %35 = vector.load %arg3[%c0_11, %c0_12, %c0_13] : memref<1x8x32xbf16, #tpu.memory_space<vmem>>, vector<1x8x8xbf16>
    %36 = vector.shape_cast %35 : vector<1x8x8xbf16> to vector<8x8xbf16>
    %37 = vector.shape_cast %34 : vector<8x8xbf16> to vector<1x8x8xbf16>
    tpu.vector_store %arg3[%c0_11, %c0_12, %c0_13], %37 {strides = array<i32>} : memref<1x8x32xbf16, #tpu.memory_space<vmem>>, vector<1x8x8xbf16>,
    %38 = vector.extract_strided_slice %2 {offsets = [0, 8], sizes = [8, 8], strides = [1, 1]} : vector<8x32xbf16> to vector<8x8xbf16>
    %39 = vector.extract_strided_slice %3 {offsets = [0, 8], sizes = [8, 8], strides = [1, 1]} : vector<8x32xbf16> to vector<8x8xbf16>
    %40 = vector.extract_strided_slice %4 {offsets = [0, 8], sizes = [8, 8], strides = [1, 1]} : vector<8x32xbf16> to vector<8x8xbf16>
    %cst_14 = arith.constant dense<0.000000e+00> : vector<8x8xf32>
    %41 = tpu.matmul %38, %39, %cst_14 {dimension_numbers = #tpu.dot_dimension_numbers<[1], [1], [0], [0], [0, 0, 1, 0], [], []>} : vector<8x8xbf16>, vector<8x8xbf16>, vector<8x8xf32> -> vector<8x8xf32>
    %cst_15 = arith.constant 0.353553385 : f32
    %42 = vector.broadcast %cst_15 : f32 to vector<8x8xf32>
    %43 = arith.mulf %41, %42 : vector<8x8xf32>
    %44 = arith.addf %43, %14 : vector<8x8xf32>
    %cst_16 = arith.constant dense<0xFF800000> : vector<8xf32>
    %45 = vector.multi_reduction <maximumf>, %44, %cst_16 [1] : vector<8x8xf32> to vector<8xf32>
    %46 = vector.shape_cast %45 : vector<8xf32> to vector<8x1xf32>
    %47 = vector.broadcast %46 : vector<8x1xf32> to vector<8x8xf32>
    %48 = arith.subf %44, %47 : vector<8x8xf32>
    %49 = math.exp %48 : vector<8x8xf32>
    %cst_17 = arith.constant dense<0.000000e+00> : vector<8xf32>
    %50 = vector.multi_reduction <add>, %49, %cst_17 [1] : vector<8x8xf32> to vector<8xf32>
    %51 = vector.shape_cast %50 : vector<8xf32> to vector<8x1xf32>
    %52 = tpu.reciprocal %51 {approx = true} : vector<8x1xf32> -> vector<8x1xf32>
    %53 = vector.broadcast %52 : vector<8x1xf32> to vector<8x8xf32>
    %54 = arith.mulf %49, %53 : vector<8x8xf32>
    %55 = arith.truncf %54 : vector<8x8xf32> to vector<8x8xbf16>
    %cst_18 = arith.constant dense<0.000000e+00> : vector<8x8xf32>
    %56 = tpu.matmul %55, %40, %cst_18 {dimension_numbers = #tpu.dot_dimension_numbers<[1], [0], [0], [1], [0, 0, 1, 1], [], []>} : vector<8x8xbf16>, vector<8x8xbf16>, vector<8x8xf32> -> vector<8x8xf32>
    %57 = arith.truncf %56 : vector<8x8xf32> to vector<8x8xbf16>
    %c0_19 = arith.constant 0 : index
    %c0_20 = arith.constant 0 : index
    %c8 = arith.constant 8 : index
    %58 = vector.load %arg3[%c0_19, %c0_20, %c8] : memref<1x8x32xbf16, #tpu.memory_space<vmem>>, vector<1x8x8xbf16>
    %59 = vector.shape_cast %58 : vector<1x8x8xbf16> to vector<8x8xbf16>
    %60 = vector.shape_cast %57 : vector<8x8xbf16> to vector<1x8x8xbf16>
    tpu.vector_store %arg3[%c0_19, %c0_20, %c8], %60 {strides = array<i32>} : memref<1x8x32xbf16, #tpu.memory_space<vmem>>, vector<1x8x8xbf16>,
    %61 = vector.extract_strided_slice %2 {offsets = [0, 16], sizes = [8, 8], strides = [1, 1]} : vector<8x32xbf16> to vector<8x8xbf16>
    %62 = vector.extract_strided_slice %3 {offsets = [0, 16], sizes = [8, 8], strides = [1, 1]} : vector<8x32xbf16> to vector<8x8xbf16>
    %63 = vector.extract_strided_slice %4 {offsets = [0, 16], sizes = [8, 8], strides = [1, 1]} : vector<8x32xbf16> to vector<8x8xbf16>
    %cst_21 = arith.constant dense<0.000000e+00> : vector<8x8xf32>
    %64 = tpu.matmul %61, %62, %cst_21 {dimension_numbers = #tpu.dot_dimension_numbers<[1], [1], [0], [0], [0, 0, 1, 0], [], []>} : vector<8x8xbf16>, vector<8x8xbf16>, vector<8x8xf32> -> vector<8x8xf32>
    %cst_22 = arith.constant 0.353553385 : f32
    %65 = vector.broadcast %cst_22 : f32 to vector<8x8xf32>
    %66 = arith.mulf %64, %65 : vector<8x8xf32>
    %67 = arith.addf %66, %14 : vector<8x8xf32>
    %cst_23 = arith.constant dense<0xFF800000> : vector<8xf32>
    %68 = vector.multi_reduction <maximumf>, %67, %cst_23 [1] : vector<8x8xf32> to vector<8xf32>
    %69 = vector.shape_cast %68 : vector<8xf32> to vector<8x1xf32>
    %70 = vector.broadcast %69 : vector<8x1xf32> to vector<8x8xf32>
    %71 = arith.subf %67, %70 : vector<8x8xf32>
    %72 = math.exp %71 : vector<8x8xf32>
    %cst_24 = arith.constant dense<0.000000e+00> : vector<8xf32>
    %73 = vector.multi_reduction <add>, %72, %cst_24 [1] : vector<8x8xf32> to vector<8xf32>
    %74 = vector.shape_cast %73 : vector<8xf32> to vector<8x1xf32>
    %75 = tpu.reciprocal %74 {approx = true} : vector<8x1xf32> -> vector<8x1xf32>
    %76 = vector.broadcast %75 : vector<8x1xf32> to vector<8x8xf32>
    %77 = arith.mulf %72, %76 : vector<8x8xf32>
    %78 = arith.truncf %77 : vector<8x8xf32> to vector<8x8xbf16>
    %cst_25 = arith.constant dense<0.000000e+00> : vector<8x8xf32>
    %79 = tpu.matmul %78, %63, %cst_25 {dimension_numbers = #tpu.dot_dimension_numbers<[1], [0], [0], [1], [0, 0, 1, 1], [], []>} : vector<8x8xbf16>, vector<8x8xbf16>, vector<8x8xf32> -> vector<8x8xf32>
    %80 = arith.truncf %79 : vector<8x8xf32> to vector<8x8xbf16>
    %c0_26 = arith.constant 0 : index
    %c0_27 = arith.constant 0 : index
    %c16 = arith.constant 16 : index
    %81 = vector.load %arg3[%c0_26, %c0_27, %c16] : memref<1x8x32xbf16, #tpu.memory_space<vmem>>, vector<1x8x8xbf16>
    %82 = vector.shape_cast %81 : vector<1x8x8xbf16> to vector<8x8xbf16>
    %83 = vector.shape_cast %80 : vector<8x8xbf16> to vector<1x8x8xbf16>
    tpu.vector_store %arg3[%c0_26, %c0_27, %c16], %83 {strides = array<i32>} : memref<1x8x32xbf16, #tpu.memory_space<vmem>>, vector<1x8x8xbf16>,
    %84 = vector.extract_strided_slice %2 {offsets = [0, 24], sizes = [8, 8], strides = [1, 1]} : vector<8x32xbf16> to vector<8x8xbf16>
    %85 = vector.extract_strided_slice %3 {offsets = [0, 24], sizes = [8, 8], strides = [1, 1]} : vector<8x32xbf16> to vector<8x8xbf16>
    %86 = vector.extract_strided_slice %4 {offsets = [0, 24], sizes = [8, 8], strides = [1, 1]} : vector<8x32xbf16> to vector<8x8xbf16>
    %cst_28 = arith.constant dense<0.000000e+00> : vector<8x8xf32>
    %87 = tpu.matmul %84, %85, %cst_28 {dimension_numbers = #tpu.dot_dimension_numbers<[1], [1], [0], [0], [0, 0, 1, 0], [], []>} : vector<8x8xbf16>, vector<8x8xbf16>, vector<8x8xf32> -> vector<8x8xf32>
    %cst_29 = arith.constant 0.353553385 : f32
    %88 = vector.broadcast %cst_29 : f32 to vector<8x8xf32>
    %89 = arith.mulf %87, %88 : vector<8x8xf32>
    %90 = arith.addf %89, %14 : vector<8x8xf32>
    %cst_30 = arith.constant dense<0xFF800000> : vector<8xf32>
    %91 = vector.multi_reduction <maximumf>, %90, %cst_30 [1] : vector<8x8xf32> to vector<8xf32>
    %92 = vector.shape_cast %91 : vector<8xf32> to vector<8x1xf32>
    %93 = vector.broadcast %92 : vector<8x1xf32> to vector<8x8xf32>
    %94 = arith.subf %90, %93 : vector<8x8xf32>
    %95 = math.exp %94 : vector<8x8xf32>
    %cst_31 = arith.constant dense<0.000000e+00> : vector<8xf32>
    %96 = vector.multi_reduction <add>, %95, %cst_31 [1] : vector<8x8xf32> to vector<8xf32>
    %97 = vector.shape_cast %96 : vector<8xf32> to vector<8x1xf32>
    %98 = tpu.reciprocal %97 {approx = true} : vector<8x1xf32> -> vector<8x1xf32>
    %99 = vector.broadcast %98 : vector<8x1xf32> to vector<8x8xf32>
    %100 = arith.mulf %95, %99 : vector<8x8xf32>
    %101 = arith.truncf %100 : vector<8x8xf32> to vector<8x8xbf16>
    %cst_32 = arith.constant dense<0.000000e+00> : vector<8x8xf32>
    %102 = tpu.matmul %101, %86, %cst_32 {dimension_numbers = #tpu.dot_dimension_numbers<[1], [0], [0], [1], [0, 0, 1, 1], [], []>} : vector<8x8xbf16>, vector<8x8xbf16>, vector<8x8xf32> -> vector<8x8xf32>
    %103 = arith.truncf %102 : vector<8x8xf32> to vector<8x8xbf16>
    %c0_33 = arith.constant 0 : index
    %c0_34 = arith.constant 0 : index
    %c24 = arith.constant 24 : index
    %104 = vector.load %arg3[%c0_33, %c0_34, %c24] : memref<1x8x32xbf16, #tpu.memory_space<vmem>>, vector<1x8x8xbf16>
    %105 = vector.shape_cast %104 : vector<1x8x8xbf16> to vector<8x8xbf16>
    %106 = vector.shape_cast %103 : vector<8x8xbf16> to vector<1x8x8xbf16>
    tpu.vector_store %arg3[%c0_33, %c0_34, %c24], %106 {strides = array<i32>} : memref<1x8x32xbf16, #tpu.memory_space<vmem>>, vector<1x8x8xbf16>,
    return
  }
  func.func @transform_0(%arg0: i32) -> (i32, i32, i32) {
    %c0_i32 = arith.constant 0 : i32
    %c0_i32_0 = arith.constant 0 : i32
    %c0_i32_1 = arith.constant 0 : i32
    return %arg0, %c0_i32, %c0_i32_0 : i32, i32, i32
  }
  func.func @transform_1(%arg0: i32) -> (i32, i32, i32) {
    %c0_i32 = arith.constant 0 : i32
    %c0_i32_0 = arith.constant 0 : i32
    %c0_i32_1 = arith.constant 0 : i32
    return %arg0, %c0_i32, %c0_i32_0 : i32, i32, i32
  }
  func.func @transform_2(%arg0: i32) -> (i32, i32, i32) {
    %c0_i32 = arith.constant 0 : i32
    %c0_i32_0 = arith.constant 0 : i32
    %c0_i32_1 = arith.constant 0 : i32
    return %arg0, %c0_i32, %c0_i32_0 : i32, i32, i32
  }
}

module attributes {stable_mosaic.version = 11 : i64} {
  func.func @_cross_attn_kernel(%arg0: i32, %arg1: memref<1x8x32xbf16, #tpu.memory_space<vmem>>, %arg2: memref<1x8x64xbf16, #tpu.memory_space<vmem>>, %arg3: memref<1x1x8xf32, #tpu.memory_space<vmem>>, %arg4: memref<1x8x32xbf16, #tpu.memory_space<vmem>>) attributes {dimension_semantics = [#tpu.dimension_semantics<parallel>], iteration_bounds = array<i64: 2>, scalar_prefetch = 0 : i64, scratch_operands = 0 : i64, tpu.core_type = #tpu.core_type<tc>, window_params = [{transform_indices = @transform_0, window_bounds = array<i64: 1, 8, 32>}, {transform_indices = @transform_1, window_bounds = array<i64: 1, 8, 64>}, {transform_indices = @transform_2, window_bounds = array<i64: 1, 1, 8>}, {transform_indices = @transform_3, window_bounds = array<i64: 1, 8, 32>}]} {
    %c0 = arith.constant 0 : index
    %c0_0 = arith.constant 0 : index
    %c0_1 = arith.constant 0 : index
    %0 = vector.load %arg1[%c0, %c0_0, %c0_1] : memref<1x8x32xbf16, #tpu.memory_space<vmem>>, vector<1x8x32xbf16>
    %1 = vector.shape_cast %0 : vector<1x8x32xbf16> to vector<8x32xbf16>
    %c0_2 = arith.constant 0 : index
    %c0_3 = arith.constant 0 : index
    %c0_4 = arith.constant 0 : index
    %2 = vector.load %arg2[%c0_2, %c0_3, %c0_4] : memref<1x8x64xbf16, #tpu.memory_space<vmem>>, vector<1x8x64xbf16>
    %3 = vector.shape_cast %2 : vector<1x8x64xbf16> to vector<8x64xbf16>
    %4 = vector.extract_strided_slice %3 {offsets = [0, 0], sizes = [8, 32], strides = [1, 1]} : vector<8x64xbf16> to vector<8x32xbf16>
    %5 = vector.extract_strided_slice %3 {offsets = [0, 32], sizes = [8, 32], strides = [1, 1]} : vector<8x64xbf16> to vector<8x32xbf16>
    %c0_5 = arith.constant 0 : index
    %c0_6 = arith.constant 0 : index
    %c0_7 = arith.constant 0 : index
    %6 = vector.load %arg3[%c0_5, %c0_6, %c0_7] : memref<1x1x8xf32, #tpu.memory_space<vmem>>, vector<1x1x8xf32>
    %7 = vector.shape_cast %6 : vector<1x1x8xf32> to vector<1x8xf32>
    %8 = vector.extract_strided_slice %1 {offsets = [0, 0], sizes = [8, 8], strides = [1, 1]} : vector<8x32xbf16> to vector<8x8xbf16>
    %9 = vector.extract_strided_slice %4 {offsets = [0, 0], sizes = [8, 8], strides = [1, 1]} : vector<8x32xbf16> to vector<8x8xbf16>
    %10 = vector.extract_strided_slice %5 {offsets = [0, 0], sizes = [8, 8], strides = [1, 1]} : vector<8x32xbf16> to vector<8x8xbf16>
    %cst = arith.constant dense<0.000000e+00> : vector<8x8xf32>
    %11 = tpu.matmul %8, %9, %cst {dimension_numbers = #tpu.dot_dimension_numbers<[1], [1], [0], [0], [0, 0, 1, 0], [], []>} : vector<8x8xbf16>, vector<8x8xbf16>, vector<8x8xf32> -> vector<8x8xf32>
    %cst_8 = arith.constant 0.353553385 : f32
    %12 = vector.broadcast %cst_8 : f32 to vector<8x8xf32>
    %13 = arith.mulf %11, %12 : vector<8x8xf32>
    %14 = vector.broadcast %7 : vector<1x8xf32> to vector<8x8xf32>
    %15 = arith.addf %13, %14 : vector<8x8xf32>
    %cst_9 = arith.constant dense<0xFF800000> : vector<8xf32>
    %16 = vector.multi_reduction <maximumf>, %15, %cst_9 [1] : vector<8x8xf32> to vector<8xf32>
    %17 = vector.shape_cast %16 : vector<8xf32> to vector<8x1xf32>
    %18 = vector.broadcast %17 : vector<8x1xf32> to vector<8x8xf32>
    %19 = arith.subf %15, %18 : vector<8x8xf32>
    %20 = math.exp %19 : vector<8x8xf32>
    %cst_10 = arith.constant dense<0.000000e+00> : vector<8xf32>
    %21 = vector.multi_reduction <add>, %20, %cst_10 [1] : vector<8x8xf32> to vector<8xf32>
    %22 = vector.shape_cast %21 : vector<8xf32> to vector<8x1xf32>
    %23 = tpu.reciprocal %22 {approx = true} : vector<8x1xf32> -> vector<8x1xf32>
    %24 = vector.broadcast %23 : vector<8x1xf32> to vector<8x8xf32>
    %25 = arith.mulf %20, %24 : vector<8x8xf32>
    %26 = arith.truncf %25 : vector<8x8xf32> to vector<8x8xbf16>
    %cst_11 = arith.constant dense<0.000000e+00> : vector<8x8xf32>
    %27 = tpu.matmul %26, %10, %cst_11 {dimension_numbers = #tpu.dot_dimension_numbers<[1], [0], [0], [1], [0, 0, 1, 1], [], []>} : vector<8x8xbf16>, vector<8x8xbf16>, vector<8x8xf32> -> vector<8x8xf32>
    %28 = arith.truncf %27 : vector<8x8xf32> to vector<8x8xbf16>
    %c0_12 = arith.constant 0 : index
    %c0_13 = arith.constant 0 : index
    %c0_14 = arith.constant 0 : index
    %29 = vector.load %arg4[%c0_12, %c0_13, %c0_14] : memref<1x8x32xbf16, #tpu.memory_space<vmem>>, vector<1x8x8xbf16>
    %30 = vector.shape_cast %29 : vector<1x8x8xbf16> to vector<8x8xbf16>
    %31 = vector.shape_cast %28 : vector<8x8xbf16> to vector<1x8x8xbf16>
    tpu.vector_store %arg4[%c0_12, %c0_13, %c0_14], %31 {strides = array<i32>} : memref<1x8x32xbf16, #tpu.memory_space<vmem>>, vector<1x8x8xbf16>,
    %32 = vector.extract_strided_slice %1 {offsets = [0, 8], sizes = [8, 8], strides = [1, 1]} : vector<8x32xbf16> to vector<8x8xbf16>
    %33 = vector.extract_strided_slice %4 {offsets = [0, 8], sizes = [8, 8], strides = [1, 1]} : vector<8x32xbf16> to vector<8x8xbf16>
    %34 = vector.extract_strided_slice %5 {offsets = [0, 8], sizes = [8, 8], strides = [1, 1]} : vector<8x32xbf16> to vector<8x8xbf16>
    %cst_15 = arith.constant dense<0.000000e+00> : vector<8x8xf32>
    %35 = tpu.matmul %32, %33, %cst_15 {dimension_numbers = #tpu.dot_dimension_numbers<[1], [1], [0], [0], [0, 0, 1, 0], [], []>} : vector<8x8xbf16>, vector<8x8xbf16>, vector<8x8xf32> -> vector<8x8xf32>
    %cst_16 = arith.constant 0.353553385 : f32
    %36 = vector.broadcast %cst_16 : f32 to vector<8x8xf32>
    %37 = arith.mulf %35, %36 : vector<8x8xf32>
    %38 = vector.broadcast %7 : vector<1x8xf32> to vector<8x8xf32>
    %39 = arith.addf %37, %38 : vector<8x8xf32>
    %cst_17 = arith.constant dense<0xFF800000> : vector<8xf32>
    %40 = vector.multi_reduction <maximumf>, %39, %cst_17 [1] : vector<8x8xf32> to vector<8xf32>
    %41 = vector.shape_cast %40 : vector<8xf32> to vector<8x1xf32>
    %42 = vector.broadcast %41 : vector<8x1xf32> to vector<8x8xf32>
    %43 = arith.subf %39, %42 : vector<8x8xf32>
    %44 = math.exp %43 : vector<8x8xf32>
    %cst_18 = arith.constant dense<0.000000e+00> : vector<8xf32>
    %45 = vector.multi_reduction <add>, %44, %cst_18 [1] : vector<8x8xf32> to vector<8xf32>
    %46 = vector.shape_cast %45 : vector<8xf32> to vector<8x1xf32>
    %47 = tpu.reciprocal %46 {approx = true} : vector<8x1xf32> -> vector<8x1xf32>
    %48 = vector.broadcast %47 : vector<8x1xf32> to vector<8x8xf32>
    %49 = arith.mulf %44, %48 : vector<8x8xf32>
    %50 = arith.truncf %49 : vector<8x8xf32> to vector<8x8xbf16>
    %cst_19 = arith.constant dense<0.000000e+00> : vector<8x8xf32>
    %51 = tpu.matmul %50, %34, %cst_19 {dimension_numbers = #tpu.dot_dimension_numbers<[1], [0], [0], [1], [0, 0, 1, 1], [], []>} : vector<8x8xbf16>, vector<8x8xbf16>, vector<8x8xf32> -> vector<8x8xf32>
    %52 = arith.truncf %51 : vector<8x8xf32> to vector<8x8xbf16>
    %c0_20 = arith.constant 0 : index
    %c0_21 = arith.constant 0 : index
    %c8 = arith.constant 8 : index
    %53 = vector.load %arg4[%c0_20, %c0_21, %c8] : memref<1x8x32xbf16, #tpu.memory_space<vmem>>, vector<1x8x8xbf16>
    %54 = vector.shape_cast %53 : vector<1x8x8xbf16> to vector<8x8xbf16>
    %55 = vector.shape_cast %52 : vector<8x8xbf16> to vector<1x8x8xbf16>
    tpu.vector_store %arg4[%c0_20, %c0_21, %c8], %55 {strides = array<i32>} : memref<1x8x32xbf16, #tpu.memory_space<vmem>>, vector<1x8x8xbf16>,
    %56 = vector.extract_strided_slice %1 {offsets = [0, 16], sizes = [8, 8], strides = [1, 1]} : vector<8x32xbf16> to vector<8x8xbf16>
    %57 = vector.extract_strided_slice %4 {offsets = [0, 16], sizes = [8, 8], strides = [1, 1]} : vector<8x32xbf16> to vector<8x8xbf16>
    %58 = vector.extract_strided_slice %5 {offsets = [0, 16], sizes = [8, 8], strides = [1, 1]} : vector<8x32xbf16> to vector<8x8xbf16>
    %cst_22 = arith.constant dense<0.000000e+00> : vector<8x8xf32>
    %59 = tpu.matmul %56, %57, %cst_22 {dimension_numbers = #tpu.dot_dimension_numbers<[1], [1], [0], [0], [0, 0, 1, 0], [], []>} : vector<8x8xbf16>, vector<8x8xbf16>, vector<8x8xf32> -> vector<8x8xf32>
    %cst_23 = arith.constant 0.353553385 : f32
    %60 = vector.broadcast %cst_23 : f32 to vector<8x8xf32>
    %61 = arith.mulf %59, %60 : vector<8x8xf32>
    %62 = vector.broadcast %7 : vector<1x8xf32> to vector<8x8xf32>
    %63 = arith.addf %61, %62 : vector<8x8xf32>
    %cst_24 = arith.constant dense<0xFF800000> : vector<8xf32>
    %64 = vector.multi_reduction <maximumf>, %63, %cst_24 [1] : vector<8x8xf32> to vector<8xf32>
    %65 = vector.shape_cast %64 : vector<8xf32> to vector<8x1xf32>
    %66 = vector.broadcast %65 : vector<8x1xf32> to vector<8x8xf32>
    %67 = arith.subf %63, %66 : vector<8x8xf32>
    %68 = math.exp %67 : vector<8x8xf32>
    %cst_25 = arith.constant dense<0.000000e+00> : vector<8xf32>
    %69 = vector.multi_reduction <add>, %68, %cst_25 [1] : vector<8x8xf32> to vector<8xf32>
    %70 = vector.shape_cast %69 : vector<8xf32> to vector<8x1xf32>
    %71 = tpu.reciprocal %70 {approx = true} : vector<8x1xf32> -> vector<8x1xf32>
    %72 = vector.broadcast %71 : vector<8x1xf32> to vector<8x8xf32>
    %73 = arith.mulf %68, %72 : vector<8x8xf32>
    %74 = arith.truncf %73 : vector<8x8xf32> to vector<8x8xbf16>
    %cst_26 = arith.constant dense<0.000000e+00> : vector<8x8xf32>
    %75 = tpu.matmul %74, %58, %cst_26 {dimension_numbers = #tpu.dot_dimension_numbers<[1], [0], [0], [1], [0, 0, 1, 1], [], []>} : vector<8x8xbf16>, vector<8x8xbf16>, vector<8x8xf32> -> vector<8x8xf32>
    %76 = arith.truncf %75 : vector<8x8xf32> to vector<8x8xbf16>
    %c0_27 = arith.constant 0 : index
    %c0_28 = arith.constant 0 : index
    %c16 = arith.constant 16 : index
    %77 = vector.load %arg4[%c0_27, %c0_28, %c16] : memref<1x8x32xbf16, #tpu.memory_space<vmem>>, vector<1x8x8xbf16>
    %78 = vector.shape_cast %77 : vector<1x8x8xbf16> to vector<8x8xbf16>
    %79 = vector.shape_cast %76 : vector<8x8xbf16> to vector<1x8x8xbf16>
    tpu.vector_store %arg4[%c0_27, %c0_28, %c16], %79 {strides = array<i32>} : memref<1x8x32xbf16, #tpu.memory_space<vmem>>, vector<1x8x8xbf16>,
    %80 = vector.extract_strided_slice %1 {offsets = [0, 24], sizes = [8, 8], strides = [1, 1]} : vector<8x32xbf16> to vector<8x8xbf16>
    %81 = vector.extract_strided_slice %4 {offsets = [0, 24], sizes = [8, 8], strides = [1, 1]} : vector<8x32xbf16> to vector<8x8xbf16>
    %82 = vector.extract_strided_slice %5 {offsets = [0, 24], sizes = [8, 8], strides = [1, 1]} : vector<8x32xbf16> to vector<8x8xbf16>
    %cst_29 = arith.constant dense<0.000000e+00> : vector<8x8xf32>
    %83 = tpu.matmul %80, %81, %cst_29 {dimension_numbers = #tpu.dot_dimension_numbers<[1], [1], [0], [0], [0, 0, 1, 0], [], []>} : vector<8x8xbf16>, vector<8x8xbf16>, vector<8x8xf32> -> vector<8x8xf32>
    %cst_30 = arith.constant 0.353553385 : f32
    %84 = vector.broadcast %cst_30 : f32 to vector<8x8xf32>
    %85 = arith.mulf %83, %84 : vector<8x8xf32>
    %86 = vector.broadcast %7 : vector<1x8xf32> to vector<8x8xf32>
    %87 = arith.addf %85, %86 : vector<8x8xf32>
    %cst_31 = arith.constant dense<0xFF800000> : vector<8xf32>
    %88 = vector.multi_reduction <maximumf>, %87, %cst_31 [1] : vector<8x8xf32> to vector<8xf32>
    %89 = vector.shape_cast %88 : vector<8xf32> to vector<8x1xf32>
    %90 = vector.broadcast %89 : vector<8x1xf32> to vector<8x8xf32>
    %91 = arith.subf %87, %90 : vector<8x8xf32>
    %92 = math.exp %91 : vector<8x8xf32>
    %cst_32 = arith.constant dense<0.000000e+00> : vector<8xf32>
    %93 = vector.multi_reduction <add>, %92, %cst_32 [1] : vector<8x8xf32> to vector<8xf32>
    %94 = vector.shape_cast %93 : vector<8xf32> to vector<8x1xf32>
    %95 = tpu.reciprocal %94 {approx = true} : vector<8x1xf32> -> vector<8x1xf32>
    %96 = vector.broadcast %95 : vector<8x1xf32> to vector<8x8xf32>
    %97 = arith.mulf %92, %96 : vector<8x8xf32>
    %98 = arith.truncf %97 : vector<8x8xf32> to vector<8x8xbf16>
    %cst_33 = arith.constant dense<0.000000e+00> : vector<8x8xf32>
    %99 = tpu.matmul %98, %82, %cst_33 {dimension_numbers = #tpu.dot_dimension_numbers<[1], [0], [0], [1], [0, 0, 1, 1], [], []>} : vector<8x8xbf16>, vector<8x8xbf16>, vector<8x8xf32> -> vector<8x8xf32>
    %100 = arith.truncf %99 : vector<8x8xf32> to vector<8x8xbf16>
    %c0_34 = arith.constant 0 : index
    %c0_35 = arith.constant 0 : index
    %c24 = arith.constant 24 : index
    %101 = vector.load %arg4[%c0_34, %c0_35, %c24] : memref<1x8x32xbf16, #tpu.memory_space<vmem>>, vector<1x8x8xbf16>
    %102 = vector.shape_cast %101 : vector<1x8x8xbf16> to vector<8x8xbf16>
    %103 = vector.shape_cast %100 : vector<8x8xbf16> to vector<1x8x8xbf16>
    tpu.vector_store %arg4[%c0_34, %c0_35, %c24], %103 {strides = array<i32>} : memref<1x8x32xbf16, #tpu.memory_space<vmem>>, vector<1x8x8xbf16>,
    return
  }
  func.func @transform_0(%arg0: i32) -> (i32, i32, i32) {
    %c0_i32 = arith.constant 0 : i32
    %c0_i32_0 = arith.constant 0 : i32
    %c0_i32_1 = arith.constant 0 : i32
    return %arg0, %c0_i32, %c0_i32_0 : i32, i32, i32
  }
  func.func @transform_1(%arg0: i32) -> (i32, i32, i32) {
    %c0_i32 = arith.constant 0 : i32
    %c0_i32_0 = arith.constant 0 : i32
    %c0_i32_1 = arith.constant 0 : i32
    return %arg0, %c0_i32, %c0_i32_0 : i32, i32, i32
  }
  func.func @transform_2(%arg0: i32) -> (i32, i32, i32) {
    %c0_i32 = arith.constant 0 : i32
    %c0_i32_0 = arith.constant 0 : i32
    %c0_i32_1 = arith.constant 0 : i32
    return %arg0, %c0_i32, %c0_i32_0 : i32, i32, i32
  }
  func.func @transform_3(%arg0: i32) -> (i32, i32, i32) {
    %c0_i32 = arith.constant 0 : i32
    %c0_i32_0 = arith.constant 0 : i32
    %c0_i32_1 = arith.constant 0 : i32
    return %arg0, %c0_i32, %c0_i32_0 : i32, i32, i32
  }
}

module attributes {stable_mosaic.version = 11 : i64} {
  func.func @_linear_kernel(%arg0: i32, %arg1: i32, %arg2: i32, %arg3: memref<16x32xbf16, #tpu.memory_space<vmem>>, %arg4: memref<32x16xbf16, #tpu.memory_space<vmem>>, %arg5: memref<1x16xf32, #tpu.memory_space<vmem>>, %arg6: memref<16x16xf32, #tpu.memory_space<vmem>>, %arg7: memref<16x16xf32, #tpu.memory_space<vmem>>) attributes {dimension_semantics = [#tpu.dimension_semantics<parallel>, #tpu.dimension_semantics<parallel>, #tpu.dimension_semantics<arbitrary>], iteration_bounds = array<i64: 1, 1, 1>, scalar_prefetch = 0 : i64, scratch_operands = 1 : i64, tpu.core_type = #tpu.core_type<tc>, window_params = [{transform_indices = @transform_0, window_bounds = array<i64: 16, 32>}, {transform_indices = @transform_1, window_bounds = array<i64: 32, 16>}, {transform_indices = @transform_2, window_bounds = array<i64: 1, 16>}, {transform_indices = @transform_3, window_bounds = array<i64: 16, 16>}]} {
    %c0_i32 = arith.constant 0 : i32
    %0 = arith.cmpi eq, %arg2, %c0_i32 : i32
    %1 = arith.extui %0 : i1 to i32
    %c0_i32_0 = arith.constant 0 : i32
    %2 = arith.cmpi ne, %1, %c0_i32_0 : i32
    scf.if %2 {
      %cst_10 = arith.constant 0.000000e+00 : f32
      %12 = vector.broadcast %cst_10 : f32 to vector<16x16xf32>
      %c0_11 = arith.constant 0 : index
      %c0_12 = arith.constant 0 : index
      %13 = vector.load %arg7[%c0_11, %c0_12] : memref<16x16xf32, #tpu.memory_space<vmem>>, vector<16x16xf32>
      tpu.vector_store %arg7[%c0_11, %c0_12], %12 {strides = array<i32>} : memref<16x16xf32, #tpu.memory_space<vmem>>, vector<16x16xf32>,
    } else {
    }
    %c0 = arith.constant 0 : index
    %c0_1 = arith.constant 0 : index
    %3 = vector.load %arg7[%c0, %c0_1] : memref<16x16xf32, #tpu.memory_space<vmem>>, vector<16x16xf32>
    %c0_2 = arith.constant 0 : index
    %c0_3 = arith.constant 0 : index
    %4 = vector.load %arg3[%c0_2, %c0_3] : memref<16x32xbf16, #tpu.memory_space<vmem>>, vector<16x32xbf16>
    %c0_4 = arith.constant 0 : index
    %c0_5 = arith.constant 0 : index
    %5 = vector.load %arg4[%c0_4, %c0_5] : memref<32x16xbf16, #tpu.memory_space<vmem>>, vector<32x16xbf16>
    %cst = arith.constant dense<0.000000e+00> : vector<16x16xf32>
    %6 = tpu.matmul %4, %5, %cst {dimension_numbers = #tpu.dot_dimension_numbers<[1], [0], [0], [1], [0, 0, 1, 1], [], []>} : vector<16x32xbf16>, vector<32x16xbf16>, vector<16x16xf32> -> vector<16x16xf32>
    %7 = arith.addf %3, %6 : vector<16x16xf32>
    %c0_6 = arith.constant 0 : index
    %c0_7 = arith.constant 0 : index
    %8 = vector.load %arg7[%c0_6, %c0_7] : memref<16x16xf32, #tpu.memory_space<vmem>>, vector<16x16xf32>
    tpu.vector_store %arg7[%c0_6, %c0_7], %7 {strides = array<i32>} : memref<16x16xf32, #tpu.memory_space<vmem>>, vector<16x16xf32>,
    %c0_i32_8 = arith.constant 0 : i32
    %9 = arith.cmpi eq, %arg2, %c0_i32_8 : i32
    %10 = arith.extui %9 : i1 to i32
    %c0_i32_9 = arith.constant 0 : i32
    %11 = arith.cmpi ne, %10, %c0_i32_9 : i32
    scf.if %11 {
      %c0_10 = arith.constant 0 : index
      %c0_11 = arith.constant 0 : index
      %12 = vector.load %arg7[%c0_10, %c0_11] : memref<16x16xf32, #tpu.memory_space<vmem>>, vector<16x16xf32>
      %c0_12 = arith.constant 0 : index
      %c0_13 = arith.constant 0 : index
      %13 = vector.load %arg5[%c0_12, %c0_13] : memref<1x16xf32, #tpu.memory_space<vmem>>, vector<1x16xf32>
      %14 = vector.broadcast %13 : vector<1x16xf32> to vector<16x16xf32>
      %15 = arith.addf %12, %14 : vector<16x16xf32>
      %c0_14 = arith.constant 0 : index
      %c0_15 = arith.constant 0 : index
      %16 = vector.load %arg6[%c0_14, %c0_15] : memref<16x16xf32, #tpu.memory_space<vmem>>, vector<16x16xf32>
      tpu.vector_store %arg6[%c0_14, %c0_15], %15 {strides = array<i32>} : memref<16x16xf32, #tpu.memory_space<vmem>>, vector<16x16xf32>,
    } else {
    }
    return
  }
  func.func @transform_0(%arg0: i32, %arg1: i32, %arg2: i32) -> (i32, i32) {
    %c0_i32 = arith.constant 0 : i32
    return %arg0, %arg2 : i32, i32
  }
  func.func @transform_1(%arg0: i32, %arg1: i32, %arg2: i32) -> (i32, i32) {
    %c0_i32 = arith.constant 0 : i32
    return %arg2, %arg1 : i32, i32
  }
  func.func @transform_2(%arg0: i32, %arg1: i32, %arg2: i32) -> (i32, i32) {
    %c0_i32 = arith.constant 0 : i32
    %c0_i32_0 = arith.constant 0 : i32
    return %c0_i32, %arg1 : i32, i32
  }
  func.func @transform_3(%arg0: i32, %arg1: i32, %arg2: i32) -> (i32, i32) {
    %c0_i32 = arith.constant 0 : i32
    return %arg0, %arg1 : i32, i32
  }
}

</mosaic_0001>

<bundles_post_ra>
// kernel: forward.29
= control target key start
LH: loop header
LB: loop body
LE: loop exit
PB: predicated region body
PF: predicated region fallthrough
CT: control target
= control target key end

     0   :  { %vm19_vm0 = vcmask 785408   ;;  %v151_v0 = vmov 0.0   ;;  %vm152_vm1 = vmmov 0   ;;  %vm47_vm2 = vcmask 261120   ;;  %s195_s1 = inlined_call_operand.vmem [shape: bf16[32,96], index: 1, kind: input, shape index: {}]   ;;  %s196_s0 = inlined_call_operand.vmem [shape: bf16[16,32], index: 0, kind: input, shape index: {}]   ;;  %s197_s2 = inlined_call_operand.vmem [shape: f32[1,96], index: 2, kind: input, shape index: {}]   ;;  %s198_s3 = inlined_call_operand.vmem [shape: bf16[16,96], index: 3, kind: output, shape index: {}]  }
   0x1   :  { %138 = vmatprep.subr.bf16.mxu0 %v151_v0  ;;  %v148_v1 = vld [vmem:[%s195_s1] sm:$0xff]   ;;  %142 = vmatprep.mubr.msk.bf16.mxu0 %vm152_vm1, %v151_v0  ;;  %20 = vst.msk [vmem:[#allocation2] sm:$0xff] %vm19_vm0, %v151_v0  ;;  %21 = vst.msk [vmem:[#allocation2 + $0x8] sm:$0xff] %vm19_vm0, %v151_v0  ;;  %v149_v2 = vld [vmem:[%s195_s1 + $0x8] sm:$0xff]   ;;  %vm119_vm3 = vcmask 781312  }
   0x2   :  { %139 = vmatpush3.bf16.msra.mxu0 %v148_v1  ;;  %v150_v3 = vld [vmem:[%s196_s0] sm:$0xff]  }
   0x3   :  { %140 = vmatprep.subr.bf16.mxu0 %v151_v0  ;;  %v130_v12 = vld [vmem:[%s197_s2] ss:$0 sm:$0xff] }
   0x6   :  { %141 = vmatpush3.bf16.msra.mxu0 %v149_v2 }
   0x8   :  { %v22_v4 = vld [vmem:[#allocation2] sm:$0xff]  ;;  %v23_v6 = vld [vmem:[#allocation2 + $0x8] sm:$0xff] }
   0x9   :  { %143 = vmatmul.mubr.msk.bf16.vlgmr.msra.gmra.mrb[0].mxu0 %vm47_vm2, %v150_v3 }
  0xdc   :  { %v85_v5 = vpop.f32.mrb[0].mxu0 }
  0xdd   :  { %v92_v7 = vadd.f32 %v85_v5, %v22_v4  ;;  %v144_v8 = vpop.f32.mrb[1].mxu0 }
  0xde   :  { %v88_v9 = vpop.f32.mrb[2].mxu0 }
  0xdf   :  { %95 = vst.msk [vmem:[#allocation2] sm:$0xff] %vm19_vm0, %v92_v7  ;;  %v93_v10 = vadd.f32 %v88_v9, %v23_v6  ;;  %v145_v11 = vpop.f32.mrb[3].mxu0 }
  0xe1   :  { %96 = vst.msk [vmem:[#allocation2 + $0x8] sm:$0xff] %vm19_vm0, %v93_v10 }
  0xe6   :  { %v100_v13 = vld [vmem:[#allocation2] sm:$0xff] }
  0xe7   :  { %v109_v14 = vadd.f32 %v130_v12, %v100_v13 }
  0xe8   :  { %v101_v15 = vld [vmem:[#allocation2 + $0x8] sm:$0xff] }
  0xe9   :  { %v133_v16 = vpack.c.bf16 %v109_v14, %v109_v14  ;;  %v110_v17 = vadd.f32 %v130_v12, %v101_v15 }
  0xeb   :  { %120 = vst.msk [vmem:[%s198_s3] sm:$0xf] %vm119_vm3, %v133_v16  ;;  %v134_v18 = vpack.c.bf16 %v110_v17, %v110_v17 }
  0xed   :  { %121 = vst.msk [vmem:[%s198_s3 + $0x4] sm:$0xf] %vm119_vm3, %v134_v18 }

// kernel: forward.31
= control target key start
LH: loop header
LB: loop body
LE: loop exit
PB: predicated region body
PF: predicated region fallthrough
CT: control target
= control target key end

     0   :  { %vm28_vm0 = vcmask 261120   ;;  %v220_v0 = vmov 0.0   ;;  %vm221_vm1 = vmmov 0   ;;  %vm178_vm2 = vcmask 257024   ;;  %s293_s1 = inlined_call_operand.vmem [shape: bf16[32,32], index: 1, kind: input, shape index: {}]   ;;  %s294_s0 = inlined_call_operand.vmem [shape: bf16[16,32], index: 0, kind: input, shape index: {}]   ;;  %s295_s3 = inlined_call_operand.vmem [shape: bf16[16,32], index: 3, kind: input, shape index: {}]   ;;  %s296_s2 = inlined_call_operand.vmem [shape: f32[1,32], index: 2, kind: input, shape index: {}]   ;;  %s297_s4 = inlined_call_operand.vmem [shape: f32[1,32], index: 4, kind: input, shape index: {}]   ;;  %s298_s5 = inlined_call_operand.vmem [shape: f32[1,32], index: 5, kind: input, shape index: {}]   ;;  %s299_s6 = inlined_call_operand.vmem [shape: bf16[16,32], index: 6, kind: output, shape index: {}]  }
   0x1   :  { %203 = vmatprep.subr.bf16.mxu0 %v220_v0  ;;  %v213_v1 = vld [vmem:[%s293_s1] sm:$0xff]   ;;  %207 = vmatprep.mubr.msk.bf16.mxu0 %vm221_vm1, %v220_v0  ;;  %29 = vst.msk [vmem:[#allocation2] sm:$0xff] %vm28_vm0, %v220_v0  ;;  %30 = vst.msk [vmem:[#allocation2 + $0x8] sm:$0xff] %vm28_vm0, %v220_v0  ;;  %v214_v2 = vld [vmem:[%s293_s1 + $0x8] sm:$0xff]  }
   0x2   :  { %204 = vmatpush3.bf16.msra.mxu0 %v213_v1  ;;  %v215_v3 = vld [vmem:[%s294_s0] sm:$0xff]  }
   0x3   :  { %205 = vmatprep.subr.bf16.mxu0 %v220_v0  ;;  %v197_v12 = vld [vmem:[%s295_s3] sm:$0xff]  }
   0x4   :  { %v189_v13 = vld [vmem:[%s296_s2] ss:$0 sm:$0xff]  ;;  %v198_v14 = vunpack.c.l.bf16 %v197_v12  ;;  %v199_v17 = vunpack.c.h.bf16 %v197_v12 }
   0x5   :  { %v190_v41 = vld [vmem:[%s297_s4] ss:$0 sm:$0xff] }
   0x6   :  { %206 = vmatpush3.bf16.msra.mxu0 %v214_v2  ;;  %v191_v43 = vld [vmem:[%s298_s5] ss:$0 sm:$0xff] }
   0x8   :  { %v31_v4 = vld [vmem:[#allocation2] sm:$0xff]  ;;  %v32_v6 = vld [vmem:[#allocation2 + $0x8] sm:$0xff] }
   0x9   :  { %208 = vmatmul.mubr.msk.bf16.vlgmr.msra.gmra.mrb[0].mxu0 %vm28_vm0, %v215_v3 }
  0xdc   :  { %v94_v5 = vpop.f32.mrb[0].mxu0 }
  0xdd   :  { %v101_v7 = vadd.f32 %v94_v5, %v31_v4  ;;  %v209_v8 = vpop.f32.mrb[1].mxu0 }
  0xde   :  { %v97_v9 = vpop.f32.mrb[2].mxu0 }
  0xdf   :  { %103 = vst.msk [vmem:[#allocation2] sm:$0xff] %vm28_vm0, %v101_v7  ;;  %v102_v10 = vadd.f32 %v97_v9, %v32_v6  ;;  %v210_v11 = vpop.f32.mrb[3].mxu0 }
  0xe1   :  { %104 = vst.msk [vmem:[#allocation2 + $0x8] sm:$0xff] %vm28_vm0, %v102_v10 }
  0xe6   :  { %v108_v15 = vld [vmem:[#allocation2] sm:$0xff] }
  0xe7   :  { %v117_v16 = vadd.f32 %v189_v13, %v108_v15 }
  0xe8   :  { %v109_v18 = vld [vmem:[#allocation2 + $0x8] sm:$0xff] }
  0xe9   :  { %v123_v19 = vadd.f32 %v198_v14, %v117_v16  ;;  %v118_v20 = vadd.f32 %v189_v13, %v109_v18 }
  0xeb   :  { %v125_v21 = vsel %vm28_vm0, %v123_v19, 0.0  ;;  %v124_v22 = vadd.f32 %v199_v17, %v118_v20 }
  0xec   :  { %126 = vadd.xlane.f32.xlu0 %v125_v21 }
  0xed   :  { %v128_v23 = vsel %vm28_vm0, %v124_v22, 0.0 }
  0xf0   :  { %129 = vadd.xlane.f32.xlu0 %v128_v23 }
 0x179   :  { %v127_v24 = vpop.xlane.xlu0 %126 }
 0x17a   :  { %v132_v25 = vmul.f32 0.03125, %v127_v24 }
 0x17c   :  { %v134_v26 = vsub.f32 %v123_v19, %v132_v25 }
 0x17d   :  { %v130_v27 = vpop.xlane.xlu0 %129 }
 0x17e   :  { %v133_v28 = vmul.f32 0.03125, %v130_v27  ;;  %v136_v29 = vmul.f32 %v134_v26, %v134_v26 }
 0x180   :  { %v135_v30 = vsub.f32 %v124_v22, %v133_v28  ;;  %v138_v31 = vsel %vm28_vm0, %v136_v29, 0.0 }
 0x181   :  { %139 = vadd.xlane.f32.xlu1 %v138_v31 }
 0x182   :  { %v137_v32 = vmul.f32 %v135_v30, %v135_v30 }
 0x184   :  { %v141_v33 = vsel %vm28_vm0, %v137_v32, 0.0 }
 0x185   :  { %142 = vadd.xlane.f32.xlu1 %v141_v33 }
 0x20e   :  { %v140_v34 = vpop.xlane.xlu1 %139 }
 0x20f   :  { %v144_v35 = vmul.f32 0.03125, %v140_v34 }
 0x211   :  { %v146_v36 = vadd.f32 1e-05, %v144_v35 }
 0x212   :  { %v143_v37 = vpop.xlane.xlu1 %142 }
 0x213   :  { %216 = vrsqrt.f32 %v146_v36  ;;  %v145_v38 = vmul.f32 0.03125, %v143_v37 }
 0x215   :  { %v147_v39 = vadd.f32 1e-05, %v145_v38 }
 0x217   :  { %218 = vrsqrt.f32 %v147_v39 }
 0x21d   :  { %v217_v40 = vpop.eup %216 }
 0x21e   :  { %v150_v42 = vmul.f32 %v217_v40, %v134_v26 }
 0x220   :  { %v159_v44 = vmul.f32 %v190_v41, %v150_v42 }
 0x221   :  { %v219_v45 = vpop.eup %218 }
 0x222   :  { %v168_v46 = vadd.f32 %v191_v43, %v159_v44  ;;  %v151_v47 = vmul.f32 %v219_v45, %v135_v30 }
 0x224   :  { %v194_v48 = vpack.c.bf16 %v168_v46, %v168_v46  ;;  %v160_v49 = vmul.f32 %v190_v41, %v151_v47 }
 0x226   :  { %179 = vst.msk [vmem:[%s299_s6] sm:$0xf] %vm178_vm2, %v194_v48  ;;  %v169_v50 = vadd.f32 %v191_v43, %v160_v49 }
 0x228   :  { %v195_v51 = vpack.c.bf16 %v169_v50, %v169_v50 }
 0x22a   :  { %180 = vst.msk [vmem:[%s299_s6 + $0x4] sm:$0xf] %vm178_vm2, %v195_v51 }

// kernel: forward.32
= control target key start
LH: loop header
LB: loop body
LE: loop exit
PB: predicated region body
PF: predicated region fallthrough
CT: control target
= control target key end

     0   :  { %vm19_vm0 = vcmask 523264   ;;  %v153_v0 = vmov 0.0   ;;  %vm154_vm1 = vmmov 0   ;;  %vm47_vm2 = vcmask 261120   ;;  %s197_s1 = inlined_call_operand.vmem [shape: bf16[32,64], index: 1, kind: input, shape index: {}]   ;;  %s198_s0 = inlined_call_operand.vmem [shape: bf16[16,32], index: 0, kind: input, shape index: {}]   ;;  %s199_s2 = inlined_call_operand.vmem [shape: f32[1,64], index: 2, kind: input, shape index: {}]   ;;  %s200_s3 = inlined_call_operand.vmem [shape: bf16[16,64], index: 3, kind: output, shape index: {}]  }
   0x1   :  { %140 = vmatprep.subr.bf16.mxu0 %v153_v0  ;;  %v150_v1 = vld [vmem:[%s197_s1] sm:$0xff]   ;;  %144 = vmatprep.mubr.msk.bf16.mxu0 %vm154_vm1, %v153_v0  ;;  %20 = vst.msk [vmem:[#allocation2] sm:$0xff] %vm19_vm0, %v153_v0  ;;  %21 = vst.msk [vmem:[#allocation2 + $0x8] sm:$0xff] %vm19_vm0, %v153_v0  ;;  %v151_v2 = vld [vmem:[%s197_s1 + $0x8] sm:$0xff]   ;;  %vm121_vm3 = vcmask 519168  }
   0x2   :  { %141 = vmatpush3.bf16.msra.mxu0 %v150_v1  ;;  %v152_v3 = vld [vmem:[%s198_s0] sm:$0xff]  }
   0x3   :  { %142 = vmatprep.subr.bf16.mxu0 %v153_v0  ;;  %v132_v12 = vld [vmem:[%s199_s2] ss:$0 sm:$0xff] }
   0x6   :  { %143 = vmatpush3.bf16.msra.mxu0 %v151_v2 }
   0x8   :  { %v22_v4 = vld [vmem:[#allocation2] sm:$0xff]  ;;  %v23_v6 = vld [vmem:[#allocation2 + $0x8] sm:$0xff] }
   0x9   :  { %145 = vmatmul.mubr.msk.bf16.vlgmr.msra.gmra.mrb[0].mxu0 %vm47_vm2, %v152_v3 }
  0xdc   :  { %v85_v5 = vpop.f32.mrb[0].mxu0 }
  0xdd   :  { %v92_v7 = vadd.f32 %v85_v5, %v22_v4  ;;  %v146_v8 = vpop.f32.mrb[1].mxu0 }
  0xde   :  { %v88_v9 = vpop.f32.mrb[2].mxu0 }
  0xdf   :  { %95 = vst.msk [vmem:[#allocation2] sm:$0xff] %vm19_vm0, %v92_v7  ;;  %v93_v10 = vadd.f32 %v88_v9, %v23_v6  ;;  %v147_v11 = vpop.f32.mrb[3].mxu0 }
  0xe1   :  { %96 = vst.msk [vmem:[#allocation2 + $0x8] sm:$0xff] %vm19_vm0, %v93_v10 }
  0xe6   :  { %v100_v13 = vld [vmem:[#allocation2] sm:$0xff] }
  0xe7   :  { %v109_v14 = vadd.f32 %v132_v12, %v100_v13 }
  0xe8   :  { %v101_v15 = vld [vmem:[#allocation2 + $0x8] sm:$0xff] }
  0xe9   :  { %v111_v16 = vmax.f32 %v109_v14, 0.0  ;;  %v110_v17 = vadd.f32 %v132_v12, %v101_v15 }
  0xeb   :  { %v135_v18 = vpack.c.bf16 %v111_v16, %v111_v16  ;;  %v112_v19 = vmax.f32 %v110_v17, 0.0 }
  0xed   :  { %122 = vst.msk [vmem:[%s200_s3] sm:$0xf] %vm121_vm3, %v135_v18  ;;  %v136_v20 = vpack.c.bf16 %v112_v19, %v112_v19 }
  0xef   :  { %123 = vst.msk [vmem:[%s200_s3 + $0x4] sm:$0xf] %vm121_vm3, %v136_v20 }

// kernel: forward.30
= control target key start
LH: loop header
LB: loop body
LE: loop exit
PB: predicated region body
PF: predicated region fallthrough
CT: control target
= control target key end

     0   :  { %s874_s9 = smov 0   ;;  %s975_s0 = inlined_call_operand.vmem [shape: bf16[2,8,96], index: 0, kind: input, shape index: {}]   ;;  %s976_s1 = inlined_call_operand.vmem [shape: f32[2,1,8], index: 1, kind: input, shape index: {}]   ;;  %s977_s2 = inlined_call_operand.vmem [shape: bf16[2,8,32], index: 2, kind: output, shape index: {}]  }
   0x1 LB: > { %s705_s10 = sadd.s32 4294967295, %s841_s9   ;;  %p709_p0 = scmp.ge.s32.totalorder %s841_s9, 1  ;;  %s841_s9 = sphi %s874_s9, %s12_s9  }
   0x2   : > { %p119_p1 = scmp.lt.s32.totalorder %s841_s9, 3 }
   0x4   : > { %p120_p2 = pnand %p709_p0, %p119_p1 }
   0x5   : > { %p142_p3 = scmp.lt.s32.totalorder (!%p120_p2), %s705_s10, 1  ;;  %v843_v0 = vmov (!%p120_p2), 0.0   ;;  %vm844_vm0 = vmmov (!%p120_p2), 0   ;;  %s845_s15 = smov (!%p120_p2), 96   ;;  %vm161_vm1 = vcmask (!%p120_p2), 64512   ;;  %vm233_vm2 = vcmask (!%p120_p2), 1043456  }
   0x6   : > { %123 = sbr.rel (%p120_p2) target bundleno = 1605 (0x645), region = 28  ;;  %746 = vmatprep.subr.bf16.mxu0 (!%p120_p2), %v843_v0  ;;  %748 = vmatprep.mubr.msk.bf16.mxu0 (!%p120_p2), %vm844_vm0, %v843_v0  ;;  %s846_s16 = smov (!%p120_p2), 64   ;;  %vm278_vm3 = vcmask (!%p120_p2), 60416   ;;  %vm399_vm4 = vcmask (!%p120_p2), 126016   ;;  %vm520_vm5 = vcmask (!%p120_p2), 191616   ;;  %vm641_vm6 = vcmask (!%p120_p2), 257216  }
   0x7   : > { %752 = vmatprep.subr.bf16.mxu1 (!%p120_p2), %v843_v0  ;;  %754 = vmatprep.mubr.msk.bf16.mxu1 (!%p120_p2), %vm844_vm0, %v843_v0  ;;  %s847_s17 = smov (!%p120_p2), 88   ;;  %s848_s21 = smov (!%p120_p2), 72  }
   0x8   : > { %s849_s22 = smov (!%p120_p2), 120   ;;  %s850_s23 = smov (!%p120_p2), 80  }
   0x9   : > { %s851_s24 = smov (!%p120_p2), 112   ;;  %s852_s25 = smov (!%p120_p2), 104  }
   0xa   : > { %s853_s29 = smov (!%p120_p2), 56   ;;  %s854_s30 = smov (!%p120_p2), 48  }
   0xb   : > { %s855_s3 = smov (!%p120_p2), 40   ;;  %s856_s4 = smov (!%p120_p2), 8  }
   0xc   : > { %s857_s5 = smov (!%p120_p2), 16   ;;  %s858_s6 = smov (!%p120_p2), 24  }
   0xd   : > { %s979_s10 = smov (!%p142_p3, %s705_s10), 1 }
   0xe   : > { %s710_s11 = sshll.u32 %s979_s10, 2  ;;  %s148_s20 = scalar_lea.vmem %s976_s1, %s979_s10 }
   0xf   : > { %s145_s14 = scalar_lea.vmem %s975_s0, %s710_s11  ;;  %v910_v6 = vld [vmem:[%s148_s20] ss:$0 sm:$0xff]  ;;  %s942_s28 = scalar_lea.vmem %s977_s2, %s710_s11 }
  0x10   : > { %v154_v1 = vld [vmem:[%s145_s14] sm:$0xf] }
  0x11   : > { %v896_v2 = vcombine.low %v154_v1, %v154_v1 }
  0x13   : > { %159 = vrot.lane.b32.xlu0 %v896_v2, %s845_s15  ;;  %228 = vrot.lane.b32.xlu1 %v896_v2, %s846_s16 }
  0x17   : > { %282 = vrot.lane.b32.xlu1 %v896_v2, %s847_s17 }
  0x85   : > { %v160_v3 = vpop.permute.xlu0 %159  ;;  %v229_v13 = vpop.permute.xlu1 %228 }
  0x86   : > { %v166_v4 = vsel %vm161_vm1, %v160_v3, 0  ;;  %v235_v14 = vsel %vm233_vm2, %v229_v13, 0 }
  0x87   : > { %747 = vmatpush3.bf16.xpose.msra.mxu0 %v166_v4  ;;  %753 = vmatpush3.bf16.msra.mxu1 %v235_v14 }
  0x88   : > { %764 = vmatprep.subr.bf16.mxu0 %v843_v0  ;;  %758 = vmatprep.subr.bf16.mxu1 %v843_v0 }
  0x89   : > { %v283_v20 = vpop.permute.xlu1 %282 }
  0x8a   : > { %v288_v26 = vsel %vm161_vm1, %v283_v20, 0 }
  0x8e   : > { %749 = vmatmul.mubr.msk.bf16.vlgmr.msra.gmra.mrb[0].mxu0 %vm161_vm1, %v154_v1 }
  0x8f   : > { %766 = vmatprep.mubr.msk.bf16.mxu0 %vm844_vm0, %v843_v0 }
 0x161   : > { %v202_v5 = vpop.f32.mrb[0].mxu0 }
 0x162   : > { %v208_v7 = vmul.f32 0.35355338, %v202_v5  ;;  %v750_v8 = vpop.f32.mrb[1].mxu0 }
 0x163   : > { %v205_v9 = vpop.f32.mrb[2].mxu0 }
 0x164   : > { %v751_v10 = vpop.f32.mrb[3].mxu0  ;;  %v215_v11 = vadd.f32 %v910_v6, %v208_v7 }
 0x166   : > { %v216_v12 = vsel %vm161_vm1, %v215_v11, -inf }
 0x167   : > { %217 = vmax.xlane.f32.xlu0 %v216_v12 }
 0x17d   : > { %524 = vrot.lane.b32.xlu0 %v896_v2, %s848_s21 }
 0x1f4   : > { %v218_v15 = vpop.xlane.xlu0 %217 }
 0x1f5   : > { %v219_v16 = vsub.f32 %v215_v11, %v218_v15 }
 0x1f7   : > { %v220_v17 = vmul.f32 1.442695, %v219_v16 }
 0x1f8   : > { %v525_v29 = vpop.permute.xlu0 %524 }
 0x1f9   : > { %819 = vpow2.f32 %v220_v17  ;;  %v530_v31 = vsel %vm161_vm1, %v525_v29, 0 }
 0x203   : > { %v820_v18 = vpop.eup %819 }
 0x204   : > { %v222_v19 = vsel %vm161_vm1, %v820_v18, 0.0 }
 0x205   : > { %223 = vadd.xlane.f32.xlu1 %v222_v19 }
 0x216   : > { %280 = vrot.lane.b32.xlu1 %v896_v2, %s849_s22 }
 0x21a   : > { %403 = vrot.lane.b32.xlu1 %v896_v2, %s850_s23 }
 0x21e   : > { %401 = vrot.lane.b32.xlu1 %v896_v2, %s851_s24 }
 0x222   : > { %522 = vrot.lane.b32.xlu1 %v896_v2, %s852_s25 }
 0x292   : > { %v224_v21 = vpop.xlane.xlu1 %223 }
 0x293   : > { %821 = vrcp.f32 %v224_v21 }
 0x296   : > { %v281_v24 = vpop.permute.xlu1 %280 }
 0x29a   : > { %v404_v27 = vpop.permute.xlu1 %403 }
 0x29b   : > { %v409_v28 = vsel %vm161_vm1, %v404_v27, 0 }
 0x29d   : > { %v822_v22 = vpop.eup %821 }
 0x29e   : > { %v226_v23 = vmul.f32 %v822_v22, %v820_v18  ;;  %v402_v30 = vpop.permute.xlu1 %401 }
 0x2a0   : > { %v227_v25 = vpack.c.bf16 %v226_v23, %v226_v23 }
 0x2a2   : > { %755 = vmatmul.mubr.msk.bf16.vlgmr.msra.gmra.mrb[0].mxu1 %vm161_vm1, %v227_v25  ;;  %v523_v32 = vpop.permute.xlu1 %522 }
 0x2a3   : > { %759 = vmatpush3.bf16.xpose.msra.mxu1 %v288_v26  ;;  %760 = vmatprep.mubr.msk.bf16.mxu1 %vm844_vm0, %v843_v0 }
 0x2a4   : > { %770 = vmatprep.subr.bf16.mxu1 %v843_v0 }
 0x2aa   : > { %761 = vmatmul.mubr.msk.bf16.vlgmr.msra.gmra.mrb[4].mxu1 %vm161_vm1, %v281_v24 }
 0x2ab   : > { %771 = vmatpush3.bf16.xpose.msra.mxu1 %v409_v28  ;;  %772 = vmatprep.mubr.msk.bf16.mxu1 %vm844_vm0, %v843_v0 }
 0x2ac   : > { %782 = vmatprep.subr.bf16.mxu1 %v843_v0 }
 0x2b2   : > { %773 = vmatmul.mubr.msk.bf16.vlgmr.msra.gmra.mrb[8].mxu1 %vm161_vm1, %v402_v30 }
 0x2b3   : > { %783 = vmatpush3.bf16.xpose.msra.mxu1 %v530_v31  ;;  %784 = vmatprep.mubr.msk.bf16.mxu1 %vm844_vm0, %v843_v0 }
 0x2ba   : > { %785 = vmatmul.mubr.msk.bf16.vlgmr.msra.gmra.mrb[12].mxu1 %vm161_vm1, %v523_v32 }
 0x375   : > { %v271_v33 = vpop.f32.mrb[0].mxu1 }
 0x376   : > { %v277_v34 = vpack.c.bf16 %v271_v33, %v271_v33  ;;  %v756_v35 = vpop.f32.mrb[1].mxu1 }
 0x377   : > { %v274_v36 = vpop.f32.mrb[2].mxu1 }
 0x378   : > { %279 = vst.msk [vmem:[%s942_s28] sm:$0xf] %vm278_vm3, %v277_v34  ;;  %v757_v37 = vpop.f32.mrb[3].mxu1 }
 0x37d   : > { %v324_v38 = vpop.f32.mrb[4].mxu1 }
 0x37e   : > { %v330_v39 = vmul.f32 0.35355338, %v324_v38  ;;  %v762_v40 = vpop.f32.mrb[5].mxu1 }
 0x37f   : > { %v327_v41 = vpop.f32.mrb[6].mxu1 }
 0x380   : > { %v763_v42 = vpop.f32.mrb[7].mxu1  ;;  %v331_v43 = vadd.f32 %v910_v6, %v330_v39 }
 0x382   : > { %v332_v44 = vsel %vm161_vm1, %v331_v43, -inf }
 0x383   : > { %333 = vmax.xlane.f32.xlu1 %v332_v44 }
 0x385   : > { %v445_v45 = vpop.f32.mrb[8].mxu1 }
 0x386   : > { %v451_v46 = vmul.f32 0.35355338, %v445_v45  ;;  %v774_v47 = vpop.f32.mrb[9].mxu1 }
 0x387   : > { %v448_v48 = vpop.f32.mrb[10].mxu1 }
 0x388   : > { %v452_v49 = vadd.f32 %v910_v6, %v451_v46  ;;  %v775_v50 = vpop.f32.mrb[11].mxu1 }
 0x38a   : > { %v453_v51 = vsel %vm161_vm1, %v452_v49, -inf }
 0x38b   : > { %454 = vmax.xlane.f32.xlu0 %v453_v51 }
 0x38d   : > { %v566_v52 = vpop.f32.mrb[12].mxu1 }
 0x38e   : > { %v572_v53 = vmul.f32 0.35355338, %v566_v52  ;;  %v786_v54 = vpop.f32.mrb[13].mxu1 }
 0x38f   : > { %v569_v55 = vpop.f32.mrb[14].mxu1 }
 0x390   : > { %v573_v56 = vadd.f32 %v910_v6, %v572_v53  ;;  %v787_v57 = vpop.f32.mrb[15].mxu1 }
 0x392   : > { %v574_v58 = vsel %vm161_vm1, %v573_v56, -inf }
 0x393   : > { %575 = vmax.xlane.f32.xlu1 %v574_v58 }
 0x410   : > { %v334_v59 = vpop.xlane.xlu1 %333 }
 0x411   : > { %v335_v60 = vsub.f32 %v331_v43, %v334_v59 }
 0x413   : > { %v336_v61 = vmul.f32 1.442695, %v335_v60 }
 0x415   : > { %823 = vpow2.f32 %v336_v61 }
 0x418   : > { %v455_v6 = vpop.xlane.xlu0 %454 }
 0x419   : > { %v456_v8 = vsub.f32 %v452_v49, %v455_v6 }
 0x41b   : > { %v457_v9 = vmul.f32 1.442695, %v456_v8 }
 0x41f   : > { %v824_v62 = vpop.eup %823 }
 0x420   : > { %v576_v63 = vpop.xlane.xlu1 %575  ;;  %v338_v1 = vsel %vm161_vm1, %v824_v62, 0.0 }
 0x421   : > { %v577_v3 = vsub.f32 %v573_v56, %v576_v63  ;;  %339 = vadd.xlane.f32.xlu1 %v338_v1 }
 0x423   : > { %v578_v4 = vmul.f32 1.442695, %v577_v3 }
 0x425   : > { %825 = vpow2.f32 %v578_v4 }
 0x426   : > { %827 = vpow2.f32 %v457_v9 }
 0x42f   : > { %v826_v5 = vpop.eup %825 }
 0x430   : > { %v580_v7 = vsel %vm161_vm1, %v826_v5, 0.0  ;;  %v828_v10 = vpop.eup %827 }
 0x431   : > { %581 = vadd.xlane.f32.xlu0 %v580_v7  ;;  %v459_v11 = vsel %vm161_vm1, %v828_v10, 0.0 }
 0x432   : > { %344 = vrot.lane.b32.xlu1 %v896_v2, %s853_s29 }
 0x447   : > { %465 = vrot.lane.b32.xlu0 %v896_v2, %s854_s30 }
 0x456   : > { %460 = vadd.xlane.f32.xlu1 %v459_v11 }
 0x467   : > { %586 = vrot.lane.b32.xlu1 %v896_v2, %s855_s3 }
 0x4ae   : > { %v340_v12 = vpop.xlane.xlu1 %339 }
 0x4af   : > { %829 = vrcp.f32 %v340_v12 }
 0x4b2   : > { %v345_v13 = vpop.permute.xlu1 %344 }
 0x4b3   : > { %v350_v14 = vsel %vm233_vm2, %v345_v13, 0 }
 0x4b4   : > { %765 = vmatpush3.bf16.msra.mxu0 %v350_v14 }
 0x4b5   : > { %776 = vmatprep.subr.bf16.mxu0 %v843_v0 }
 0x4b9   : > { %v830_v15 = vpop.eup %829 }
 0x4ba   : > { %v342_v16 = vmul.f32 %v830_v15, %v824_v62 }
 0x4bc   : > { %v343_v17 = vpack.c.bf16 %v342_v16, %v342_v16 }
 0x4be   : > { %767 = vmatmul.mubr.msk.bf16.vlgmr.msra.gmra.mrb[4].mxu0 %vm161_vm1, %v343_v17  ;;  %v582_v18 = vpop.xlane.xlu0 %581 }
 0x4bf   : > { %778 = vmatprep.mubr.msk.bf16.mxu0 %vm844_vm0, %v843_v0 }
 0x4c2   : > { %v466_v19 = vpop.permute.xlu0 %465 }
 0x4c3   : > { %v471_v2 = vsel %vm233_vm2, %v466_v19, 0 }
 0x4c4   : > { %777 = vmatpush3.bf16.msra.mxu0 %v471_v2 }
 0x4c5   : > { %788 = vmatprep.subr.bf16.mxu0 %v843_v0 }
 0x4e3   : > { %v461_v20 = vpop.xlane.xlu1 %460 }
 0x4e4   : > { %831 = vrcp.f32 %v461_v20 }
 0x4e5   : > { %833 = vrcp.f32 %v582_v18 }
 0x4e7   : > { %v587_v22 = vpop.permute.xlu1 %586 }
 0x4e8   : > { %v592_v24 = vsel %vm233_vm2, %v587_v22, 0 }
 0x4ee   : > { %v832_v21 = vpop.eup %831 }
 0x4ef   : > { %v463_v23 = vmul.f32 %v832_v21, %v828_v10  ;;  %v834_v26 = vpop.eup %833 }
 0x4f0   : > { %v584_v27 = vmul.f32 %v834_v26, %v826_v5 }
 0x4f1   : > { %v464_v25 = vpack.c.bf16 %v463_v23, %v463_v23 }
 0x4f2   : > { %v585_v28 = vpack.c.bf16 %v584_v27, %v584_v27 }
 0x4f3   : > { %779 = vmatmul.mubr.msk.bf16.vlgmr.msra.gmra.mrb[8].mxu0 %vm161_vm1, %v464_v25 }
 0x4f4   : > { %789 = vmatpush3.bf16.msra.mxu0 %v592_v24  ;;  %790 = vmatprep.mubr.msk.bf16.mxu0 %vm844_vm0, %v843_v0 }
 0x4fb   : > { %791 = vmatmul.mubr.msk.bf16.vlgmr.msra.gmra.mrb[12].mxu0 %vm161_vm1, %v585_v28 }
 0x591   : > { %v386_v29 = vpop.f32.mrb[4].mxu0 }
 0x592   : > { %v727_v30 = vpack.c.bf16 %v386_v29, %v386_v29  ;;  %v768_v31 = vpop.f32.mrb[5].mxu0 }
 0x593   : > { %v389_v32 = vpop.f32.mrb[6].mxu0 }
 0x594   : > { %396 = vrot.lane.b32.xlu1 %v727_v30, %s856_s4  ;;  %v769_v33 = vpop.f32.mrb[7].mxu0 }
 0x5c6   : > { %v507_v34 = vpop.f32.mrb[8].mxu0 }
 0x5c7   : > { %v728_v35 = vpack.c.bf16 %v507_v34, %v507_v34  ;;  %v780_v36 = vpop.f32.mrb[9].mxu0 }
 0x5c8   : > { %v510_v37 = vpop.f32.mrb[10].mxu0 }
 0x5c9   : > { %517 = vrot.lane.b32.xlu0 %v728_v35, %s857_s5  ;;  %v781_v0 = vpop.f32.mrb[11].mxu0 }
 0x5ce   : > { %v628_v38 = vpop.f32.mrb[12].mxu0 }
 0x5cf   : > { %v729_v39 = vpack.c.bf16 %v628_v38, %v628_v38  ;;  %v792_v40 = vpop.f32.mrb[13].mxu0 }
 0x5d0   : > { %v631_v41 = vpop.f32.mrb[14].mxu0 }
 0x5d1   : > { %638 = vrot.lane.b32.xlu1 %v729_v39, %s858_s6  ;;  %v793_v42 = vpop.f32.mrb[15].mxu0 }
 0x606   : > { %v397_v43 = vpop.permute.xlu1 %396 }
 0x607   : > { %400 = vst.msk [vmem:[%s942_s28] sm:$0xf] %vm399_vm4, %v397_v43 }
 0x63b   : > { %v518_v44 = vpop.permute.xlu0 %517 }
 0x63c   : > { %521 = vst.msk [vmem:[%s942_s28] sm:$0xf] %vm520_vm5, %v518_v44 }
 0x643   : > { %v639_v45 = vpop.permute.xlu1 %638 }
 0x644   : > { %642 = vst.msk [vmem:[%s942_s28] sm:$0xf] %vm641_vm6, %v639_v45 }
 0x645 PF: > { %s12_s9 = sadd.s32 1, %s841_s9  }
 0x646   : > { %p9_p4 = scmp.ge.s32.totalorder %s12_s9, 4  }
 0x648   :  { %11 = sbr.rel (!%p9_p4) target bundleno = 1 (0x1), region = 61 }

// kernel: forward.43
= control target key start
LH: loop header
LB: loop body
LE: loop exit
PB: predicated region body
PF: predicated region fallthrough
CT: control target
= control target key end

     0   :  { %vm19_vm0 = vcmask 523264   ;;  %v151_v0 = vmov 0.0   ;;  %vm152_vm1 = vmmov 0   ;;  %vm47_vm2 = vcmask 261120   ;;  %s195_s1 = inlined_call_operand.vmem [shape: bf16[32,64], index: 1, kind: input, shape index: {}]   ;;  %s196_s0 = inlined_call_operand.vmem [shape: bf16[16,32], index: 0, kind: input, shape index: {}]   ;;  %s197_s2 = inlined_call_operand.vmem [shape: f32[1,64], index: 2, kind: input, shape index: {}]   ;;  %s198_s3 = inlined_call_operand.vmem [shape: bf16[16,64], index: 3, kind: output, shape index: {}]  }
   0x1   :  { %138 = vmatprep.subr.bf16.mxu0 %v151_v0  ;;  %v148_v1 = vld [vmem:[%s195_s1] sm:$0xff]   ;;  %142 = vmatprep.mubr.msk.bf16.mxu0 %vm152_vm1, %v151_v0  ;;  %20 = vst.msk [vmem:[#allocation2] sm:$0xff] %vm19_vm0, %v151_v0  ;;  %21 = vst.msk [vmem:[#allocation2 + $0x8] sm:$0xff] %vm19_vm0, %v151_v0  ;;  %v149_v2 = vld [vmem:[%s195_s1 + $0x8] sm:$0xff]   ;;  %vm119_vm3 = vcmask 519168  }
   0x2   :  { %139 = vmatpush3.bf16.msra.mxu0 %v148_v1  ;;  %v150_v3 = vld [vmem:[%s196_s0] sm:$0xff]  }
   0x3   :  { %140 = vmatprep.subr.bf16.mxu0 %v151_v0  ;;  %v130_v12 = vld [vmem:[%s197_s2] ss:$0 sm:$0xff] }
   0x6   :  { %141 = vmatpush3.bf16.msra.mxu0 %v149_v2 }
   0x8   :  { %v22_v4 = vld [vmem:[#allocation2] sm:$0xff]  ;;  %v23_v6 = vld [vmem:[#allocation2 + $0x8] sm:$0xff] }
   0x9   :  { %143 = vmatmul.mubr.msk.bf16.vlgmr.msra.gmra.mrb[0].mxu0 %vm47_vm2, %v150_v3 }
  0xdc   :  { %v85_v5 = vpop.f32.mrb[0].mxu0 }
  0xdd   :  { %v92_v7 = vadd.f32 %v85_v5, %v22_v4  ;;  %v144_v8 = vpop.f32.mrb[1].mxu0 }
  0xde   :  { %v88_v9 = vpop.f32.mrb[2].mxu0 }
  0xdf   :  { %95 = vst.msk [vmem:[#allocation2] sm:$0xff] %vm19_vm0, %v92_v7  ;;  %v93_v10 = vadd.f32 %v88_v9, %v23_v6  ;;  %v145_v11 = vpop.f32.mrb[3].mxu0 }
  0xe1   :  { %96 = vst.msk [vmem:[#allocation2 + $0x8] sm:$0xff] %vm19_vm0, %v93_v10 }
  0xe6   :  { %v100_v13 = vld [vmem:[#allocation2] sm:$0xff] }
  0xe7   :  { %v109_v14 = vadd.f32 %v130_v12, %v100_v13 }
  0xe8   :  { %v101_v15 = vld [vmem:[#allocation2 + $0x8] sm:$0xff] }
  0xe9   :  { %v133_v16 = vpack.c.bf16 %v109_v14, %v109_v14  ;;  %v110_v17 = vadd.f32 %v130_v12, %v101_v15 }
  0xeb   :  { %120 = vst.msk [vmem:[%s198_s3] sm:$0xf] %vm119_vm3, %v133_v16  ;;  %v134_v18 = vpack.c.bf16 %v110_v17, %v110_v17 }
  0xed   :  { %121 = vst.msk [vmem:[%s198_s3 + $0x4] sm:$0xf] %vm119_vm3, %v134_v18 }

// kernel: forward.33
= control target key start
LH: loop header
LB: loop body
LE: loop exit
PB: predicated region body
PF: predicated region fallthrough
CT: control target
= control target key end

     0   :  { %vm28_vm0 = vcmask 261120   ;;  %v247_v0 = vmov 0.0   ;;  %vm248_vm1 = vmmov 0   ;;  %vm72_vm2 = vcmask 523264   ;;  %s325_s1 = inlined_call_operand.vmem [shape: bf16[64,32], index: 1, kind: input, shape index: {}]   ;;  %s326_s0 = inlined_call_operand.vmem [shape: bf16[16,64], index: 0, kind: input, shape index: {}]   ;;  %s327_s3 = inlined_call_operand.vmem [shape: bf16[16,32], index: 3, kind: input, shape index: {}]   ;;  %s328_s2 = inlined_call_operand.vmem [shape: f32[1,32], index: 2, kind: input, shape index: {}]   ;;  %s329_s4 = inlined_call_operand.vmem [shape: f32[1,32], index: 4, kind: input, shape index: {}]   ;;  %s330_s5 = inlined_call_operand.vmem [shape: f32[1,32], index: 5, kind: input, shape index: {}]   ;;  %s331_s6 = inlined_call_operand.vmem [shape: bf16[16,32], index: 6, kind: output, shape index: {}]  }
   0x1   :  { %224 = vmatprep.subr.bf16.mxu0 %v247_v0  ;;  %v238_v1 = vld [vmem:[%s325_s1] sm:$0xff]   ;;  %232 = vmatprep.mubr.msk.bf16.mxu0 %vm248_vm1, %v247_v0  ;;  %29 = vst.msk [vmem:[#allocation2] sm:$0xff] %vm28_vm0, %v247_v0  ;;  %30 = vst.msk [vmem:[#allocation2 + $0x8] sm:$0xff] %vm28_vm0, %v247_v0  ;;  %v239_v2 = vld [vmem:[%s325_s1 + $0x8] sm:$0xff]   ;;  %vm195_vm3 = vcmask 257024  }
   0x2   :  { %225 = vmatpush3.bf16.msra.mxu0 %v238_v1  ;;  %v240_v3 = vld [vmem:[%s325_s1 + $0x10] sm:$0xff]   ;;  %v241_v4 = vld [vmem:[%s325_s1 + $0x18] sm:$0xff]   ;;  %v242_v5 = vld [vmem:[%s326_s0] sm:$0xff]  }
   0x3   :  { %226 = vmatprep.subr.bf16.mxu0 %v247_v0  ;;  %v216_v14 = vld [vmem:[%s327_s3] sm:$0xff]  }
   0x4   :  { %v208_v15 = vld [vmem:[%s328_s2] ss:$0 sm:$0xff]  ;;  %v217_v16 = vunpack.c.l.bf16 %v216_v14  ;;  %v218_v19 = vunpack.c.h.bf16 %v216_v14 }
   0x5   :  { %v209_v43 = vld [vmem:[%s329_s4] ss:$0 sm:$0xff] }
   0x6   :  { %227 = vmatpush3.bf16.msra.mxu0 %v239_v2  ;;  %v210_v45 = vld [vmem:[%s330_s5] ss:$0 sm:$0xff] }
   0x7   :  { %228 = vmatprep.subr.bf16.mxu0 %v247_v0 }
   0x8   :  { %v31_v6 = vld [vmem:[#allocation2] sm:$0xff]  ;;  %v32_v8 = vld [vmem:[#allocation2 + $0x8] sm:$0xff] }
   0xa   :  { %229 = vmatpush3.bf16.msra.mxu0 %v240_v3 }
   0xb   :  { %230 = vmatprep.subr.bf16.mxu0 %v247_v0 }
   0xe   :  { %231 = vmatpush3.bf16.msra.mxu0 %v241_v4 }
  0x11   :  { %233 = vmatmul.mubr.msk.bf16.vlgmr.msra.gmra.mrb[0].mxu0 %vm72_vm2, %v242_v5 }
  0xe4   :  { %v110_v7 = vpop.f32.mrb[0].mxu0 }
  0xe5   :  { %v117_v9 = vadd.f32 %v110_v7, %v31_v6  ;;  %v234_v10 = vpop.f32.mrb[1].mxu0 }
  0xe6   :  { %v113_v11 = vpop.f32.mrb[2].mxu0 }
  0xe7   :  { %120 = vst.msk [vmem:[#allocation2] sm:$0xff] %vm28_vm0, %v117_v9  ;;  %v118_v12 = vadd.f32 %v113_v11, %v32_v8  ;;  %v235_v13 = vpop.f32.mrb[3].mxu0 }
  0xe9   :  { %121 = vst.msk [vmem:[#allocation2 + $0x8] sm:$0xff] %vm28_vm0, %v118_v12 }
  0xee   :  { %v125_v17 = vld [vmem:[#allocation2] sm:$0xff] }
  0xef   :  { %v134_v18 = vadd.f32 %v208_v15, %v125_v17 }
  0xf0   :  { %v126_v20 = vld [vmem:[#allocation2 + $0x8] sm:$0xff] }
  0xf1   :  { %v140_v21 = vadd.f32 %v217_v16, %v134_v18  ;;  %v135_v22 = vadd.f32 %v208_v15, %v126_v20 }
  0xf3   :  { %v142_v23 = vsel %vm28_vm0, %v140_v21, 0.0  ;;  %v141_v24 = vadd.f32 %v218_v19, %v135_v22 }
  0xf4   :  { %143 = vadd.xlane.f32.xlu0 %v142_v23 }
  0xf5   :  { %v145_v25 = vsel %vm28_vm0, %v141_v24, 0.0 }
  0xf8   :  { %146 = vadd.xlane.f32.xlu0 %v145_v25 }
 0x181   :  { %v144_v26 = vpop.xlane.xlu0 %143 }
 0x182   :  { %v149_v27 = vmul.f32 0.03125, %v144_v26 }
 0x184   :  { %v151_v28 = vsub.f32 %v140_v21, %v149_v27 }
 0x185   :  { %v147_v29 = vpop.xlane.xlu0 %146 }
 0x186   :  { %v150_v30 = vmul.f32 0.03125, %v147_v29  ;;  %v153_v31 = vmul.f32 %v151_v28, %v151_v28 }
 0x188   :  { %v152_v32 = vsub.f32 %v141_v24, %v150_v30  ;;  %v155_v33 = vsel %vm28_vm0, %v153_v31, 0.0 }
 0x189   :  { %156 = vadd.xlane.f32.xlu1 %v155_v33 }
 0x18a   :  { %v154_v34 = vmul.f32 %v152_v32, %v152_v32 }
 0x18c   :  { %v158_v35 = vsel %vm28_vm0, %v154_v34, 0.0 }
 0x18d   :  { %159 = vadd.xlane.f32.xlu1 %v158_v35 }
 0x216   :  { %v157_v36 = vpop.xlane.xlu1 %156 }
 0x217   :  { %v161_v37 = vmul.f32 0.03125, %v157_v36 }
 0x219   :  { %v163_v38 = vadd.f32 1e-05, %v161_v37 }
 0x21a   :  { %v160_v39 = vpop.xlane.xlu1 %159 }
 0x21b   :  { %243 = vrsqrt.f32 %v163_v38  ;;  %v162_v40 = vmul.f32 0.03125, %v160_v39 }
 0x21d   :  { %v164_v41 = vadd.f32 1e-05, %v162_v40 }
 0x21f   :  { %245 = vrsqrt.f32 %v164_v41 }
 0x225   :  { %v244_v42 = vpop.eup %243 }
 0x226   :  { %v167_v44 = vmul.f32 %v244_v42, %v151_v28 }
 0x228   :  { %v176_v46 = vmul.f32 %v209_v43, %v167_v44 }
 0x229   :  { %v246_v47 = vpop.eup %245 }
 0x22a   :  { %v185_v48 = vadd.f32 %v210_v45, %v176_v46  ;;  %v168_v49 = vmul.f32 %v246_v47, %v152_v32 }
 0x22c   :  { %v213_v50 = vpack.c.bf16 %v185_v48, %v185_v48  ;;  %v177_v51 = vmul.f32 %v209_v43, %v168_v49 }
 0x22e   :  { %196 = vst.msk [vmem:[%s331_s6] sm:$0xf] %vm195_vm3, %v213_v50  ;;  %v186_v52 = vadd.f32 %v210_v45, %v177_v51 }
 0x230   :  { %v214_v53 = vpack.c.bf16 %v186_v52, %v186_v52 }
 0x232   :  { %197 = vst.msk [vmem:[%s331_s6 + $0x4] sm:$0xf] %vm195_vm3, %v214_v53 }

// kernel: forward.42
= control target key start
LH: loop header
LB: loop body
LE: loop exit
PB: predicated region body
PF: predicated region fallthrough
CT: control target
= control target key end

     0   :  { %vm19_vm0 = vcmask 261120   ;;  %v150_v0 = vmov 0.0   ;;  %vm151_vm1 = vmmov 0   ;;  %vm118_vm2 = vcmask 257024   ;;  %s195_s1 = inlined_call_operand.vmem [shape: bf16[32,32], index: 1, kind: input, shape index: {}]   ;;  %s196_s0 = inlined_call_operand.vmem [shape: bf16[16,32], index: 0, kind: input, shape index: {}]   ;;  %s197_s2 = inlined_call_operand.vmem [shape: f32[1,32], index: 2, kind: input, shape index: {}]   ;;  %s198_s3 = inlined_call_operand.vmem [shape: bf16[16,32], index: 3, kind: output, shape index: {}]  }
   0x1   :  { %137 = vmatprep.subr.bf16.mxu0 %v150_v0  ;;  %v147_v1 = vld [vmem:[%s195_s1] sm:$0xff]   ;;  %141 = vmatprep.mubr.msk.bf16.mxu0 %vm151_vm1, %v150_v0  ;;  %20 = vst.msk [vmem:[#allocation2] sm:$0xff] %vm19_vm0, %v150_v0  ;;  %21 = vst.msk [vmem:[#allocation2 + $0x8] sm:$0xff] %vm19_vm0, %v150_v0  ;;  %v148_v2 = vld [vmem:[%s195_s1 + $0x8] sm:$0xff]  }
   0x2   :  { %138 = vmatpush3.bf16.msra.mxu0 %v147_v1  ;;  %v149_v3 = vld [vmem:[%s196_s0] sm:$0xff]  }
   0x3   :  { %139 = vmatprep.subr.bf16.mxu0 %v150_v0  ;;  %v129_v12 = vld [vmem:[%s197_s2] ss:$0 sm:$0xff] }
   0x6   :  { %140 = vmatpush3.bf16.msra.mxu0 %v148_v2 }
   0x8   :  { %v22_v4 = vld [vmem:[#allocation2] sm:$0xff]  ;;  %v23_v6 = vld [vmem:[#allocation2 + $0x8] sm:$0xff] }
   0x9   :  { %142 = vmatmul.mubr.msk.bf16.vlgmr.msra.gmra.mrb[0].mxu0 %vm19_vm0, %v149_v3 }
  0xdc   :  { %v85_v5 = vpop.f32.mrb[0].mxu0 }
  0xdd   :  { %v92_v7 = vadd.f32 %v85_v5, %v22_v4  ;;  %v143_v8 = vpop.f32.mrb[1].mxu0 }
  0xde   :  { %v88_v9 = vpop.f32.mrb[2].mxu0 }
  0xdf   :  { %94 = vst.msk [vmem:[#allocation2] sm:$0xff] %vm19_vm0, %v92_v7  ;;  %v93_v10 = vadd.f32 %v88_v9, %v23_v6  ;;  %v144_v11 = vpop.f32.mrb[3].mxu0 }
  0xe1   :  { %95 = vst.msk [vmem:[#allocation2 + $0x8] sm:$0xff] %vm19_vm0, %v93_v10 }
  0xe6   :  { %v99_v13 = vld [vmem:[#allocation2] sm:$0xff] }
  0xe7   :  { %v108_v14 = vadd.f32 %v129_v12, %v99_v13 }
  0xe8   :  { %v100_v15 = vld [vmem:[#allocation2 + $0x8] sm:$0xff] }
  0xe9   :  { %v132_v16 = vpack.c.bf16 %v108_v14, %v108_v14  ;;  %v109_v17 = vadd.f32 %v129_v12, %v100_v15 }
  0xeb   :  { %119 = vst.msk [vmem:[%s198_s3] sm:$0xf] %vm118_vm2, %v132_v16  ;;  %v133_v18 = vpack.c.bf16 %v109_v17, %v109_v17 }
  0xed   :  { %120 = vst.msk [vmem:[%s198_s3 + $0x4] sm:$0xf] %vm118_vm2, %v133_v18 }

// kernel: forward.40
= control target key start
LH: loop header
LB: loop body
LE: loop exit
PB: predicated region body
PF: predicated region fallthrough
CT: control target
= control target key end

     0   :  { %s881_s9 = smov 0   ;;  %s983_s0 = inlined_call_operand.vmem [shape: bf16[2,8,96], index: 0, kind: input, shape index: {}]   ;;  %s984_s1 = inlined_call_operand.vmem [shape: f32[2,1,8], index: 1, kind: input, shape index: {}]   ;;  %s985_s2 = inlined_call_operand.vmem [shape: bf16[2,8,32], index: 2, kind: output, shape index: {}]  }
   0x1 LB: > { %s712_s10 = sadd.s32 4294967295, %s848_s9   ;;  %p716_p0 = scmp.ge.s32.totalorder %s848_s9, 1  ;;  %s848_s9 = sphi %s881_s9, %s12_s9  }
   0x2   : > { %p119_p1 = scmp.lt.s32.totalorder %s848_s9, 3 }
   0x4   : > { %p120_p2 = pnand %p716_p0, %p119_p1 }
   0x5   : > { %p142_p3 = scmp.lt.s32.totalorder (!%p120_p2), %s712_s10, 1  ;;  %v850_v0 = vmov (!%p120_p2), 0.0   ;;  %vm851_vm0 = vmmov (!%p120_p2), 0   ;;  %s852_s15 = smov (!%p120_p2), 96   ;;  %vm174_vm1 = vcmask (!%p120_p2), 64512   ;;  %v156_v5 = vlaneseq (!%p120_p2) }
   0x6   : > { %123 = sbr.rel (%p120_p2) target bundleno = 1605 (0x645), region = 28  ;;  %753 = vmatprep.subr.bf16.mxu0 (!%p120_p2), %v850_v0  ;;  %755 = vmatprep.mubr.msk.bf16.mxu0 (!%p120_p2), %vm851_vm0, %v850_v0  ;;  %s853_s16 = smov (!%p120_p2), 64   ;;  %vm240_vm3 = vcmask (!%p120_p2), 1043456   ;;  %vm285_vm4 = vcmask (!%p120_p2), 60416   ;;  %vm406_vm5 = vcmask (!%p120_p2), 126016   ;;  %vm527_vm6 = vcmask (!%p120_p2), 191616  }
   0x7   : > { %759 = vmatprep.subr.bf16.mxu1 (!%p120_p2), %v850_v0  ;;  %761 = vmatprep.mubr.msk.bf16.mxu1 (!%p120_p2), %vm851_vm0, %v850_v0  ;;  %s854_s17 = smov (!%p120_p2), 88   ;;  %v157_v6 = vshrl.u32 (!%p120_p2), %v156_v5, 7  ;;  %v159_v7 = vand.u32 (!%p120_p2), 127, %v156_v5  ;;  %s855_s21 = smov (!%p120_p2), 72   ;;  %vm648_vm7 = vcmask (!%p120_p2), 257216  }
   0x8   : > { %s856_s22 = smov (!%p120_p2), 120   ;;  %s857_s23 = smov (!%p120_p2), 80  }
   0x9   : > { %vm160_vm2 = vcmp.gt.s32.totalorder (!%p120_p2), %v159_v7, %v157_v6  ;;  %s858_s24 = smov (!%p120_p2), 112   ;;  %s859_s25 = smov (!%p120_p2), 104  }
   0xa   : > { %v161_v9 = vsel (!%p120_p2), %vm160_vm2, -1e+30, %v850_v0  ;;  %s860_s29 = smov (!%p120_p2), 56   ;;  %s861_s30 = smov (!%p120_p2), 48  }
   0xb   : > { %s862_s3 = smov (!%p120_p2), 40   ;;  %s863_s4 = smov (!%p120_p2), 8  }
   0xc   : > { %s864_s5 = smov (!%p120_p2), 16   ;;  %s865_s6 = smov (!%p120_p2), 24  }
   0xd   : > { %s987_s10 = smov (!%p142_p3, %s712_s10), 1 }
   0xe   : > { %s717_s11 = sshll.u32 %s987_s10, 2  ;;  %s148_s20 = scalar_lea.vmem %s984_s1, %s987_s10 }
   0xf   : > { %s145_s14 = scalar_lea.vmem %s983_s0, %s717_s11  ;;  %v719_v8 = vld [vmem:[%s148_s20] ss:$0 sm:$0xff]  ;;  %s950_s28 = scalar_lea.vmem %s985_s2, %s717_s11 }
  0x10   : > { %v154_v1 = vld [vmem:[%s145_s14] sm:$0xf]  ;;  %v918_v10 = vadd.f32 %v719_v8, %v161_v9 }
  0x11   : > { %v903_v2 = vcombine.low %v154_v1, %v154_v1 }
  0x13   : > { %172 = vrot.lane.b32.xlu0 %v903_v2, %s852_s15  ;;  %235 = vrot.lane.b32.xlu1 %v903_v2, %s853_s16 }
  0x17   : > { %289 = vrot.lane.b32.xlu1 %v903_v2, %s854_s17 }
  0x85   : > { %v173_v3 = vpop.permute.xlu0 %172  ;;  %v236_v18 = vpop.permute.xlu1 %235 }
  0x86   : > { %v179_v4 = vsel %vm174_vm1, %v173_v3, 0  ;;  %v242_v19 = vsel %vm240_vm3, %v236_v18, 0 }
  0x87   : > { %754 = vmatpush3.bf16.xpose.msra.mxu0 %v179_v4  ;;  %760 = vmatpush3.bf16.msra.mxu1 %v242_v19 }
  0x88   : > { %771 = vmatprep.subr.bf16.mxu0 %v850_v0  ;;  %765 = vmatprep.subr.bf16.mxu1 %v850_v0 }
  0x89   : > { %v290_v25 = vpop.permute.xlu1 %289 }
  0x8a   : > { %v295_v31 = vsel %vm174_vm1, %v290_v25, 0 }
  0x8e   : > { %756 = vmatmul.mubr.msk.bf16.vlgmr.msra.gmra.mrb[0].mxu0 %vm174_vm1, %v154_v1 }
  0x8f   : > { %773 = vmatprep.mubr.msk.bf16.mxu0 %vm851_vm0, %v850_v0 }
 0x161   : > { %v215_v11 = vpop.f32.mrb[0].mxu0 }
 0x162   : > { %v221_v12 = vmul.f32 0.35355338, %v215_v11  ;;  %v757_v13 = vpop.f32.mrb[1].mxu0 }
 0x163   : > { %v218_v14 = vpop.f32.mrb[2].mxu0 }
 0x164   : > { %v758_v15 = vpop.f32.mrb[3].mxu0  ;;  %v222_v16 = vadd.f32 %v221_v12, %v918_v10 }
 0x166   : > { %v223_v17 = vsel %vm174_vm1, %v222_v16, -inf }
 0x167   : > { %224 = vmax.xlane.f32.xlu0 %v223_v17 }
 0x17d   : > { %531 = vrot.lane.b32.xlu0 %v903_v2, %s855_s21 }
 0x1f4   : > { %v225_v20 = vpop.xlane.xlu0 %224 }
 0x1f5   : > { %v226_v21 = vsub.f32 %v222_v16, %v225_v20 }
 0x1f7   : > { %v227_v22 = vmul.f32 1.442695, %v226_v21 }
 0x1f8   : > { %v532_v34 = vpop.permute.xlu0 %531 }
 0x1f9   : > { %826 = vpow2.f32 %v227_v22  ;;  %v537_v36 = vsel %vm174_vm1, %v532_v34, 0 }
 0x203   : > { %v827_v23 = vpop.eup %826 }
 0x204   : > { %v229_v24 = vsel %vm174_vm1, %v827_v23, 0.0 }
 0x205   : > { %230 = vadd.xlane.f32.xlu1 %v229_v24 }
 0x216   : > { %287 = vrot.lane.b32.xlu1 %v903_v2, %s856_s22 }
 0x21a   : > { %410 = vrot.lane.b32.xlu1 %v903_v2, %s857_s23 }
 0x21e   : > { %408 = vrot.lane.b32.xlu1 %v903_v2, %s858_s24 }
 0x222   : > { %529 = vrot.lane.b32.xlu1 %v903_v2, %s859_s25 }
 0x292   : > { %v231_v26 = vpop.xlane.xlu1 %230 }
 0x293   : > { %828 = vrcp.f32 %v231_v26 }
 0x296   : > { %v288_v29 = vpop.permute.xlu1 %287 }
 0x29a   : > { %v411_v32 = vpop.permute.xlu1 %410 }
 0x29b   : > { %v416_v33 = vsel %vm174_vm1, %v411_v32, 0 }
 0x29d   : > { %v829_v27 = vpop.eup %828 }
 0x29e   : > { %v233_v28 = vmul.f32 %v829_v27, %v827_v23  ;;  %v409_v35 = vpop.permute.xlu1 %408 }
 0x2a0   : > { %v234_v30 = vpack.c.bf16 %v233_v28, %v233_v28 }
 0x2a2   : > { %762 = vmatmul.mubr.msk.bf16.vlgmr.msra.gmra.mrb[0].mxu1 %vm174_vm1, %v234_v30  ;;  %v530_v37 = vpop.permute.xlu1 %529 }
 0x2a3   : > { %766 = vmatpush3.bf16.xpose.msra.mxu1 %v295_v31  ;;  %767 = vmatprep.mubr.msk.bf16.mxu1 %vm851_vm0, %v850_v0 }
 0x2a4   : > { %777 = vmatprep.subr.bf16.mxu1 %v850_v0 }
 0x2aa   : > { %768 = vmatmul.mubr.msk.bf16.vlgmr.msra.gmra.mrb[4].mxu1 %vm174_vm1, %v288_v29 }
 0x2ab   : > { %778 = vmatpush3.bf16.xpose.msra.mxu1 %v416_v33  ;;  %779 = vmatprep.mubr.msk.bf16.mxu1 %vm851_vm0, %v850_v0 }
 0x2ac   : > { %789 = vmatprep.subr.bf16.mxu1 %v850_v0 }
 0x2b2   : > { %780 = vmatmul.mubr.msk.bf16.vlgmr.msra.gmra.mrb[8].mxu1 %vm174_vm1, %v409_v35 }
 0x2b3   : > { %790 = vmatpush3.bf16.xpose.msra.mxu1 %v537_v36  ;;  %791 = vmatprep.mubr.msk.bf16.mxu1 %vm851_vm0, %v850_v0 }
 0x2ba   : > { %792 = vmatmul.mubr.msk.bf16.vlgmr.msra.gmra.mrb[12].mxu1 %vm174_vm1, %v530_v37 }
 0x375   : > { %v278_v38 = vpop.f32.mrb[0].mxu1 }
 0x376   : > { %v284_v39 = vpack.c.bf16 %v278_v38, %v278_v38  ;;  %v763_v40 = vpop.f32.mrb[1].mxu1 }
 0x377   : > { %v281_v41 = vpop.f32.mrb[2].mxu1 }
 0x378   : > { %286 = vst.msk [vmem:[%s950_s28] sm:$0xf] %vm285_vm4, %v284_v39  ;;  %v764_v42 = vpop.f32.mrb[3].mxu1 }
 0x37d   : > { %v331_v43 = vpop.f32.mrb[4].mxu1 }
 0x37e   : > { %v337_v44 = vmul.f32 0.35355338, %v331_v43  ;;  %v769_v45 = vpop.f32.mrb[5].mxu1 }
 0x37f   : > { %v334_v46 = vpop.f32.mrb[6].mxu1 }
 0x380   : > { %v770_v47 = vpop.f32.mrb[7].mxu1  ;;  %v338_v48 = vadd.f32 %v337_v44, %v918_v10 }
 0x382   : > { %v339_v49 = vsel %vm174_vm1, %v338_v48, -inf }
 0x383   : > { %340 = vmax.xlane.f32.xlu1 %v339_v49 }
 0x385   : > { %v452_v50 = vpop.f32.mrb[8].mxu1 }
 0x386   : > { %v458_v51 = vmul.f32 0.35355338, %v452_v50  ;;  %v781_v52 = vpop.f32.mrb[9].mxu1 }
 0x387   : > { %v455_v53 = vpop.f32.mrb[10].mxu1 }
 0x388   : > { %v459_v54 = vadd.f32 %v458_v51, %v918_v10  ;;  %v782_v55 = vpop.f32.mrb[11].mxu1 }
 0x38a   : > { %v460_v56 = vsel %vm174_vm1, %v459_v54, -inf }
 0x38b   : > { %461 = vmax.xlane.f32.xlu0 %v460_v56 }
 0x38d   : > { %v573_v57 = vpop.f32.mrb[12].mxu1 }
 0x38e   : > { %v579_v58 = vmul.f32 0.35355338, %v573_v57  ;;  %v793_v59 = vpop.f32.mrb[13].mxu1 }
 0x38f   : > { %v576_v60 = vpop.f32.mrb[14].mxu1 }
 0x390   : > { %v580_v61 = vadd.f32 %v579_v58, %v918_v10  ;;  %v794_v62 = vpop.f32.mrb[15].mxu1 }
 0x392   : > { %v581_v63 = vsel %vm174_vm1, %v580_v61, -inf }
 0x393   : > { %582 = vmax.xlane.f32.xlu1 %v581_v63 }
 0x410   : > { %v341_v1 = vpop.xlane.xlu1 %340 }
 0x411   : > { %v342_v3 = vsub.f32 %v338_v48, %v341_v1 }
 0x413   : > { %v343_v4 = vmul.f32 1.442695, %v342_v3 }
 0x415   : > { %830 = vpow2.f32 %v343_v4 }
 0x418   : > { %v462_v10 = vpop.xlane.xlu0 %461 }
 0x419   : > { %v463_v13 = vsub.f32 %v459_v54, %v462_v10 }
 0x41b   : > { %v464_v14 = vmul.f32 1.442695, %v463_v13 }
 0x41f   : > { %v831_v5 = vpop.eup %830 }
 0x420   : > { %v583_v6 = vpop.xlane.xlu1 %582  ;;  %v345_v7 = vsel %vm174_vm1, %v831_v5, 0.0 }
 0x421   : > { %v584_v8 = vsub.f32 %v580_v61, %v583_v6  ;;  %346 = vadd.xlane.f32.xlu1 %v345_v7 }
 0x423   : > { %v585_v9 = vmul.f32 1.442695, %v584_v8 }
 0x425   : > { %832 = vpow2.f32 %v585_v9 }
 0x426   : > { %834 = vpow2.f32 %v464_v14 }
 0x42f   : > { %v833_v11 = vpop.eup %832 }
 0x430   : > { %v587_v12 = vsel %vm174_vm1, %v833_v11, 0.0  ;;  %v835_v15 = vpop.eup %834 }
 0x431   : > { %588 = vadd.xlane.f32.xlu0 %v587_v12  ;;  %v466_v16 = vsel %vm174_vm1, %v835_v15, 0.0 }
 0x432   : > { %351 = vrot.lane.b32.xlu1 %v903_v2, %s860_s29 }
 0x447   : > { %472 = vrot.lane.b32.xlu0 %v903_v2, %s861_s30 }
 0x456   : > { %467 = vadd.xlane.f32.xlu1 %v466_v16 }
 0x467   : > { %593 = vrot.lane.b32.xlu1 %v903_v2, %s862_s3 }
 0x4ae   : > { %v347_v17 = vpop.xlane.xlu1 %346 }
 0x4af   : > { %836 = vrcp.f32 %v347_v17 }
 0x4b2   : > { %v352_v18 = vpop.permute.xlu1 %351 }
 0x4b3   : > { %v357_v19 = vsel %vm240_vm3, %v352_v18, 0 }
 0x4b4   : > { %772 = vmatpush3.bf16.msra.mxu0 %v357_v19 }
 0x4b5   : > { %783 = vmatprep.subr.bf16.mxu0 %v850_v0 }
 0x4b9   : > { %v837_v20 = vpop.eup %836 }
 0x4ba   : > { %v349_v21 = vmul.f32 %v837_v20, %v831_v5 }
 0x4bc   : > { %v350_v22 = vpack.c.bf16 %v349_v21, %v349_v21 }
 0x4be   : > { %774 = vmatmul.mubr.msk.bf16.vlgmr.msra.gmra.mrb[4].mxu0 %vm174_vm1, %v350_v22  ;;  %v589_v23 = vpop.xlane.xlu0 %588 }
 0x4bf   : > { %785 = vmatprep.mubr.msk.bf16.mxu0 %vm851_vm0, %v850_v0 }
 0x4c2   : > { %v473_v24 = vpop.permute.xlu0 %472 }
 0x4c3   : > { %v478_v2 = vsel %vm240_vm3, %v473_v24, 0 }
 0x4c4   : > { %784 = vmatpush3.bf16.msra.mxu0 %v478_v2 }
 0x4c5   : > { %795 = vmatprep.subr.bf16.mxu0 %v850_v0 }
 0x4e3   : > { %v468_v25 = vpop.xlane.xlu1 %467 }
 0x4e4   : > { %838 = vrcp.f32 %v468_v25 }
 0x4e5   : > { %840 = vrcp.f32 %v589_v23 }
 0x4e7   : > { %v594_v27 = vpop.permute.xlu1 %593 }
 0x4e8   : > { %v599_v29 = vsel %vm240_vm3, %v594_v27, 0 }
 0x4ee   : > { %v839_v26 = vpop.eup %838 }
 0x4ef   : > { %v470_v28 = vmul.f32 %v839_v26, %v835_v15  ;;  %v841_v31 = vpop.eup %840 }
 0x4f0   : > { %v591_v32 = vmul.f32 %v841_v31, %v833_v11 }
 0x4f1   : > { %v471_v30 = vpack.c.bf16 %v470_v28, %v470_v28 }
 0x4f2   : > { %v592_v33 = vpack.c.bf16 %v591_v32, %v591_v32 }
 0x4f3   : > { %786 = vmatmul.mubr.msk.bf16.vlgmr.msra.gmra.mrb[8].mxu0 %vm174_vm1, %v471_v30 }
 0x4f4   : > { %796 = vmatpush3.bf16.msra.mxu0 %v599_v29  ;;  %797 = vmatprep.mubr.msk.bf16.mxu0 %vm851_vm0, %v850_v0 }
 0x4fb   : > { %798 = vmatmul.mubr.msk.bf16.vlgmr.msra.gmra.mrb[12].mxu0 %vm174_vm1, %v592_v33 }
 0x591   : > { %v393_v34 = vpop.f32.mrb[4].mxu0 }
 0x592   : > { %v734_v35 = vpack.c.bf16 %v393_v34, %v393_v34  ;;  %v775_v36 = vpop.f32.mrb[5].mxu0 }
 0x593   : > { %v396_v37 = vpop.f32.mrb[6].mxu0 }
 0x594   : > { %403 = vrot.lane.b32.xlu1 %v734_v35, %s863_s4  ;;  %v776_v38 = vpop.f32.mrb[7].mxu0 }
 0x5c6   : > { %v514_v39 = vpop.f32.mrb[8].mxu0 }
 0x5c7   : > { %v735_v40 = vpack.c.bf16 %v514_v39, %v514_v39  ;;  %v787_v41 = vpop.f32.mrb[9].mxu0 }
 0x5c8   : > { %v517_v42 = vpop.f32.mrb[10].mxu0 }
 0x5c9   : > { %524 = vrot.lane.b32.xlu0 %v735_v40, %s864_s5  ;;  %v788_v0 = vpop.f32.mrb[11].mxu0 }
 0x5ce   : > { %v635_v43 = vpop.f32.mrb[12].mxu0 }
 0x5cf   : > { %v736_v44 = vpack.c.bf16 %v635_v43, %v635_v43  ;;  %v799_v45 = vpop.f32.mrb[13].mxu0 }
 0x5d0   : > { %v638_v46 = vpop.f32.mrb[14].mxu0 }
 0x5d1   : > { %645 = vrot.lane.b32.xlu1 %v736_v44, %s865_s6  ;;  %v800_v47 = vpop.f32.mrb[15].mxu0 }
 0x606   : > { %v404_v48 = vpop.permute.xlu1 %403 }
 0x607   : > { %407 = vst.msk [vmem:[%s950_s28] sm:$0xf] %vm406_vm5, %v404_v48 }
 0x63b   : > { %v525_v49 = vpop.permute.xlu0 %524 }
 0x63c   : > { %528 = vst.msk [vmem:[%s950_s28] sm:$0xf] %vm527_vm6, %v525_v49 }
 0x643   : > { %v646_v50 = vpop.permute.xlu1 %645 }
 0x644   : > { %649 = vst.msk [vmem:[%s950_s28] sm:$0xf] %vm648_vm7, %v646_v50 }
 0x645 PF: > { %s12_s9 = sadd.s32 1, %s848_s9  }
 0x646   : > { %p9_p4 = scmp.ge.s32.totalorder %s12_s9, 4  }
 0x648   :  { %11 = sbr.rel (!%p9_p4) target bundleno = 1 (0x1), region = 61 }

// kernel: forward.57
= control target key start
LH: loop header
LB: loop body
LE: loop exit
PB: predicated region body
PF: predicated region fallthrough
CT: control target
= control target key end

     0   :  { %v178_v1 = vmov 0.0   ;;  %vm179_vm0 = vmmov 0   ;;  %vm20_vm1 = vcmask 130048   ;;  %s233_s0 = inlined_call_operand.vmem [shape: bf16[16,32], index: 0, kind: input, shape index: {}]   ;;  %s234_s1 = inlined_call_operand.vmem [shape: bf16[32,16], index: 1, kind: input, shape index: {}]   ;;  %s235_s2 = inlined_call_operand.vmem [shape: f32[1,16], index: 2, kind: input, shape index: {}]   ;;  %s236_s3 = inlined_call_operand.hbm [shape: f32[16,16], index: 3, kind: output, shape index: {}]  }
   0x1   :  { %v151_v0 = vld [vmem:[%s234_s1] sm:$0xff]   ;;  %138 = vmatprep.subr.bf16.mxu0 %v178_v1  ;;  %v152_v2 = vld [vmem:[%s234_s1 + $0x8] sm:$0xff]   ;;  %142 = vmatprep.mubr.msk.bf16.mxu0 %vm179_vm0, %v178_v1 }
   0x2   :  { %139 = vmatpush3.bf16.msra.mxu0 %v151_v0 }
   0x3   :  { %140 = vmatprep.subr.bf16.mxu0 %v178_v1 }
   0x4   :  { %8 = vsyncpa [#allocation4], 0  ;;  %21 = vst.msk [vmem:[#allocation2] sm:$0xff] %vm20_vm1, %v178_v1  ;;  %v153_v3 = vld [vmem:[%s233_s0] sm:$0xff]   ;;  %vm48_vm2 = vcmask 261120   ;;  %s180_s0 = smov [#allocation3]  }
   0x5   :  { %22 = vst.msk [vmem:[#allocation2 + $0x8] sm:$0xff] %vm20_vm1, %v178_v1  ;;  %v134_v12 = vld [vmem:[%s235_s2] ss:$0 sm:$0xff]  ;;  %s119_s19 = sshll.u32 %s180_s0, 4  ;;  %s120_s19 = int_to_ptr.vmem [resolvable:$true] %s119_s19 }
   0x6   :  { %141 = vmatpush3.bf16.msra.mxu0 %v152_v2  ;;  %s154_s20 = scalar_lea.vmem %s120_s19, 256  ;;  %p159_p1 = scmp.lt.s32.totalorder %s120_s19, %s120_s19 }
   0x7   :  { %p155_p0 = scmp.ne.s32.totalorder %s120_s19, %s154_s20  ;;  %p160_p2 = scmp.lt.s32.totalorder %s154_s20, %s154_s20 }
   0x9   :  { %143 = vmatmul.mubr.msk.bf16.vlgmr.msra.gmra.mrb[0].mxu0 %vm48_vm2, %v153_v3  ;;  %p161_p3 = por %p160_p2, %p159_p1 }
   0xb   :  { %v23_v4 = vld [vmem:[#allocation2] sm:$0xff]  ;;  %p162_p4 = pnand %p161_p3, %p155_p0 }
   0xc   :  { %v24_v6 = vld [vmem:[#allocation2 + $0x8] sm:$0xff] }
  0xdc   :  { %v86_v5 = vpop.f32.mrb[0].mxu0 }
  0xdd   :  { %v93_v7 = vadd.f32 %v86_v5, %v23_v4  ;;  %v144_v8 = vpop.f32.mrb[1].mxu0 }
  0xde   :  { %v89_v9 = vpop.f32.mrb[2].mxu0 }
  0xdf   :  { %96 = vst.msk [vmem:[#allocation2] sm:$0xff] %vm20_vm1, %v93_v7  ;;  %v94_v10 = vadd.f32 %v89_v9, %v24_v6  ;;  %v145_v11 = vpop.f32.mrb[3].mxu0 }
  0xe1   :  { %97 = vst.msk [vmem:[#allocation2 + $0x8] sm:$0xff] %vm20_vm1, %v94_v10 }
  0xe6   :  { %v101_v13 = vld [vmem:[#allocation2] sm:$0xff] }
  0xe7   :  { %v110_v14 = vadd.f32 %v134_v12, %v101_v13 }
  0xe8   :  { %v102_v15 = vld [vmem:[#allocation2 + $0x8] sm:$0xff] }
  0xe9   :  { %v111_v16 = vadd.f32 %v134_v12, %v102_v15  ;;  %112 = vst.msk [vmem:[#allocation3] sm:$0xff] %vm20_vm1, %v110_v14 }
  0xeb   :  { %113 = vst.msk [vmem:[#allocation3 + $0x8] sm:$0xff] %vm20_vm1, %v111_v16 }
  0xec   :  { %165 = shalt.err (!%p162_p4)
}
  0xed   :  { %s166_s22 = scalar_lea.hbm %s236_s3, 256 }
  0xee   :  { %p167_p5 = scmp.ne.s32.totalorder %s236_s3, %s166_s22  ;;  %p170_p6 = scmp.lt.u32.totalorder %s166_s22, %s236_s3 }
  0xf0   :  { %p172_p7 = pnand %p170_p6, %p167_p5 }
  0xf2   :  { %175 = shalt.err (!%p172_p7)
}
  0xf3   :  { %s181_s27 = smov 128   ;;  %s182_s28 = smov 8  }
  0xf4   :  { %125 = dma.vmem_to_hbm [thread:$0]  %s120_s19, 256, %s236_s3, [#allocation4], %s181_s27, %s181_s27, %s182_s28  }
  0xf5   :  { %176 = dma.done.wait [#allocation4], 256  }
  0xf6   :  { %177 = vsyncadd [#allocation4], 4294967040 }
  0xf7   :  { %129 = vsyncpa [#allocation4], 1 }

// kernel: forward.44
= control target key start
LH: loop header
LB: loop body
LE: loop exit
PB: predicated region body
PF: predicated region fallthrough
CT: control target
= control target key end

     0   :  { %s932_s12 = smov 0   ;;  %s1029_s0 = inlined_call_operand.vmem [shape: bf16[2,8,32], index: 0, kind: input, shape index: {}]   ;;  %s1030_s1 = inlined_call_operand.vmem [shape: bf16[2,8,64], index: 1, kind: input, shape index: {}]   ;;  %s1031_s2 = inlined_call_operand.vmem [shape: f32[2,1,8], index: 2, kind: input, shape index: {}]   ;;  %s1032_s3 = inlined_call_operand.vmem [shape: bf16[2,8,32], index: 3, kind: output, shape index: {}]  }
   0x1 LB: > { %s763_s13 = sadd.s32 4294967295, %s898_s12   ;;  %p767_p0 = scmp.ge.s32.totalorder %s898_s12, 1  ;;  %s898_s12 = sphi %s932_s12, %s13_s12  }
   0x2   : > { %p153_p1 = scmp.lt.s32.totalorder %s898_s12, 3 }
   0x4   : > { %p154_p2 = pnand %p767_p0, %p153_p1 }
   0x5   : > { %p182_p3 = scmp.lt.s32.totalorder (!%p154_p2), %s763_s13, 1  ;;  %v900_v0 = vmov (!%p154_p2), 0.0   ;;  %vm901_vm0 = vmmov (!%p154_p2), 0   ;;  %vm201_vm1 = vcmask (!%p154_p2), 64512   ;;  %s902_s24 = smov (!%p154_p2), 96   ;;  %vm276_vm2 = vcmask (!%p154_p2), 1043456  }
   0x6   : > { %157 = sbr.rel (%p154_p2) target bundleno = 1444 (0x5a4), region = 32  ;;  %806 = vmatprep.subr.bf16.mxu0 (!%p154_p2), %v900_v0  ;;  %808 = vmatprep.mubr.msk.bf16.mxu0 (!%p154_p2), %vm901_vm0, %v900_v0  ;;  %s903_s25 = smov (!%p154_p2), 120   ;;  %vm321_vm3 = vcmask (!%p154_p2), 60416   ;;  %vm445_vm4 = vcmask (!%p154_p2), 126016   ;;  %vm566_vm5 = vcmask (!%p154_p2), 191616   ;;  %vm687_vm6 = vcmask (!%p154_p2), 257216  }
   0x7   : > { %812 = vmatprep.subr.bf16.mxu1 (!%p154_p2), %v900_v0  ;;  %814 = vmatprep.mubr.msk.bf16.mxu1 (!%p154_p2), %vm901_vm0, %v900_v0  ;;  %s904_s26 = smov (!%p154_p2), 112   ;;  %s905_s27 = smov (!%p154_p2), 104  }
   0x8   : > { %s906_s4 = smov (!%p154_p2), 88   ;;  %s907_s5 = smov (!%p154_p2), 72  }
   0x9   : > { %s908_s6 = smov (!%p154_p2), 80   ;;  %s909_s7 = smov (!%p154_p2), 8  }
   0xa   : > { %s910_s8 = smov (!%p154_p2), 16   ;;  %s911_s9 = smov (!%p154_p2), 24  }
   0xd   : > { %s1034_s13 = smov (!%p182_p3, %s763_s13), 1 }
   0xe   : > { %s946_s14 = sshll.u32 %s1034_s13, 2  ;;  %s192_s23 = scalar_lea.vmem %s1031_s2, %s1034_s13 }
   0xf   : > { %s189_s17 = scalar_lea.vmem %s1030_s1, %s946_s14  ;;  %s185_s20 = scalar_lea.vmem %s1029_s0, %s946_s14  ;;  %v964_v5 = vld [vmem:[%s192_s23] ss:$0 sm:$0xff] }
  0x10   : > { %v199_v1 = vld [vmem:[%s189_s17] sm:$0xf]  ;;  %s996_s30 = scalar_lea.vmem %s1032_s3, %s946_s14 }
  0x11   : > { %v206_v2 = vsel %vm201_vm1, %v199_v1, 0  ;;  %v198_v3 = vld [vmem:[%s185_s20] sm:$0xf]  ;;  %v968_v12 = vcombine.low %v199_v1, %v199_v1 }
  0x12   : > { %807 = vmatpush3.bf16.xpose.msra.mxu0 %v206_v2  ;;  %v775_v13 = vcombine.low %v198_v3, %v198_v3 }
  0x13   : > { %824 = vmatprep.subr.bf16.mxu0 %v900_v0  ;;  %271 = vrot.lane.b32.xlu1 %v968_v12, %s902_s24 }
  0x17   : > { %328 = vrot.lane.b32.xlu1 %v968_v12, %s903_s25 }
  0x19   : > { %809 = vmatmul.mubr.msk.bf16.vlgmr.msra.gmra.mrb[0].mxu0 %vm201_vm1, %v198_v3 }
  0x1a   : > { %826 = vmatprep.mubr.msk.bf16.mxu0 %vm901_vm0, %v900_v0 }
  0x1b   : > { %449 = vrot.lane.b32.xlu1 %v968_v12, %s904_s26 }
  0x1f   : > { %447 = vrot.lane.b32.xlu1 %v775_v13, %s904_s26 }
  0x23   : > { %570 = vrot.lane.b32.xlu1 %v968_v12, %s905_s27 }
  0x27   : > { %568 = vrot.lane.b32.xlu1 %v775_v13, %s905_s27 }
  0x85   : > { %v272_v19 = vpop.permute.xlu1 %271 }
  0x86   : > { %v278_v20 = vsel %vm276_vm2, %v272_v19, 0 }
  0x87   : > { %813 = vmatpush3.bf16.msra.mxu1 %v278_v20 }
  0x88   : > { %818 = vmatprep.subr.bf16.mxu1 %v900_v0 }
  0x89   : > { %v329_v23 = vpop.permute.xlu1 %328 }
  0x8a   : > { %v334_v25 = vsel %vm201_vm1, %v329_v23, 0 }
  0x8d   : > { %v450_v27 = vpop.permute.xlu1 %449 }
  0x8e   : > { %v455_v30 = vsel %vm201_vm1, %v450_v27, 0 }
  0x91   : > { %v448_v29 = vpop.permute.xlu1 %447 }
  0x95   : > { %v571_v31 = vpop.permute.xlu1 %570 }
  0x96   : > { %v576_v32 = vsel %vm201_vm1, %v571_v31, 0 }
  0x99   : > { %v569_v33 = vpop.permute.xlu1 %568 }
  0xec   : > { %v242_v4 = vpop.f32.mrb[0].mxu0 }
  0xed   : > { %v248_v6 = vmul.f32 0.35355338, %v242_v4  ;;  %v810_v7 = vpop.f32.mrb[1].mxu0 }
  0xee   : > { %v245_v8 = vpop.f32.mrb[2].mxu0 }
  0xef   : > { %v811_v9 = vpop.f32.mrb[3].mxu0  ;;  %v255_v10 = vadd.f32 %v964_v5, %v248_v6 }
  0xf1   : > { %v256_v11 = vsel %vm201_vm1, %v255_v10, -inf }
  0xf2   : > { %257 = vmax.xlane.f32.xlu0 %v256_v11 }
 0x17f   : > { %v258_v14 = vpop.xlane.xlu0 %257 }
 0x180   : > { %v259_v15 = vsub.f32 %v255_v10, %v258_v14 }
 0x182   : > { %v260_v16 = vmul.f32 1.442695, %v259_v15 }
 0x184   : > { %876 = vpow2.f32 %v260_v16 }
 0x18e   : > { %v877_v17 = vpop.eup %876 }
 0x18f   : > { %v262_v18 = vsel %vm201_vm1, %v877_v17, 0.0 }
 0x190   : > { %263 = vadd.xlane.f32.xlu0 %v262_v18 }
 0x1a6   : > { %326 = vrot.lane.b32.xlu0 %v775_v13, %s903_s25 }
 0x21d   : > { %v264_v21 = vpop.xlane.xlu0 %263 }
 0x21e   : > { %878 = vrcp.f32 %v264_v21 }
 0x221   : > { %v327_v28 = vpop.permute.xlu0 %326 }
 0x228   : > { %v879_v22 = vpop.eup %878 }
 0x229   : > { %v266_v24 = vmul.f32 %v879_v22, %v877_v17 }
 0x22b   : > { %v267_v26 = vpack.c.bf16 %v266_v24, %v266_v24 }
 0x22d   : > { %815 = vmatmul.mubr.msk.bf16.vlgmr.msra.gmra.mrb[0].mxu1 %vm201_vm1, %v267_v26 }
 0x22e   : > { %819 = vmatpush3.bf16.xpose.msra.mxu1 %v334_v25  ;;  %820 = vmatprep.mubr.msk.bf16.mxu1 %vm901_vm0, %v900_v0 }
 0x22f   : > { %830 = vmatprep.subr.bf16.mxu1 %v900_v0 }
 0x235   : > { %821 = vmatmul.mubr.msk.bf16.vlgmr.msra.gmra.mrb[4].mxu1 %vm201_vm1, %v327_v28 }
 0x236   : > { %831 = vmatpush3.bf16.xpose.msra.mxu1 %v455_v30  ;;  %832 = vmatprep.mubr.msk.bf16.mxu1 %vm901_vm0, %v900_v0 }
 0x237   : > { %842 = vmatprep.subr.bf16.mxu1 %v900_v0 }
 0x23d   : > { %833 = vmatmul.mubr.msk.bf16.vlgmr.msra.gmra.mrb[8].mxu1 %vm201_vm1, %v448_v29 }
 0x23e   : > { %843 = vmatpush3.bf16.xpose.msra.mxu1 %v576_v32  ;;  %844 = vmatprep.mubr.msk.bf16.mxu1 %vm901_vm0, %v900_v0 }
 0x245   : > { %845 = vmatmul.mubr.msk.bf16.vlgmr.msra.gmra.mrb[12].mxu1 %vm201_vm1, %v569_v33 }
 0x300   : > { %v314_v34 = vpop.f32.mrb[0].mxu1 }
 0x301   : > { %v320_v35 = vpack.c.bf16 %v314_v34, %v314_v34  ;;  %v816_v36 = vpop.f32.mrb[1].mxu1 }
 0x302   : > { %v317_v37 = vpop.f32.mrb[2].mxu1 }
 0x303   : > { %322 = vst.msk [vmem:[%s996_s30] sm:$0xf] %vm321_vm3, %v320_v35  ;;  %v817_v38 = vpop.f32.mrb[3].mxu1 }
 0x308   : > { %v370_v39 = vpop.f32.mrb[4].mxu1 }
 0x309   : > { %v376_v40 = vmul.f32 0.35355338, %v370_v39  ;;  %v822_v41 = vpop.f32.mrb[5].mxu1 }
 0x30a   : > { %v373_v42 = vpop.f32.mrb[6].mxu1 }
 0x30b   : > { %v823_v43 = vpop.f32.mrb[7].mxu1  ;;  %v377_v44 = vadd.f32 %v964_v5, %v376_v40 }
 0x30d   : > { %v378_v45 = vsel %vm201_vm1, %v377_v44, -inf }
 0x30e   : > { %379 = vmax.xlane.f32.xlu1 %v378_v45 }
 0x310   : > { %v491_v46 = vpop.f32.mrb[8].mxu1 }
 0x311   : > { %v497_v47 = vmul.f32 0.35355338, %v491_v46  ;;  %v834_v48 = vpop.f32.mrb[9].mxu1 }
 0x312   : > { %v494_v49 = vpop.f32.mrb[10].mxu1 }
 0x313   : > { %v835_v50 = vpop.f32.mrb[11].mxu1  ;;  %v498_v51 = vadd.f32 %v964_v5, %v497_v47 }
 0x315   : > { %v499_v52 = vsel %vm201_vm1, %v498_v51, -inf }
 0x316   : > { %500 = vmax.xlane.f32.xlu0 %v499_v52 }
 0x318   : > { %v612_v53 = vpop.f32.mrb[12].mxu1 }
 0x319   : > { %v618_v54 = vmul.f32 0.35355338, %v612_v53  ;;  %v846_v55 = vpop.f32.mrb[13].mxu1 }
 0x31a   : > { %v615_v56 = vpop.f32.mrb[14].mxu1 }
 0x31b   : > { %v847_v57 = vpop.f32.mrb[15].mxu1  ;;  %v619_v58 = vadd.f32 %v964_v5, %v618_v54 }
 0x31d   : > { %v620_v59 = vsel %vm201_vm1, %v619_v58, -inf }
 0x31e   : > { %621 = vmax.xlane.f32.xlu1 %v620_v59 }
 0x32f   : > { %390 = vrot.lane.b32.xlu1 %v968_v12, %s906_s4 }
 0x39b   : > { %v380_v60 = vpop.xlane.xlu1 %379 }
 0x39c   : > { %v381_v61 = vsub.f32 %v377_v44, %v380_v60 }
 0x39e   : > { %v382_v62 = vmul.f32 1.442695, %v381_v61 }
 0x3a0   : > { %880 = vpow2.f32 %v382_v62 }
 0x3a3   : > { %v501_v63 = vpop.xlane.xlu0 %500 }
 0x3a4   : > { %v502_v1 = vsub.f32 %v498_v51, %v501_v63 }
 0x3a6   : > { %v503_v2 = vmul.f32 1.442695, %v502_v1 }
 0x3a8   : > { %882 = vpow2.f32 %v503_v2 }
 0x3aa   : > { %v881_v3 = vpop.eup %880 }
 0x3ab   : > { %v622_v4 = vpop.xlane.xlu1 %621  ;;  %v384_v6 = vsel %vm201_vm1, %v881_v3, 0.0 }
 0x3ac   : > { %v623_v7 = vsub.f32 %v619_v58, %v622_v4  ;;  %385 = vadd.xlane.f32.xlu0 %v384_v6 }
 0x3ae   : > { %v624_v5 = vmul.f32 1.442695, %v623_v7 }
 0x3af   : > { %v391_v8 = vpop.permute.xlu1 %390 }
 0x3b0   : > { %884 = vpow2.f32 %v624_v5  ;;  %v396_v9 = vsel %vm276_vm2, %v391_v8, 0 }
 0x3b1   : > { %825 = vmatpush3.bf16.msra.mxu0 %v396_v9 }
 0x3b2   : > { %v883_v10 = vpop.eup %882  ;;  %836 = vmatprep.subr.bf16.mxu0 %v900_v0 }
 0x3b3   : > { %v505_v11 = vsel %vm201_vm1, %v883_v10, 0.0 }
 0x3b4   : > { %506 = vadd.xlane.f32.xlu1 %v505_v11 }
 0x3ba   : > { %v885_v13 = vpop.eup %884 }
 0x3bb   : > { %v626_v14 = vsel %vm201_vm1, %v885_v13, 0.0 }
 0x3bc   : > { %627 = vadd.xlane.f32.xlu0 %v626_v14 }
 0x3c5   : > { %632 = vrot.lane.b32.xlu1 %v968_v12, %s907_s5 }
 0x3d2   : > { %511 = vrot.lane.b32.xlu0 %v968_v12, %s908_s6 }
 0x439   : > { %v386_v15 = vpop.xlane.xlu0 %385 }
 0x43a   : > { %886 = vrcp.f32 %v386_v15 }
 0x441   : > { %v507_v16 = vpop.xlane.xlu1 %506 }
 0x442   : > { %888 = vrcp.f32 %v507_v16 }
 0x444   : > { %v887_v17 = vpop.eup %886 }
 0x445   : > { %v388_v18 = vmul.f32 %v887_v17, %v881_v3  ;;  %v633_v24 = vpop.permute.xlu1 %632 }
 0x446   : > { %v638_v26 = vsel %vm276_vm2, %v633_v24, 0 }
 0x447   : > { %v389_v19 = vpack.c.bf16 %v388_v18, %v388_v18 }
 0x449   : > { %v628_v20 = vpop.xlane.xlu0 %627  ;;  %827 = vmatmul.mubr.msk.bf16.vlgmr.msra.gmra.mrb[4].mxu0 %vm201_vm1, %v389_v19 }
 0x44a   : > { %890 = vrcp.f32 %v628_v20  ;;  %838 = vmatprep.mubr.msk.bf16.mxu0 %vm901_vm0, %v900_v0 }
 0x44c   : > { %v889_v21 = vpop.eup %888 }
 0x44d   : > { %v509_v22 = vmul.f32 %v889_v21, %v883_v10  ;;  %v512_v23 = vpop.permute.xlu0 %511 }
 0x44e   : > { %v517_v12 = vsel %vm276_vm2, %v512_v23, 0 }
 0x44f   : > { %837 = vmatpush3.bf16.msra.mxu0 %v517_v12  ;;  %v510_v25 = vpack.c.bf16 %v509_v22, %v509_v22 }
 0x450   : > { %848 = vmatprep.subr.bf16.mxu0 %v900_v0 }
 0x452   : > { %839 = vmatmul.mubr.msk.bf16.vlgmr.msra.gmra.mrb[8].mxu0 %vm201_vm1, %v510_v25 }
 0x453   : > { %849 = vmatpush3.bf16.msra.mxu0 %v638_v26  ;;  %850 = vmatprep.mubr.msk.bf16.mxu0 %vm901_vm0, %v900_v0 }
 0x454   : > { %v891_v27 = vpop.eup %890 }
 0x455   : > { %v630_v28 = vmul.f32 %v891_v27, %v885_v13 }
 0x457   : > { %v631_v29 = vpack.c.bf16 %v630_v28, %v630_v28 }
 0x45a   : > { %851 = vmatmul.mubr.msk.bf16.vlgmr.msra.gmra.mrb[12].mxu0 %vm201_vm1, %v631_v29 }
 0x51c   : > { %v432_v30 = vpop.f32.mrb[4].mxu0 }
 0x51d   : > { %v787_v31 = vpack.c.bf16 %v432_v30, %v432_v30  ;;  %v828_v32 = vpop.f32.mrb[5].mxu0 }
 0x51e   : > { %v435_v33 = vpop.f32.mrb[6].mxu0 }
 0x51f   : > { %442 = vrot.lane.b32.xlu1 %v787_v31, %s909_s7  ;;  %v829_v34 = vpop.f32.mrb[7].mxu0 }
 0x525   : > { %v553_v35 = vpop.f32.mrb[8].mxu0 }
 0x526   : > { %v788_v36 = vpack.c.bf16 %v553_v35, %v553_v35  ;;  %v840_v37 = vpop.f32.mrb[9].mxu0 }
 0x527   : > { %v556_v38 = vpop.f32.mrb[10].mxu0 }
 0x528   : > { %563 = vrot.lane.b32.xlu0 %v788_v36, %s910_s8  ;;  %v841_v0 = vpop.f32.mrb[11].mxu0 }
 0x52d   : > { %v674_v39 = vpop.f32.mrb[12].mxu0 }
 0x52e   : > { %v789_v40 = vpack.c.bf16 %v674_v39, %v674_v39  ;;  %v852_v41 = vpop.f32.mrb[13].mxu0 }
 0x52f   : > { %v677_v42 = vpop.f32.mrb[14].mxu0 }
 0x530   : > { %684 = vrot.lane.b32.xlu1 %v789_v40, %s911_s9  ;;  %v853_v43 = vpop.f32.mrb[15].mxu0 }
 0x591   : > { %v443_v44 = vpop.permute.xlu1 %442 }
 0x592   : > { %446 = vst.msk [vmem:[%s996_s30] sm:$0xf] %vm445_vm4, %v443_v44 }
 0x59a   : > { %v564_v45 = vpop.permute.xlu0 %563 }
 0x59b   : > { %567 = vst.msk [vmem:[%s996_s30] sm:$0xf] %vm566_vm5, %v564_v45 }
 0x5a2   : > { %v685_v46 = vpop.permute.xlu1 %684 }
 0x5a3   : > { %688 = vst.msk [vmem:[%s996_s30] sm:$0xf] %vm687_vm6, %v685_v46 }
 0x5a4 PF: > { %s13_s12 = sadd.s32 1, %s898_s12  }
 0x5a5   : > { %p10_p4 = scmp.ge.s32.totalorder %s13_s12, 4  }
 0x5a7   :  { %12 = sbr.rel (!%p10_p4) target bundleno = 1 (0x1), region = 68 }

</bundles_post_ra>
